<compile_context>
chip_gen: v7x
topology: tpu7x:2x2x1
jax: 0.10.0
libtpu: 0.0.40
codegen_flags: <defaults>
</compile_context>

<pallas_src>
import functools

import jax
import jax.numpy as jnp
from jax.experimental import pallas as pl
from jax.experimental.pallas import tpu as pltpu

_EPS = 1e-5


def _round_up(x, m):
    return ((x + m - 1) // m) * m


@functools.lru_cache(maxsize=None)
def _vmem_budget():
    """(per-call tile budget, vmem_limit_bytes), gated by physical VMEM size."""
    cap = 64 * 1024 * 1024
    try:  # trace-time hardware query; fall back to conservative v7x sizing.
        cap = int(getattr(pltpu.get_tpu_info(), "vmem_capacity_bytes", cap))
    except Exception:
        pass
    if cap >= 100 * 1024 * 1024:                     # v5e / v6e: 128 MiB physical
        return 72 * 1024 * 1024, 100 * 1024 * 1024
    return 24 * 1024 * 1024, 40 * 1024 * 1024        # v7x: 64 MiB physical


# ----------------------------------------------------------------------------
# Pallas kernels
# ----------------------------------------------------------------------------
def _mm_bias_kernel(a_ref, w_ref, b_ref, o_ref, *, relu):
    acc = jnp.dot(a_ref[...], w_ref[...], preferred_element_type=jnp.float32)
    y = acc + b_ref[...]
    if relu:
        y = jnp.maximum(y, 0.0)
    o_ref[...] = y.astype(o_ref.dtype)


def _mm_bias_res_kernel(a_ref, w_ref, b_ref, r_ref, o_ref, *, relu):
    acc = jnp.dot(a_ref[...], w_ref[...], preferred_element_type=jnp.float32)
    y = acc + b_ref[...] + r_ref[...].astype(jnp.float32)
    if relu:
        y = jnp.maximum(y, 0.0)
    o_ref[...] = y.astype(o_ref.dtype)


def _conv3x3_kernel(x_ref, w_ref, b_ref, o_ref, *, wp, relu):
    """Fused-im2col 3x3/stride-1 conv: 9 shifted windows of the flattened padded
    image, one MXU matmul per tap, f32 accumulation, bias(+ReLU) epilogue."""
    mw = o_ref.shape[0]
    acc = jnp.zeros(o_ref.shape, jnp.float32)
    for ki in range(3):
        for kj in range(3):
            d = ki * wp + kj
            acc += jnp.dot(x_ref[d:d + mw, :], w_ref[ki * 3 + kj],
                           preferred_element_type=jnp.float32)
    y = acc + b_ref[...]
    if relu:
        y = jnp.maximum(y, 0.0)
    o_ref[...] = y.astype(o_ref.dtype)


def _conv3x3_res_kernel(x_ref, w_ref, b_ref, r_ref, o_ref, *, wp, relu):
    mw = o_ref.shape[0]
    acc = jnp.zeros(o_ref.shape, jnp.float32)
    for ki in range(3):
        for kj in range(3):
            d = ki * wp + kj
            acc += jnp.dot(x_ref[d:d + mw, :], w_ref[ki * 3 + kj],
                           preferred_element_type=jnp.float32)
    y = acc + b_ref[...] + r_ref[...].astype(jnp.float32)
    if relu:
        y = jnp.maximum(y, 0.0)
    o_ref[...] = y.astype(o_ref.dtype)


def _maxpool_kernel(p_ref, o_ref):
    """3x3/stride-2 max over 4 phase images (stride folded into the phase split)."""
    oh, ow = o_ref.shape[0], o_ref.shape[1]
    out = None
    for ki in range(3):
        for kj in range(3):
            v = p_ref[(ki % 2) * 2 + (kj % 2),
                      ki // 2:ki // 2 + oh, kj // 2:kj // 2 + ow, :]
            out = v if out is None else jnp.maximum(out, v)
    o_ref[...] = out


def _mean_hw_kernel(x_ref, o_ref, *, inv_hw):
    @pl.when(pl.program_id(1) == 0)
    def _():
        o_ref[...] = jnp.zeros_like(o_ref)
    o_ref[...] += jnp.sum(x_ref[...].astype(jnp.float32), axis=1) * inv_hw


# ----------------------------------------------------------------------------
# Kernel wrappers
# ----------------------------------------------------------------------------
def fused_matmul_bias(a, w, bias, *, relu=False, residual=None,
                      out_dtype=jnp.bfloat16):
    """maybe_relu(a @ w + bias [+ residual]); bf16 operands, f32 accumulation."""
    m, k = a.shape
    oc = w.shape[1]
    a = a.astype(jnp.bfloat16)
    out_b = jnp.dtype(out_dtype).itemsize

    if oc % 256 == 0:
        toc = 256
    elif oc % 128 == 0:
        toc = 128
    else:
        toc = oc

    budget, vmem_limit = _vmem_budget()
    if m <= 128:
        tm = _round_up(m, 8)
    else:
        tm = 128
        for cand in (1024, 512, 384, 256, 128):
            if cand > _round_up(m, 128):
                continue
            need = (2 * cand * k * 2 + 2 * k * toc * 2 + 2 * cand * toc * out_b
                    + cand * toc * 4
                    + (2 * cand * toc * 2 if residual is not None else 0))
            if need <= budget:
                tm = cand
                break
    m_pad = _round_up(m, tm)
    m_tiles, oc_tiles = m_pad // tm, oc // toc

    # v7x megacore: prefer >= 2 parallel tiles when the grid would collapse.
    if m_tiles * oc_tiles < 2:
        if toc > 128 and oc % 128 == 0:
            toc, oc_tiles = 128, oc // 128
        elif tm >= 256:
            tm //= 2
            m_pad = _round_up(m, tm)
            m_tiles = m_pad // tm

    if m_pad != m:
        a = jnp.pad(a, ((0, m_pad - m), (0, 0)))
        if residual is not None:
            residual = jnp.pad(residual, ((0, m_pad - m), (0, 0)))

    # Grid order: keep the larger operand resident (avoid weight re-streaming).
    lhs_bytes = m_pad * k * 2
    w_bytes = k * oc * 2
    t_m_outer = lhs_bytes + (m_tiles if oc_tiles > 1 else 1) * w_bytes
    t_w_outer = w_bytes + (oc_tiles if m_tiles > 1 else 1) * lhs_bytes
    weights_outer = t_w_outer < t_m_outer

    if weights_outer:
        grid = (oc_tiles, m_tiles)
        a_map = lambda j, i: (i, 0)
        w_map = lambda j, i: (0, j)
        b_map = lambda j, i: (0, j)
        o_map = lambda j, i: (i, j)
    else:
        grid = (m_tiles, oc_tiles)
        a_map = lambda i, j: (i, 0)
        w_map = lambda i, j: (0, j)
        b_map = lambda i, j: (0, j)
        o_map = lambda i, j: (i, j)

    in_specs = [pl.BlockSpec((tm, k), a_map),
                pl.BlockSpec((k, toc), w_map),
                pl.BlockSpec((1, toc), b_map)]
    args = [a, w, bias]
    if residual is not None:
        in_specs.append(pl.BlockSpec((tm, toc), o_map))
        args.append(residual)
        kern = functools.partial(_mm_bias_res_kernel, relu=relu)
    else:
        kern = functools.partial(_mm_bias_kernel, relu=relu)

    bytes_accessed = (m_pad * k * 2 + k * oc * 2 + oc * 4 + m_pad * oc * out_b
                      + (m_pad * oc * 2 if residual is not None else 0))
    out = pl.pallas_call(
        kern,
        out_shape=jax.ShapeDtypeStruct((m_pad, oc), out_dtype),
        grid=grid,
        in_specs=in_specs,
        out_specs=pl.BlockSpec((tm, toc), o_map),
        compiler_params=pltpu.CompilerParams(
            dimension_semantics=("parallel", "parallel"),
            vmem_limit_bytes=vmem_limit),
        cost_estimate=pl.CostEstimate(
            flops=2 * m_pad * k * oc, transcendentals=0,
            bytes_accessed=bytes_accessed),
    )(*args)
    return out[:m] if m_pad != m else out


def _im2col(x, kh, kw, stride, pad):
    """NHWC -> (N*OH*OW, KH*KW*C) patches, tap-major (matches w.reshape(KH*KW*C, OC))."""
    n, h, w, c = x.shape
    oh = (h + 2 * pad - kh) // stride + 1
    ow = (w + 2 * pad - kw) // stride + 1
    if pad:
        x = jnp.pad(x, ((0, 0), (pad, pad), (pad, pad), (0, 0)))
    cols = [x[:, i:i + stride * oh:stride, j:j + stride * ow:stride, :]
            for i in range(kh) for j in range(kw)]
    patches = jnp.stack(cols, axis=3)                 # (n, oh, ow, kh*kw, c)
    return patches.reshape(n * oh * ow, kh * kw * c), (n, oh, ow)


def conv_im2col(x, layer, kh, kw, stride, pad, relu, residual=None):
    """Conv + folded BN [+ residual] [+ ReLU] via materialized im2col patches.
    Only used for the 7x7/s2 stem and 3x3/s2 downsampling convs (and as a
    fall-back for the fused kernel on extremely large images)."""
    c = x.shape[-1]
    oc = layer["w"].shape[-1]
    patches, (n, oh, ow) = _im2col(x.astype(jnp.bfloat16), kh, kw, stride, pad)
    w2d = layer["w"].reshape(kh * kw * c, oc)
    res = residual.reshape(n * oh * ow, oc) if residual is not None else None
    out = fused_matmul_bias(patches, w2d, layer["b"], relu=relu, residual=res)
    return out.reshape(n, oh, ow, oc)


def conv3x3_s1(x, layer, *, relu, residual=None):
    """3x3/stride-1/pad-1 Conv + folded BN [+ residual] [+ ReLU], im2col fused
    into the kernel.

    The padded image is flattened to (Hp*Wp, C): tap (ki,kj) is then a contiguous
    window of the flat array shifted by ki*Wp+kj.  The kernel produces a 'wide'
    output that includes the 2 pad columns per row (garbage); those are sliced
    off afterwards (the slice fuses with the next layer's pad in XLA).
    """
    n, h, w, c = x.shape
    oc = layer["w"].shape[-1]
    wp = w + 2
    m_wide = h * wp
    flat_len = (h + 3) * wp          # +1 extra zero row = overrun guard for the last taps

    if oc % 256 == 0:
        toc = 256
    elif oc % 128 == 0:
        toc = 128
    else:
        toc = oc
    budget, vmem_limit = _vmem_budget()

    def est(toc_):
        return (2 * flat_len * c * 2 + 2 * 9 * c * toc_ * 2
                + 2 * m_wide * toc_ * 2 + m_wide * toc_ * 4
                + (2 * m_wide * toc_ * 2 if residual is not None else 0))

    if est(toc) > budget:
        if toc > 128 and oc % 128 == 0 and est(128) <= budget:
            toc = 128
        else:
            # TODO(synk): tile the fused conv over halo'd row blocks for very
            # large images instead of falling back to materialized im2col.
            return conv_im2col(x, layer, 3, 3, 1, 1, relu, residual)

    oc_tiles = oc // toc
    if n * oc_tiles < 2 and toc > 128 and oc % 128 == 0:
        toc, oc_tiles = 128, oc // 128           # keep v7x's second core busy

    xp = jnp.pad(x.astype(jnp.bfloat16), ((0, 0), (1, 2), (1, 1), (0, 0)))
    xflat = xp.reshape(n, flat_len, c)

    args = [xflat, layer["w"], layer["b"]]
    if residual is not None:
        r = jnp.pad(residual.astype(jnp.bfloat16), ((0, 0), (0, 0), (0, 2), (0, 0)))
        args.append(r.reshape(n, m_wide, oc))

    # Grid order: keep the larger operand resident across the inner axis.
    lhs_bytes = n * flat_len * c * 2
    w_bytes = 9 * c * oc * 2
    t_samples_outer = lhs_bytes + (n if oc_tiles > 1 else 1) * w_bytes
    t_weights_outer = w_bytes + (oc_tiles if n > 1 else 1) * lhs_bytes
    weights_outer = t_weights_outer < t_samples_outer

    if weights_outer:
        grid = (oc_tiles, n)
        x_map = lambda j, i: (i, 0, 0)
        w_map = lambda j, i: (0, 0, j)
        b_map = lambda j, i: (0, j)
        o_map = lambda j, i: (i, 0, j)
    else:
        grid = (n, oc_tiles)
        x_map = lambda i, j: (i, 0, 0)
        w_map = lambda i, j: (0, 0, j)
        b_map = lambda i, j: (0, j)
        o_map = lambda i, j: (i, 0, j)

    in_specs = [pl.BlockSpec((None, flat_len, c), x_map),
                pl.BlockSpec((9, c, toc), w_map),
                pl.BlockSpec((1, toc), b_map)]
    if residual is not None:
        in_specs.append(pl.BlockSpec((None, m_wide, toc), o_map))
        kern = functools.partial(_conv3x3_res_kernel, wp=wp, relu=relu)
    else:
        kern = functools.partial(_conv3x3_kernel, wp=wp, relu=relu)

    bytes_accessed = (n * flat_len * c * 2 + 9 * c * oc * 2 + oc * 4
                      + n * m_wide * oc * 2
                      + (n * m_wide * oc * 2 if residual is not None else 0))
    out = pl.pallas_call(
        kern,
        out_shape=jax.ShapeDtypeStruct((n, m_wide, oc), jnp.bfloat16),
        grid=grid,
        in_specs=in_specs,
        out_specs=pl.BlockSpec((None, m_wide, toc), o_map),
        compiler_params=pltpu.CompilerParams(
            dimension_semantics=("parallel", "parallel"),
            vmem_limit_bytes=vmem_limit),
        cost_estimate=pl.CostEstimate(
            flops=2 * n * m_wide * 9 * c * oc, transcendentals=0,
            bytes_accessed=bytes_accessed),
    )(*args)
    return out.reshape(n, h, wp, oc)[:, :, :w, :]


def conv1x1(x, layer, stride, relu=False):
    """1x1 Conv + folded BN (downsample path); stride is a cheap subsample."""
    if stride != 1:
        x = x[:, ::stride, ::stride, :]
    n, h, w, c = x.shape
    oc = layer["w"].shape[-1]
    out = fused_matmul_bias(x.reshape(n * h * w, c), layer["w"][0], layer["b"],
                            relu=relu)
    return out.reshape(n, h, w, oc)


def max_pool_3x3_s2_p1(x):
    """MaxPool2d(kernel=3, stride=2, padding=1) on NHWC.

    Stride-2 is folded into a 2x2 phase split (one ~input-sized XLA pass, no 9x
    window blow-up); the Pallas kernel then takes the 3x3 max with contiguous
    shifted slices of the 4 phase images.
    """
    n, h, w, c = x.shape
    oh = (h - 1) // 2 + 1
    ow = (w - 1) // 2 + 1
    hp = 2 * (oh + 1)
    wpd = 2 * (ow + 1)
    xp = jnp.pad(x, ((0, 0), (1, hp - h - 1), (1, wpd - w - 1), (0, 0)),
                 constant_values=-jnp.inf)

    budget, vmem_limit = _vmem_budget()
    if 2 * 4 * (oh + 1) * (ow + 1) * c * x.dtype.itemsize > budget:
        # Huge-image fall-back: fused XLA maximum tree (single HBM pass).
        out = None
        for ki in range(3):
            for kj in range(3):
                v = xp[:, ki:ki + 2 * oh:2, kj:kj + 2 * ow:2, :]
                out = v if out is None else jnp.maximum(out, v)
        return out

    phases = jnp.stack([xp[:, pi::2, pj::2, :] for pi in (0, 1) for pj in (0, 1)],
                       axis=1)                             # (n, 4, oh+1, ow+1, c)
    return pl.pallas_call(
        _maxpool_kernel,
        out_shape=jax.ShapeDtypeStruct((n, oh, ow, c), x.dtype),
        grid=(n,),
        in_specs=[pl.BlockSpec((None, 4, oh + 1, ow + 1, c),
                               lambda i: (i, 0, 0, 0, 0))],
        out_specs=pl.BlockSpec((None, oh, ow, c), lambda i: (i, 0, 0, 0)),
        compiler_params=pltpu.CompilerParams(
            dimension_semantics=("parallel",),
            vmem_limit_bytes=vmem_limit),
    )(phases)


def global_avg_pool(x):
    """AdaptiveAvgPool2d((1,1)) + flatten -> lane-dense (N, C) float32."""
    n, h, w, c = x.shape
    hw = h * w
    flat = x.reshape(n, hw, c)
    budget, vmem_limit = _vmem_budget()

    tn = n if n <= 8 else 8
    n_pad = _round_up(n, tn)
    thw = _round_up(hw, 8)
    while thw > 8 and 2 * tn * thw * c * flat.dtype.itemsize > budget // 2:
        thw = _round_up(thw // 2, 8)
    hw_pad = _round_up(hw, thw)
    if (n_pad, hw_pad) != (n, hw):
        flat = jnp.pad(flat, ((0, n_pad - n), (0, hw_pad - hw), (0, 0)))

    out = pl.pallas_call(
        functools.partial(_mean_hw_kernel, inv_hw=1.0 / hw),
        out_shape=jax.ShapeDtypeStruct((n_pad, c), jnp.float32),
        grid=(n_pad // tn, hw_pad // thw),
        in_specs=[pl.BlockSpec((tn, thw, c), lambda i, j: (i, j, 0))],
        out_specs=pl.BlockSpec((tn, c), lambda i, j: (i, 0)),
        compiler_params=pltpu.CompilerParams(
            dimension_semantics=("parallel", "arbitrary"),
            vmem_limit_bytes=vmem_limit),
    )(flat)
    return out[:n] if n_pad != n else out


# ----------------------------------------------------------------------------
# ResNet (BasicBlock, expansion = 1)
# ----------------------------------------------------------------------------
def basic_block(x, blk, stride):
    identity = x
    if "down" in blk:
        identity = conv1x1(x, blk["down"], stride)
    if stride == 1:
        h1 = conv3x3_s1(x, blk["conv1"], relu=True)
    else:
        # TODO(synk): stride-2 3x3 still uses the materialized-im2col path.
        h1 = conv_im2col(x, blk["conv1"], 3, 3, stride, 1, relu=True)
    # conv2 + bn2 + residual-add + relu, fused in one kernel.
    return conv3x3_s1(h1, blk["conv2"], relu=True, residual=identity)


def resnet_forward(params, x_nchw, block_strides, classification_head=False):
    x = jnp.transpose(x_nchw, (0, 2, 3, 1)).astype(jnp.bfloat16)  # one transpose+cast
    x = conv_im2col(x, params["conv1"], 7, 7, 2, 3, relu=True)
    x = max_pool_3x3_s2_p1(x)
    for stage, strides in zip(params["stages"], block_strides):
        for blk, s in zip(stage, strides):
            x = basic_block(x, blk, s)
    x = global_avg_pool(x)                       # (N, C) == x.reshape(N, -1), f32
    if classification_head:
        x = fused_matmul_bias(x, params["fc"]["w"], params["fc"]["b"],
                              relu=False, out_dtype=jnp.float32)
    return x


# ----------------------------------------------------------------------------
# Parameters: raw (PyTorch-equivalent) init + offline prep (fold/cast)
# ----------------------------------------------------------------------------
def init_params(key, layer_list, stride_list, planes_list, num_channels=3,
                num_classes=10, classification_head=False, expansion=1):
    keys = iter(jax.random.split(key, 512))

    def conv_w(oc, ic, k):
        fan_in = ic * k * k
        return jax.random.normal(next(keys), (oc, ic, k, k), jnp.float32) / jnp.sqrt(fan_in)

    def bn(c):
        return dict(
            gamma=1.0 + 0.1 * jax.random.normal(next(keys), (c,), jnp.float32),
            beta=0.1 * jax.random.normal(next(keys), (c,), jnp.float32),
            mean=0.1 * jax.random.normal(next(keys), (c,), jnp.float32),
            var=1.0 + 0.1 * jax.random.uniform(next(keys), (c,), jnp.float32),
        )

    params = dict(conv1=conv_w(64, num_channels, 7), bn1=bn(64), stages=[])
    in_c = 64
    for blocks, stride, planes in zip(layer_list, stride_list, planes_list):
        stage = []
        for bi in range(blocks):
            s = stride if bi == 0 else 1
            blk = dict(stride=s,
                       conv1=conv_w(planes, in_c, 3), bn1=bn(planes),
                       conv2=conv_w(planes, planes, 3), bn2=bn(planes))
            if s != 1 or in_c != planes * expansion:
                blk["down_conv"] = conv_w(planes * expansion, in_c, 1)
                blk["down_bias"] = 0.1 * jax.random.normal(
                    next(keys), (planes * expansion,), jnp.float32)
                blk["down_bn"] = bn(planes * expansion)
            stage.append(blk)
            in_c = planes * expansion
        params["stages"].append(stage)
    if classification_head:
        params["fc_w"] = jax.random.normal(
            next(keys), (num_classes, 512 * expansion), jnp.float32) / jnp.sqrt(512 * expansion)
        params["fc_b"] = jnp.zeros((num_classes,), jnp.float32)
    return params


def prepare_params(raw):
    """Fold BN scale into (KH*KW, Cin, OC) bf16 weights + f32 bias (eval mode).

    Returns (params, block_strides): an arrays-only pytree plus a static nested
    tuple of per-block strides (so the forward can be jitted cleanly).
    """
    def prep(w_oihw, bn, conv_bias=None):
        oc, ic, kh, kw = w_oihw.shape
        scale = bn["gamma"] / jnp.sqrt(bn["var"] + _EPS)
        bias = bn["beta"] - bn["mean"] * scale
        if conv_bias is not None:
            bias = bias + conv_bias * scale
        wt = jnp.transpose(w_oihw, (2, 3, 1, 0)).reshape(kh * kw, ic, oc)
        wt = wt * scale[None, None, :]
        return dict(w=wt.astype(jnp.bfloat16),
                    b=bias.reshape(1, oc).astype(jnp.float32))

    params = dict(conv1=prep(raw["conv1"], raw["bn1"]), stages=[])
    strides = []
    for stage in raw["stages"]:
        pstage, sstage = [], []
        for blk in stage:
            p = dict(conv1=prep(blk["conv1"], blk["bn1"]),
                     conv2=prep(blk["conv2"], blk["bn2"]))
            if "down_conv" in blk:
                p["down"] = prep(blk["down_conv"], blk["down_bn"],
                                 conv_bias=blk["down_bias"])
            pstage.append(p)
            sstage.append(blk["stride"])
        params["stages"].append(pstage)
        strides.append(tuple(sstage))
    if "fc_w" in raw:
        oc = raw["fc_w"].shape[0]
        params["fc"] = dict(w=raw["fc_w"].T.astype(jnp.bfloat16),
                            b=raw["fc_b"].reshape(1, oc).astype(jnp.float32))
    return params, tuple(strides)


if __name__ == "__main__":
    key = jax.random.PRNGKey(0)
    kx, kp = jax.random.split(key)

    # Small ResNet: layers=[1,1], strides=[1,2], planes=[64,128], no fc head
    # (classification_head=False -> nn.Identity, matching the module default).
    x = jax.random.normal(kx, (2, 3, 32, 32), jnp.float32)
    raw = init_params(kp, layer_list=[1, 1], stride_list=[1, 2],
                      planes_list=[64, 128], num_channels=3,
                      num_classes=10, classification_head=False)
    params, block_strides = prepare_params(raw)

    fwd = jax.jit(resnet_forward, static_argnums=(2, 3))
    out = fwd(params, x, block_strides, False)
    jax.block_until_ready(out)

    assert out.shape == (2, 128), out.shape
    assert out.dtype == jnp.float32
    print("KERNEL_OK")
</pallas_src>

<mosaic_0001>
module attributes {stable_mosaic.version = 11 : i64} {
  func.func @_mm_bias_kernel(%arg0: i32, %arg1: i32, %arg2: memref<256x147xbf16, #tpu.memory_space<vmem>>, %arg3: memref<147x64xbf16, #tpu.memory_space<vmem>>, %arg4: memref<1x64xf32, #tpu.memory_space<vmem>>, %arg5: memref<256x64xbf16, #tpu.memory_space<vmem>>) attributes {dimension_semantics = [#tpu.dimension_semantics<parallel>, #tpu.dimension_semantics<parallel>], iteration_bounds = array<i64: 2, 1>, scalar_prefetch = 0 : i64, scratch_operands = 0 : i64, tpu.core_type = #tpu.core_type<tc>, window_params = [{transform_indices = @transform_0, window_bounds = array<i64: 256, 147>}, {transform_indices = @transform_1, window_bounds = array<i64: 147, 64>}, {transform_indices = @transform_2, window_bounds = array<i64: 1, 64>}, {transform_indices = @transform_3, window_bounds = array<i64: 256, 64>}]} {
    %c0 = arith.constant 0 : index
    %c0_0 = arith.constant 0 : index
    %0 = vector.load %arg2[%c0, %c0_0] : memref<256x147xbf16, #tpu.memory_space<vmem>>, vector<256x147xbf16>
    %c0_1 = arith.constant 0 : index
    %c0_2 = arith.constant 0 : index
    %1 = vector.load %arg3[%c0_1, %c0_2] : memref<147x64xbf16, #tpu.memory_space<vmem>>, vector<147x64xbf16>
    %cst = arith.constant dense<0.000000e+00> : vector<256x64xf32>
    %2 = tpu.matmul %0, %1, %cst {dimension_numbers = #tpu.dot_dimension_numbers<[1], [0], [0], [1], [0, 0, 1, 1], [], []>} : vector<256x147xbf16>, vector<147x64xbf16>, vector<256x64xf32> -> vector<256x64xf32>
    %c0_3 = arith.constant 0 : index
    %c0_4 = arith.constant 0 : index
    %3 = vector.load %arg4[%c0_3, %c0_4] : memref<1x64xf32, #tpu.memory_space<vmem>>, vector<1x64xf32>
    %4 = vector.broadcast %3 : vector<1x64xf32> to vector<256x64xf32>
    %5 = arith.addf %2, %4 : vector<256x64xf32>
    %cst_5 = arith.constant 0.000000e+00 : f32
    %6 = vector.broadcast %cst_5 : f32 to vector<256x64xf32>
    %7 = arith.maximumf %5, %6 : vector<256x64xf32>
    %8 = arith.truncf %7 : vector<256x64xf32> to vector<256x64xbf16>
    %c0_6 = arith.constant 0 : index
    %c0_7 = arith.constant 0 : index
    %9 = vector.load %arg5[%c0_6, %c0_7] : memref<256x64xbf16, #tpu.memory_space<vmem>>, vector<256x64xbf16>
    tpu.vector_store %arg5[%c0_6, %c0_7], %8 {strides = array<i32>} : memref<256x64xbf16, #tpu.memory_space<vmem>>, vector<256x64xbf16>,
    return
  }
  func.func @transform_0(%arg0: i32, %arg1: i32) -> (i32, i32) {
    %c0_i32 = arith.constant 0 : i32
    %c0_i32_0 = arith.constant 0 : i32
    return %arg0, %c0_i32 : i32, i32
  }
  func.func @transform_1(%arg0: i32, %arg1: i32) -> (i32, i32) {
    %c0_i32 = arith.constant 0 : i32
    %c0_i32_0 = arith.constant 0 : i32
    return %c0_i32, %arg1 : i32, i32
  }
  func.func @transform_2(%arg0: i32, %arg1: i32) -> (i32, i32) {
    %c0_i32 = arith.constant 0 : i32
    %c0_i32_0 = arith.constant 0 : i32
    return %c0_i32, %arg1 : i32, i32
  }
  func.func @transform_3(%arg0: i32, %arg1: i32) -> (i32, i32) {
    %c0_i32 = arith.constant 0 : i32
    return %arg0, %arg1 : i32, i32
  }
}

module attributes {stable_mosaic.version = 11 : i64} {
  func.func @_maxpool_kernel(%arg0: i32, %arg1: memref<1x4x9x9x64xbf16, #tpu.memory_space<vmem>>, %arg2: memref<1x8x8x64xbf16, #tpu.memory_space<vmem>>) attributes {dimension_semantics = [#tpu.dimension_semantics<parallel>], iteration_bounds = array<i64: 2>, scalar_prefetch = 0 : i64, scratch_operands = 0 : i64, tpu.core_type = #tpu.core_type<tc>, window_params = [{transform_indices = @transform_0, window_bounds = array<i64: 1, 4, 9, 9, 64>}, {transform_indices = @transform_1, window_bounds = array<i64: 1, 8, 8, 64>}]} {
    %c0 = arith.constant 0 : index
    %c0_0 = arith.constant 0 : index
    %c0_1 = arith.constant 0 : index
    %c0_2 = arith.constant 0 : index
    %c0_3 = arith.constant 0 : index
    %0 = vector.load %arg1[%c0, %c0_0, %c0_1, %c0_2, %c0_3] : memref<1x4x9x9x64xbf16, #tpu.memory_space<vmem>>, vector<1x1x8x8x64xbf16>
    %1 = vector.shape_cast %0 : vector<1x1x8x8x64xbf16> to vector<8x8x64xbf16>
    %c0_4 = arith.constant 0 : index
    %c1 = arith.constant 1 : index
    %c0_5 = arith.constant 0 : index
    %c0_6 = arith.constant 0 : index
    %c0_7 = arith.constant 0 : index
    %2 = vector.load %arg1[%c0_4, %c1, %c0_5, %c0_6, %c0_7] : memref<1x4x9x9x64xbf16, #tpu.memory_space<vmem>>, vector<1x1x8x8x64xbf16>
    %3 = vector.shape_cast %2 : vector<1x1x8x8x64xbf16> to vector<8x8x64xbf16>
    %4 = arith.maximumf %1, %3 : vector<8x8x64xbf16>
    %c0_8 = arith.constant 0 : index
    %c0_9 = arith.constant 0 : index
    %c0_10 = arith.constant 0 : index
    %c1_11 = arith.constant 1 : index
    %c0_12 = arith.constant 0 : index
    %5 = vector.load %arg1[%c0_8, %c0_9, %c0_10, %c1_11, %c0_12] : memref<1x4x9x9x64xbf16, #tpu.memory_space<vmem>>, vector<1x1x8x8x64xbf16>
    %6 = vector.shape_cast %5 : vector<1x1x8x8x64xbf16> to vector<8x8x64xbf16>
    %7 = arith.maximumf %4, %6 : vector<8x8x64xbf16>
    %c0_13 = arith.constant 0 : index
    %c2 = arith.constant 2 : index
    %c0_14 = arith.constant 0 : index
    %c0_15 = arith.constant 0 : index
    %c0_16 = arith.constant 0 : index
    %8 = vector.load %arg1[%c0_13, %c2, %c0_14, %c0_15, %c0_16] : memref<1x4x9x9x64xbf16, #tpu.memory_space<vmem>>, vector<1x1x8x8x64xbf16>
    %9 = vector.shape_cast %8 : vector<1x1x8x8x64xbf16> to vector<8x8x64xbf16>
    %10 = arith.maximumf %7, %9 : vector<8x8x64xbf16>
    %c0_17 = arith.constant 0 : index
    %c3 = arith.constant 3 : index
    %c0_18 = arith.constant 0 : index
    %c0_19 = arith.constant 0 : index
    %c0_20 = arith.constant 0 : index
    %11 = vector.load %arg1[%c0_17, %c3, %c0_18, %c0_19, %c0_20] : memref<1x4x9x9x64xbf16, #tpu.memory_space<vmem>>, vector<1x1x8x8x64xbf16>
    %12 = vector.shape_cast %11 : vector<1x1x8x8x64xbf16> to vector<8x8x64xbf16>
    %13 = arith.maximumf %10, %12 : vector<8x8x64xbf16>
    %c0_21 = arith.constant 0 : index
    %c2_22 = arith.constant 2 : index
    %c0_23 = arith.constant 0 : index
    %c1_24 = arith.constant 1 : index
    %c0_25 = arith.constant 0 : index
    %14 = vector.load %arg1[%c0_21, %c2_22, %c0_23, %c1_24, %c0_25] : memref<1x4x9x9x64xbf16, #tpu.memory_space<vmem>>, vector<1x1x8x8x64xbf16>
    %15 = vector.shape_cast %14 : vector<1x1x8x8x64xbf16> to vector<8x8x64xbf16>
    %16 = arith.maximumf %13, %15 : vector<8x8x64xbf16>
    %c0_26 = arith.constant 0 : index
    %c0_27 = arith.constant 0 : index
    %c1_28 = arith.constant 1 : index
    %c0_29 = arith.constant 0 : index
    %c0_30 = arith.constant 0 : index
    %17 = vector.load %arg1[%c0_26, %c0_27, %c1_28, %c0_29, %c0_30] : memref<1x4x9x9x64xbf16, #tpu.memory_space<vmem>>, vector<1x1x8x8x64xbf16>
    %18 = vector.shape_cast %17 : vector<1x1x8x8x64xbf16> to vector<8x8x64xbf16>
    %19 = arith.maximumf %16, %18 : vector<8x8x64xbf16>
    %c0_31 = arith.constant 0 : index
    %c1_32 = arith.constant 1 : index
    %c1_33 = arith.constant 1 : index
    %c0_34 = arith.constant 0 : index
    %c0_35 = arith.constant 0 : index
    %20 = vector.load %arg1[%c0_31, %c1_32, %c1_33, %c0_34, %c0_35] : memref<1x4x9x9x64xbf16, #tpu.memory_space<vmem>>, vector<1x1x8x8x64xbf16>
    %21 = vector.shape_cast %20 : vector<1x1x8x8x64xbf16> to vector<8x8x64xbf16>
    %22 = arith.maximumf %19, %21 : vector<8x8x64xbf16>
    %c0_36 = arith.constant 0 : index
    %c0_37 = arith.constant 0 : index
    %c1_38 = arith.constant 1 : index
    %c1_39 = arith.constant 1 : index
    %c0_40 = arith.constant 0 : index
    %23 = vector.load %arg1[%c0_36, %c0_37, %c1_38, %c1_39, %c0_40] : memref<1x4x9x9x64xbf16, #tpu.memory_space<vmem>>, vector<1x1x8x8x64xbf16>
    %24 = vector.shape_cast %23 : vector<1x1x8x8x64xbf16> to vector<8x8x64xbf16>
    %25 = arith.maximumf %22, %24 : vector<8x8x64xbf16>
    %c0_41 = arith.constant 0 : index
    %c0_42 = arith.constant 0 : index
    %c0_43 = arith.constant 0 : index
    %c0_44 = arith.constant 0 : index
    %26 = vector.load %arg2[%c0_41, %c0_42, %c0_43, %c0_44] : memref<1x8x8x64xbf16, #tpu.memory_space<vmem>>, vector<1x8x8x64xbf16>
    %27 = vector.shape_cast %26 : vector<1x8x8x64xbf16> to vector<8x8x64xbf16>
    %28 = vector.shape_cast %25 : vector<8x8x64xbf16> to vector<1x8x8x64xbf16>
    tpu.vector_store %arg2[%c0_41, %c0_42, %c0_43, %c0_44], %28 {strides = array<i32>} : memref<1x8x8x64xbf16, #tpu.memory_space<vmem>>, vector<1x8x8x64xbf16>,
    return
  }
  func.func @transform_0(%arg0: i32) -> (i32, i32, i32, i32, i32) {
    %c0_i32 = arith.constant 0 : i32
    %c0_i32_0 = arith.constant 0 : i32
    %c0_i32_1 = arith.constant 0 : i32
    %c0_i32_2 = arith.constant 0 : i32
    %c0_i32_3 = arith.constant 0 : i32
    return %arg0, %c0_i32, %c0_i32_0, %c0_i32_1, %c0_i32_2 : i32, i32, i32, i32, i32
  }
  func.func @transform_1(%arg0: i32) -> (i32, i32, i32, i32) {
    %c0_i32 = arith.constant 0 : i32
    %c0_i32_0 = arith.constant 0 : i32
    %c0_i32_1 = arith.constant 0 : i32
    %c0_i32_2 = arith.constant 0 : i32
    return %arg0, %c0_i32, %c0_i32_0, %c0_i32_1 : i32, i32, i32, i32
  }
}

module attributes {stable_mosaic.version = 11 : i64} {
  func.func @_conv3x3_kernel(%arg0: i32, %arg1: i32, %arg2: memref<1x110x64xbf16, #tpu.memory_space<vmem>>, %arg3: memref<9x64x64xbf16, #tpu.memory_space<vmem>>, %arg4: memref<1x64xf32, #tpu.memory_space<vmem>>, %arg5: memref<1x80x64xbf16, #tpu.memory_space<vmem>>) attributes {dimension_semantics = [#tpu.dimension_semantics<parallel>, #tpu.dimension_semantics<parallel>], iteration_bounds = array<i64: 2, 1>, scalar_prefetch = 0 : i64, scratch_operands = 0 : i64, tpu.core_type = #tpu.core_type<tc>, window_params = [{transform_indices = @transform_0, window_bounds = array<i64: 1, 110, 64>}, {transform_indices = @transform_1, window_bounds = array<i64: 9, 64, 64>}, {transform_indices = @transform_2, window_bounds = array<i64: 1, 64>}, {transform_indices = @transform_3, window_bounds = array<i64: 1, 80, 64>}]} {
    %cst = arith.constant 0.000000e+00 : f32
    %0 = vector.broadcast %cst : f32 to vector<80x64xf32>
    %c0 = arith.constant 0 : index
    %c0_0 = arith.constant 0 : index
    %c0_1 = arith.constant 0 : index
    %1 = vector.load %arg2[%c0, %c0_0, %c0_1] : memref<1x110x64xbf16, #tpu.memory_space<vmem>>, vector<1x80x64xbf16>
    %2 = vector.shape_cast %1 : vector<1x80x64xbf16> to vector<80x64xbf16>
    %c0_2 = arith.constant 0 : index
    %c0_3 = arith.constant 0 : index
    %c0_4 = arith.constant 0 : index
    %3 = vector.load %arg3[%c0_2, %c0_3, %c0_4] : memref<9x64x64xbf16, #tpu.memory_space<vmem>>, vector<1x64x64xbf16>
    %4 = vector.shape_cast %3 : vector<1x64x64xbf16> to vector<64x64xbf16>
    %cst_5 = arith.constant dense<0.000000e+00> : vector<80x64xf32>
    %5 = tpu.matmul %2, %4, %cst_5 {dimension_numbers = #tpu.dot_dimension_numbers<[1], [0], [0], [1], [0, 0, 1, 1], [], []>} : vector<80x64xbf16>, vector<64x64xbf16>, vector<80x64xf32> -> vector<80x64xf32>
    %6 = arith.addf %0, %5 : vector<80x64xf32>
    %c0_6 = arith.constant 0 : index
    %c1 = arith.constant 1 : index
    %c0_7 = arith.constant 0 : index
    %7 = vector.load %arg2[%c0_6, %c1, %c0_7] : memref<1x110x64xbf16, #tpu.memory_space<vmem>>, vector<1x80x64xbf16>
    %8 = vector.shape_cast %7 : vector<1x80x64xbf16> to vector<80x64xbf16>
    %c1_8 = arith.constant 1 : index
    %c0_9 = arith.constant 0 : index
    %c0_10 = arith.constant 0 : index
    %9 = vector.load %arg3[%c1_8, %c0_9, %c0_10] : memref<9x64x64xbf16, #tpu.memory_space<vmem>>, vector<1x64x64xbf16>
    %10 = vector.shape_cast %9 : vector<1x64x64xbf16> to vector<64x64xbf16>
    %cst_11 = arith.constant dense<0.000000e+00> : vector<80x64xf32>
    %11 = tpu.matmul %8, %10, %cst_11 {dimension_numbers = #tpu.dot_dimension_numbers<[1], [0], [0], [1], [0, 0, 1, 1], [], []>} : vector<80x64xbf16>, vector<64x64xbf16>, vector<80x64xf32> -> vector<80x64xf32>
    %12 = arith.addf %6, %11 : vector<80x64xf32>
    %c0_12 = arith.constant 0 : index
    %c2 = arith.constant 2 : index
    %c0_13 = arith.constant 0 : index
    %13 = vector.load %arg2[%c0_12, %c2, %c0_13] : memref<1x110x64xbf16, #tpu.memory_space<vmem>>, vector<1x80x64xbf16>
    %14 = vector.shape_cast %13 : vector<1x80x64xbf16> to vector<80x64xbf16>
    %c2_14 = arith.constant 2 : index
    %c0_15 = arith.constant 0 : index
    %c0_16 = arith.constant 0 : index
    %15 = vector.load %arg3[%c2_14, %c0_15, %c0_16] : memref<9x64x64xbf16, #tpu.memory_space<vmem>>, vector<1x64x64xbf16>
    %16 = vector.shape_cast %15 : vector<1x64x64xbf16> to vector<64x64xbf16>
    %cst_17 = arith.constant dense<0.000000e+00> : vector<80x64xf32>
    %17 = tpu.matmul %14, %16, %cst_17 {dimension_numbers = #tpu.dot_dimension_numbers<[1], [0], [0], [1], [0, 0, 1, 1], [], []>} : vector<80x64xbf16>, vector<64x64xbf16>, vector<80x64xf32> -> vector<80x64xf32>
    %18 = arith.addf %12, %17 : vector<80x64xf32>
    %c0_18 = arith.constant 0 : index
    %c10 = arith.constant 10 : index
    %c0_19 = arith.constant 0 : index
    %19 = vector.load %arg2[%c0_18, %c10, %c0_19] : memref<1x110x64xbf16, #tpu.memory_space<vmem>>, vector<1x80x64xbf16>
    %20 = vector.shape_cast %19 : vector<1x80x64xbf16> to vector<80x64xbf16>
    %c3 = arith.constant 3 : index
    %c0_20 = arith.constant 0 : index
    %c0_21 = arith.constant 0 : index
    %21 = vector.load %arg3[%c3, %c0_20, %c0_21] : memref<9x64x64xbf16, #tpu.memory_space<vmem>>, vector<1x64x64xbf16>
    %22 = vector.shape_cast %21 : vector<1x64x64xbf16> to vector<64x64xbf16>
    %cst_22 = arith.constant dense<0.000000e+00> : vector<80x64xf32>
    %23 = tpu.matmul %20, %22, %cst_22 {dimension_numbers = #tpu.dot_dimension_numbers<[1], [0], [0], [1], [0, 0, 1, 1], [], []>} : vector<80x64xbf16>, vector<64x64xbf16>, vector<80x64xf32> -> vector<80x64xf32>
    %24 = arith.addf %18, %23 : vector<80x64xf32>
    %c0_23 = arith.constant 0 : index
    %c11 = arith.constant 11 : index
    %c0_24 = arith.constant 0 : index
    %25 = vector.load %arg2[%c0_23, %c11, %c0_24] : memref<1x110x64xbf16, #tpu.memory_space<vmem>>, vector<1x80x64xbf16>
    %26 = vector.shape_cast %25 : vector<1x80x64xbf16> to vector<80x64xbf16>
    %c4 = arith.constant 4 : index
    %c0_25 = arith.constant 0 : index
    %c0_26 = arith.constant 0 : index
    %27 = vector.load %arg3[%c4, %c0_25, %c0_26] : memref<9x64x64xbf16, #tpu.memory_space<vmem>>, vector<1x64x64xbf16>
    %28 = vector.shape_cast %27 : vector<1x64x64xbf16> to vector<64x64xbf16>
    %cst_27 = arith.constant dense<0.000000e+00> : vector<80x64xf32>
    %29 = tpu.matmul %26, %28, %cst_27 {dimension_numbers = #tpu.dot_dimension_numbers<[1], [0], [0], [1], [0, 0, 1, 1], [], []>} : vector<80x64xbf16>, vector<64x64xbf16>, vector<80x64xf32> -> vector<80x64xf32>
    %30 = arith.addf %24, %29 : vector<80x64xf32>
    %c0_28 = arith.constant 0 : index
    %c12 = arith.constant 12 : index
    %c0_29 = arith.constant 0 : index
    %31 = vector.load %arg2[%c0_28, %c12, %c0_29] : memref<1x110x64xbf16, #tpu.memory_space<vmem>>, vector<1x80x64xbf16>
    %32 = vector.shape_cast %31 : vector<1x80x64xbf16> to vector<80x64xbf16>
    %c5 = arith.constant 5 : index
    %c0_30 = arith.constant 0 : index
    %c0_31 = arith.constant 0 : index
    %33 = vector.load %arg3[%c5, %c0_30, %c0_31] : memref<9x64x64xbf16, #tpu.memory_space<vmem>>, vector<1x64x64xbf16>
    %34 = vector.shape_cast %33 : vector<1x64x64xbf16> to vector<64x64xbf16>
    %cst_32 = arith.constant dense<0.000000e+00> : vector<80x64xf32>
    %35 = tpu.matmul %32, %34, %cst_32 {dimension_numbers = #tpu.dot_dimension_numbers<[1], [0], [0], [1], [0, 0, 1, 1], [], []>} : vector<80x64xbf16>, vector<64x64xbf16>, vector<80x64xf32> -> vector<80x64xf32>
    %36 = arith.addf %30, %35 : vector<80x64xf32>
    %c0_33 = arith.constant 0 : index
    %c20 = arith.constant 20 : index
    %c0_34 = arith.constant 0 : index
    %37 = vector.load %arg2[%c0_33, %c20, %c0_34] : memref<1x110x64xbf16, #tpu.memory_space<vmem>>, vector<1x80x64xbf16>
    %38 = vector.shape_cast %37 : vector<1x80x64xbf16> to vector<80x64xbf16>
    %c6 = arith.constant 6 : index
    %c0_35 = arith.constant 0 : index
    %c0_36 = arith.constant 0 : index
    %39 = vector.load %arg3[%c6, %c0_35, %c0_36] : memref<9x64x64xbf16, #tpu.memory_space<vmem>>, vector<1x64x64xbf16>
    %40 = vector.shape_cast %39 : vector<1x64x64xbf16> to vector<64x64xbf16>
    %cst_37 = arith.constant dense<0.000000e+00> : vector<80x64xf32>
    %41 = tpu.matmul %38, %40, %cst_37 {dimension_numbers = #tpu.dot_dimension_numbers<[1], [0], [0], [1], [0, 0, 1, 1], [], []>} : vector<80x64xbf16>, vector<64x64xbf16>, vector<80x64xf32> -> vector<80x64xf32>
    %42 = arith.addf %36, %41 : vector<80x64xf32>
    %c0_38 = arith.constant 0 : index
    %c21 = arith.constant 21 : index
    %c0_39 = arith.constant 0 : index
    %43 = vector.load %arg2[%c0_38, %c21, %c0_39] : memref<1x110x64xbf16, #tpu.memory_space<vmem>>, vector<1x80x64xbf16>
    %44 = vector.shape_cast %43 : vector<1x80x64xbf16> to vector<80x64xbf16>
    %c7 = arith.constant 7 : index
    %c0_40 = arith.constant 0 : index
    %c0_41 = arith.constant 0 : index
    %45 = vector.load %arg3[%c7, %c0_40, %c0_41] : memref<9x64x64xbf16, #tpu.memory_space<vmem>>, vector<1x64x64xbf16>
    %46 = vector.shape_cast %45 : vector<1x64x64xbf16> to vector<64x64xbf16>
    %cst_42 = arith.constant dense<0.000000e+00> : vector<80x64xf32>
    %47 = tpu.matmul %44, %46, %cst_42 {dimension_numbers = #tpu.dot_dimension_numbers<[1], [0], [0], [1], [0, 0, 1, 1], [], []>} : vector<80x64xbf16>, vector<64x64xbf16>, vector<80x64xf32> -> vector<80x64xf32>
    %48 = arith.addf %42, %47 : vector<80x64xf32>
    %c0_43 = arith.constant 0 : index
    %c22 = arith.constant 22 : index
    %c0_44 = arith.constant 0 : index
    %49 = vector.load %arg2[%c0_43, %c22, %c0_44] : memref<1x110x64xbf16, #tpu.memory_space<vmem>>, vector<1x80x64xbf16>
    %50 = vector.shape_cast %49 : vector<1x80x64xbf16> to vector<80x64xbf16>
    %c8 = arith.constant 8 : index
    %c0_45 = arith.constant 0 : index
    %c0_46 = arith.constant 0 : index
    %51 = vector.load %arg3[%c8, %c0_45, %c0_46] : memref<9x64x64xbf16, #tpu.memory_space<vmem>>, vector<1x64x64xbf16>
    %52 = vector.shape_cast %51 : vector<1x64x64xbf16> to vector<64x64xbf16>
    %cst_47 = arith.constant dense<0.000000e+00> : vector<80x64xf32>
    %53 = tpu.matmul %50, %52, %cst_47 {dimension_numbers = #tpu.dot_dimension_numbers<[1], [0], [0], [1], [0, 0, 1, 1], [], []>} : vector<80x64xbf16>, vector<64x64xbf16>, vector<80x64xf32> -> vector<80x64xf32>
    %54 = arith.addf %48, %53 : vector<80x64xf32>
    %c0_48 = arith.constant 0 : index
    %c0_49 = arith.constant 0 : index
    %55 = vector.load %arg4[%c0_48, %c0_49] : memref<1x64xf32, #tpu.memory_space<vmem>>, vector<1x64xf32>
    %56 = vector.broadcast %55 : vector<1x64xf32> to vector<80x64xf32>
    %57 = arith.addf %54, %56 : vector<80x64xf32>
    %cst_50 = arith.constant 0.000000e+00 : f32
    %58 = vector.broadcast %cst_50 : f32 to vector<80x64xf32>
    %59 = arith.maximumf %57, %58 : vector<80x64xf32>
    %60 = arith.truncf %59 : vector<80x64xf32> to vector<80x64xbf16>
    %c0_51 = arith.constant 0 : index
    %c0_52 = arith.constant 0 : index
    %c0_53 = arith.constant 0 : index
    %61 = vector.load %arg5[%c0_51, %c0_52, %c0_53] : memref<1x80x64xbf16, #tpu.memory_space<vmem>>, vector<1x80x64xbf16>
    %62 = vector.shape_cast %61 : vector<1x80x64xbf16> to vector<80x64xbf16>
    %63 = vector.shape_cast %60 : vector<80x64xbf16> to vector<1x80x64xbf16>
    tpu.vector_store %arg5[%c0_51, %c0_52, %c0_53], %63 {strides = array<i32>} : memref<1x80x64xbf16, #tpu.memory_space<vmem>>, vector<1x80x64xbf16>,
    return
  }
  func.func @transform_0(%arg0: i32, %arg1: i32) -> (i32, i32, i32) {
    %c0_i32 = arith.constant 0 : i32
    %c0_i32_0 = arith.constant 0 : i32
    %c0_i32_1 = arith.constant 0 : i32
    return %arg0, %c0_i32, %c0_i32_0 : i32, i32, i32
  }
  func.func @transform_1(%arg0: i32, %arg1: i32) -> (i32, i32, i32) {
    %c0_i32 = arith.constant 0 : i32
    %c0_i32_0 = arith.constant 0 : i32
    %c0_i32_1 = arith.constant 0 : i32
    return %c0_i32, %c0_i32_0, %arg1 : i32, i32, i32
  }
  func.func @transform_2(%arg0: i32, %arg1: i32) -> (i32, i32) {
    %c0_i32 = arith.constant 0 : i32
    %c0_i32_0 = arith.constant 0 : i32
    return %c0_i32, %arg1 : i32, i32
  }
  func.func @transform_3(%arg0: i32, %arg1: i32) -> (i32, i32, i32) {
    %c0_i32 = arith.constant 0 : i32
    %c0_i32_0 = arith.constant 0 : i32
    return %arg0, %c0_i32, %arg1 : i32, i32, i32
  }
}

module attributes {stable_mosaic.version = 11 : i64} {
  func.func @_conv3x3_res_kernel(%arg0: i32, %arg1: i32, %arg2: memref<1x110x64xbf16, #tpu.memory_space<vmem>>, %arg3: memref<9x64x64xbf16, #tpu.memory_space<vmem>>, %arg4: memref<1x64xf32, #tpu.memory_space<vmem>>, %arg5: memref<1x80x64xbf16, #tpu.memory_space<vmem>>, %arg6: memref<1x80x64xbf16, #tpu.memory_space<vmem>>) attributes {dimension_semantics = [#tpu.dimension_semantics<parallel>, #tpu.dimension_semantics<parallel>], iteration_bounds = array<i64: 2, 1>, scalar_prefetch = 0 : i64, scratch_operands = 0 : i64, tpu.core_type = #tpu.core_type<tc>, window_params = [{transform_indices = @transform_0, window_bounds = array<i64: 1, 110, 64>}, {transform_indices = @transform_1, window_bounds = array<i64: 9, 64, 64>}, {transform_indices = @transform_2, window_bounds = array<i64: 1, 64>}, {transform_indices = @transform_3, window_bounds = array<i64: 1, 80, 64>}, {transform_indices = @transform_4, window_bounds = array<i64: 1, 80, 64>}]} {
    %cst = arith.constant 0.000000e+00 : f32
    %0 = vector.broadcast %cst : f32 to vector<80x64xf32>
    %c0 = arith.constant 0 : index
    %c0_0 = arith.constant 0 : index
    %c0_1 = arith.constant 0 : index
    %1 = vector.load %arg2[%c0, %c0_0, %c0_1] : memref<1x110x64xbf16, #tpu.memory_space<vmem>>, vector<1x80x64xbf16>
    %2 = vector.shape_cast %1 : vector<1x80x64xbf16> to vector<80x64xbf16>
    %c0_2 = arith.constant 0 : index
    %c0_3 = arith.constant 0 : index
    %c0_4 = arith.constant 0 : index
    %3 = vector.load %arg3[%c0_2, %c0_3, %c0_4] : memref<9x64x64xbf16, #tpu.memory_space<vmem>>, vector<1x64x64xbf16>
    %4 = vector.shape_cast %3 : vector<1x64x64xbf16> to vector<64x64xbf16>
    %cst_5 = arith.constant dense<0.000000e+00> : vector<80x64xf32>
    %5 = tpu.matmul %2, %4, %cst_5 {dimension_numbers = #tpu.dot_dimension_numbers<[1], [0], [0], [1], [0, 0, 1, 1], [], []>} : vector<80x64xbf16>, vector<64x64xbf16>, vector<80x64xf32> -> vector<80x64xf32>
    %6 = arith.addf %0, %5 : vector<80x64xf32>
    %c0_6 = arith.constant 0 : index
    %c1 = arith.constant 1 : index
    %c0_7 = arith.constant 0 : index
    %7 = vector.load %arg2[%c0_6, %c1, %c0_7] : memref<1x110x64xbf16, #tpu.memory_space<vmem>>, vector<1x80x64xbf16>
    %8 = vector.shape_cast %7 : vector<1x80x64xbf16> to vector<80x64xbf16>
    %c1_8 = arith.constant 1 : index
    %c0_9 = arith.constant 0 : index
    %c0_10 = arith.constant 0 : index
    %9 = vector.load %arg3[%c1_8, %c0_9, %c0_10] : memref<9x64x64xbf16, #tpu.memory_space<vmem>>, vector<1x64x64xbf16>
    %10 = vector.shape_cast %9 : vector<1x64x64xbf16> to vector<64x64xbf16>
    %cst_11 = arith.constant dense<0.000000e+00> : vector<80x64xf32>
    %11 = tpu.matmul %8, %10, %cst_11 {dimension_numbers = #tpu.dot_dimension_numbers<[1], [0], [0], [1], [0, 0, 1, 1], [], []>} : vector<80x64xbf16>, vector<64x64xbf16>, vector<80x64xf32> -> vector<80x64xf32>
    %12 = arith.addf %6, %11 : vector<80x64xf32>
    %c0_12 = arith.constant 0 : index
    %c2 = arith.constant 2 : index
    %c0_13 = arith.constant 0 : index
    %13 = vector.load %arg2[%c0_12, %c2, %c0_13] : memref<1x110x64xbf16, #tpu.memory_space<vmem>>, vector<1x80x64xbf16>
    %14 = vector.shape_cast %13 : vector<1x80x64xbf16> to vector<80x64xbf16>
    %c2_14 = arith.constant 2 : index
    %c0_15 = arith.constant 0 : index
    %c0_16 = arith.constant 0 : index
    %15 = vector.load %arg3[%c2_14, %c0_15, %c0_16] : memref<9x64x64xbf16, #tpu.memory_space<vmem>>, vector<1x64x64xbf16>
    %16 = vector.shape_cast %15 : vector<1x64x64xbf16> to vector<64x64xbf16>
    %cst_17 = arith.constant dense<0.000000e+00> : vector<80x64xf32>
    %17 = tpu.matmul %14, %16, %cst_17 {dimension_numbers = #tpu.dot_dimension_numbers<[1], [0], [0], [1], [0, 0, 1, 1], [], []>} : vector<80x64xbf16>, vector<64x64xbf16>, vector<80x64xf32> -> vector<80x64xf32>
    %18 = arith.addf %12, %17 : vector<80x64xf32>
    %c0_18 = arith.constant 0 : index
    %c10 = arith.constant 10 : index
    %c0_19 = arith.constant 0 : index
    %19 = vector.load %arg2[%c0_18, %c10, %c0_19] : memref<1x110x64xbf16, #tpu.memory_space<vmem>>, vector<1x80x64xbf16>
    %20 = vector.shape_cast %19 : vector<1x80x64xbf16> to vector<80x64xbf16>
    %c3 = arith.constant 3 : index
    %c0_20 = arith.constant 0 : index
    %c0_21 = arith.constant 0 : index
    %21 = vector.load %arg3[%c3, %c0_20, %c0_21] : memref<9x64x64xbf16, #tpu.memory_space<vmem>>, vector<1x64x64xbf16>
    %22 = vector.shape_cast %21 : vector<1x64x64xbf16> to vector<64x64xbf16>
    %cst_22 = arith.constant dense<0.000000e+00> : vector<80x64xf32>
    %23 = tpu.matmul %20, %22, %cst_22 {dimension_numbers = #tpu.dot_dimension_numbers<[1], [0], [0], [1], [0, 0, 1, 1], [], []>} : vector<80x64xbf16>, vector<64x64xbf16>, vector<80x64xf32> -> vector<80x64xf32>
    %24 = arith.addf %18, %23 : vector<80x64xf32>
    %c0_23 = arith.constant 0 : index
    %c11 = arith.constant 11 : index
    %c0_24 = arith.constant 0 : index
    %25 = vector.load %arg2[%c0_23, %c11, %c0_24] : memref<1x110x64xbf16, #tpu.memory_space<vmem>>, vector<1x80x64xbf16>
    %26 = vector.shape_cast %25 : vector<1x80x64xbf16> to vector<80x64xbf16>
    %c4 = arith.constant 4 : index
    %c0_25 = arith.constant 0 : index
    %c0_26 = arith.constant 0 : index
    %27 = vector.load %arg3[%c4, %c0_25, %c0_26] : memref<9x64x64xbf16, #tpu.memory_space<vmem>>, vector<1x64x64xbf16>
    %28 = vector.shape_cast %27 : vector<1x64x64xbf16> to vector<64x64xbf16>
    %cst_27 = arith.constant dense<0.000000e+00> : vector<80x64xf32>
    %29 = tpu.matmul %26, %28, %cst_27 {dimension_numbers = #tpu.dot_dimension_numbers<[1], [0], [0], [1], [0, 0, 1, 1], [], []>} : vector<80x64xbf16>, vector<64x64xbf16>, vector<80x64xf32> -> vector<80x64xf32>
    %30 = arith.addf %24, %29 : vector<80x64xf32>
    %c0_28 = arith.constant 0 : index
    %c12 = arith.constant 12 : index
    %c0_29 = arith.constant 0 : index
    %31 = vector.load %arg2[%c0_28, %c12, %c0_29] : memref<1x110x64xbf16, #tpu.memory_space<vmem>>, vector<1x80x64xbf16>
    %32 = vector.shape_cast %31 : vector<1x80x64xbf16> to vector<80x64xbf16>
    %c5 = arith.constant 5 : index
    %c0_30 = arith.constant 0 : index
    %c0_31 = arith.constant 0 : index
    %33 = vector.load %arg3[%c5, %c0_30, %c0_31] : memref<9x64x64xbf16, #tpu.memory_space<vmem>>, vector<1x64x64xbf16>
    %34 = vector.shape_cast %33 : vector<1x64x64xbf16> to vector<64x64xbf16>
    %cst_32 = arith.constant dense<0.000000e+00> : vector<80x64xf32>
    %35 = tpu.matmul %32, %34, %cst_32 {dimension_numbers = #tpu.dot_dimension_numbers<[1], [0], [0], [1], [0, 0, 1, 1], [], []>} : vector<80x64xbf16>, vector<64x64xbf16>, vector<80x64xf32> -> vector<80x64xf32>
    %36 = arith.addf %30, %35 : vector<80x64xf32>
    %c0_33 = arith.constant 0 : index
    %c20 = arith.constant 20 : index
    %c0_34 = arith.constant 0 : index
    %37 = vector.load %arg2[%c0_33, %c20, %c0_34] : memref<1x110x64xbf16, #tpu.memory_space<vmem>>, vector<1x80x64xbf16>
    %38 = vector.shape_cast %37 : vector<1x80x64xbf16> to vector<80x64xbf16>
    %c6 = arith.constant 6 : index
    %c0_35 = arith.constant 0 : index
    %c0_36 = arith.constant 0 : index
    %39 = vector.load %arg3[%c6, %c0_35, %c0_36] : memref<9x64x64xbf16, #tpu.memory_space<vmem>>, vector<1x64x64xbf16>
    %40 = vector.shape_cast %39 : vector<1x64x64xbf16> to vector<64x64xbf16>
    %cst_37 = arith.constant dense<0.000000e+00> : vector<80x64xf32>
    %41 = tpu.matmul %38, %40, %cst_37 {dimension_numbers = #tpu.dot_dimension_numbers<[1], [0], [0], [1], [0, 0, 1, 1], [], []>} : vector<80x64xbf16>, vector<64x64xbf16>, vector<80x64xf32> -> vector<80x64xf32>
    %42 = arith.addf %36, %41 : vector<80x64xf32>
    %c0_38 = arith.constant 0 : index
    %c21 = arith.constant 21 : index
    %c0_39 = arith.constant 0 : index
    %43 = vector.load %arg2[%c0_38, %c21, %c0_39] : memref<1x110x64xbf16, #tpu.memory_space<vmem>>, vector<1x80x64xbf16>
    %44 = vector.shape_cast %43 : vector<1x80x64xbf16> to vector<80x64xbf16>
    %c7 = arith.constant 7 : index
    %c0_40 = arith.constant 0 : index
    %c0_41 = arith.constant 0 : index
    %45 = vector.load %arg3[%c7, %c0_40, %c0_41] : memref<9x64x64xbf16, #tpu.memory_space<vmem>>, vector<1x64x64xbf16>
    %46 = vector.shape_cast %45 : vector<1x64x64xbf16> to vector<64x64xbf16>
    %cst_42 = arith.constant dense<0.000000e+00> : vector<80x64xf32>
    %47 = tpu.matmul %44, %46, %cst_42 {dimension_numbers = #tpu.dot_dimension_numbers<[1], [0], [0], [1], [0, 0, 1, 1], [], []>} : vector<80x64xbf16>, vector<64x64xbf16>, vector<80x64xf32> -> vector<80x64xf32>
    %48 = arith.addf %42, %47 : vector<80x64xf32>
    %c0_43 = arith.constant 0 : index
    %c22 = arith.constant 22 : index
    %c0_44 = arith.constant 0 : index
    %49 = vector.load %arg2[%c0_43, %c22, %c0_44] : memref<1x110x64xbf16, #tpu.memory_space<vmem>>, vector<1x80x64xbf16>
    %50 = vector.shape_cast %49 : vector<1x80x64xbf16> to vector<80x64xbf16>
    %c8 = arith.constant 8 : index
    %c0_45 = arith.constant 0 : index
    %c0_46 = arith.constant 0 : index
    %51 = vector.load %arg3[%c8, %c0_45, %c0_46] : memref<9x64x64xbf16, #tpu.memory_space<vmem>>, vector<1x64x64xbf16>
    %52 = vector.shape_cast %51 : vector<1x64x64xbf16> to vector<64x64xbf16>
    %cst_47 = arith.constant dense<0.000000e+00> : vector<80x64xf32>
    %53 = tpu.matmul %50, %52, %cst_47 {dimension_numbers = #tpu.dot_dimension_numbers<[1], [0], [0], [1], [0, 0, 1, 1], [], []>} : vector<80x64xbf16>, vector<64x64xbf16>, vector<80x64xf32> -> vector<80x64xf32>
    %54 = arith.addf %48, %53 : vector<80x64xf32>
    %c0_48 = arith.constant 0 : index
    %c0_49 = arith.constant 0 : index
    %55 = vector.load %arg4[%c0_48, %c0_49] : memref<1x64xf32, #tpu.memory_space<vmem>>, vector<1x64xf32>
    %56 = vector.broadcast %55 : vector<1x64xf32> to vector<80x64xf32>
    %57 = arith.addf %54, %56 : vector<80x64xf32>
    %c0_50 = arith.constant 0 : index
    %c0_51 = arith.constant 0 : index
    %c0_52 = arith.constant 0 : index
    %58 = vector.load %arg5[%c0_50, %c0_51, %c0_52] : memref<1x80x64xbf16, #tpu.memory_space<vmem>>, vector<1x80x64xbf16>
    %59 = vector.shape_cast %58 : vector<1x80x64xbf16> to vector<80x64xbf16>
    %60 = arith.extf %59 : vector<80x64xbf16> to vector<80x64xf32>
    %61 = arith.addf %57, %60 : vector<80x64xf32>
    %cst_53 = arith.constant 0.000000e+00 : f32
    %62 = vector.broadcast %cst_53 : f32 to vector<80x64xf32>
    %63 = arith.maximumf %61, %62 : vector<80x64xf32>
    %64 = arith.truncf %63 : vector<80x64xf32> to vector<80x64xbf16>
    %c0_54 = arith.constant 0 : index
    %c0_55 = arith.constant 0 : index
    %c0_56 = arith.constant 0 : index
    %65 = vector.load %arg6[%c0_54, %c0_55, %c0_56] : memref<1x80x64xbf16, #tpu.memory_space<vmem>>, vector<1x80x64xbf16>
    %66 = vector.shape_cast %65 : vector<1x80x64xbf16> to vector<80x64xbf16>
    %67 = vector.shape_cast %64 : vector<80x64xbf16> to vector<1x80x64xbf16>
    tpu.vector_store %arg6[%c0_54, %c0_55, %c0_56], %67 {strides = array<i32>} : memref<1x80x64xbf16, #tpu.memory_space<vmem>>, vector<1x80x64xbf16>,
    return
  }
  func.func @transform_0(%arg0: i32, %arg1: i32) -> (i32, i32, i32) {
    %c0_i32 = arith.constant 0 : i32
    %c0_i32_0 = arith.constant 0 : i32
    %c0_i32_1 = arith.constant 0 : i32
    return %arg0, %c0_i32, %c0_i32_0 : i32, i32, i32
  }
  func.func @transform_1(%arg0: i32, %arg1: i32) -> (i32, i32, i32) {
    %c0_i32 = arith.constant 0 : i32
    %c0_i32_0 = arith.constant 0 : i32
    %c0_i32_1 = arith.constant 0 : i32
    return %c0_i32, %c0_i32_0, %arg1 : i32, i32, i32
  }
  func.func @transform_2(%arg0: i32, %arg1: i32) -> (i32, i32) {
    %c0_i32 = arith.constant 0 : i32
    %c0_i32_0 = arith.constant 0 : i32
    return %c0_i32, %arg1 : i32, i32
  }
  func.func @transform_3(%arg0: i32, %arg1: i32) -> (i32, i32, i32) {
    %c0_i32 = arith.constant 0 : i32
    %c0_i32_0 = arith.constant 0 : i32
    return %arg0, %c0_i32, %arg1 : i32, i32, i32
  }
  func.func @transform_4(%arg0: i32, %arg1: i32) -> (i32, i32, i32) {
    %c0_i32 = arith.constant 0 : i32
    %c0_i32_0 = arith.constant 0 : i32
    return %arg0, %c0_i32, %arg1 : i32, i32, i32
  }
}

module attributes {stable_mosaic.version = 11 : i64} {
  func.func @_mm_bias_kernel(%arg0: i32, %arg1: i32, %arg2: memref<32x576xbf16, #tpu.memory_space<vmem>>, %arg3: memref<576x128xbf16, #tpu.memory_space<vmem>>, %arg4: memref<1x128xf32, #tpu.memory_space<vmem>>, %arg5: memref<32x128xbf16, #tpu.memory_space<vmem>>) attributes {dimension_semantics = [#tpu.dimension_semantics<parallel>, #tpu.dimension_semantics<parallel>], iteration_bounds = array<i64: 1, 1>, scalar_prefetch = 0 : i64, scratch_operands = 0 : i64, tpu.core_type = #tpu.core_type<tc>, window_params = [{transform_indices = @transform_0, window_bounds = array<i64: 32, 576>}, {transform_indices = @transform_1, window_bounds = array<i64: 576, 128>}, {transform_indices = @transform_2, window_bounds = array<i64: 1, 128>}, {transform_indices = @transform_3, window_bounds = array<i64: 32, 128>}]} {
    %c0 = arith.constant 0 : index
    %c0_0 = arith.constant 0 : index
    %0 = vector.load %arg2[%c0, %c0_0] : memref<32x576xbf16, #tpu.memory_space<vmem>>, vector<32x576xbf16>
    %c0_1 = arith.constant 0 : index
    %c0_2 = arith.constant 0 : index
    %1 = vector.load %arg3[%c0_1, %c0_2] : memref<576x128xbf16, #tpu.memory_space<vmem>>, vector<576x128xbf16>
    %cst = arith.constant dense<0.000000e+00> : vector<32x128xf32>
    %2 = tpu.matmul %0, %1, %cst {dimension_numbers = #tpu.dot_dimension_numbers<[1], [0], [0], [1], [0, 0, 1, 1], [], []>} : vector<32x576xbf16>, vector<576x128xbf16>, vector<32x128xf32> -> vector<32x128xf32>
    %c0_3 = arith.constant 0 : index
    %c0_4 = arith.constant 0 : index
    %3 = vector.load %arg4[%c0_3, %c0_4] : memref<1x128xf32, #tpu.memory_space<vmem>>, vector<1x128xf32>
    %4 = vector.broadcast %3 : vector<1x128xf32> to vector<32x128xf32>
    %5 = arith.addf %2, %4 : vector<32x128xf32>
    %cst_5 = arith.constant 0.000000e+00 : f32
    %6 = vector.broadcast %cst_5 : f32 to vector<32x128xf32>
    %7 = arith.maximumf %5, %6 : vector<32x128xf32>
    %8 = arith.truncf %7 : vector<32x128xf32> to vector<32x128xbf16>
    %c0_6 = arith.constant 0 : index
    %c0_7 = arith.constant 0 : index
    %9 = vector.load %arg5[%c0_6, %c0_7] : memref<32x128xbf16, #tpu.memory_space<vmem>>, vector<32x128xbf16>
    tpu.vector_store %arg5[%c0_6, %c0_7], %8 {strides = array<i32>} : memref<32x128xbf16, #tpu.memory_space<vmem>>, vector<32x128xbf16>,
    return
  }
  func.func @transform_0(%arg0: i32, %arg1: i32) -> (i32, i32) {
    %c0_i32 = arith.constant 0 : i32
    %c0_i32_0 = arith.constant 0 : i32
    return %arg0, %c0_i32 : i32, i32
  }
  func.func @transform_1(%arg0: i32, %arg1: i32) -> (i32, i32) {
    %c0_i32 = arith.constant 0 : i32
    %c0_i32_0 = arith.constant 0 : i32
    return %c0_i32, %arg1 : i32, i32
  }
  func.func @transform_2(%arg0: i32, %arg1: i32) -> (i32, i32) {
    %c0_i32 = arith.constant 0 : i32
    %c0_i32_0 = arith.constant 0 : i32
    return %c0_i32, %arg1 : i32, i32
  }
  func.func @transform_3(%arg0: i32, %arg1: i32) -> (i32, i32) {
    %c0_i32 = arith.constant 0 : i32
    return %arg0, %arg1 : i32, i32
  }
}

module attributes {stable_mosaic.version = 11 : i64} {
  func.func @_conv3x3_res_kernel(%arg0: i32, %arg1: i32, %arg2: memref<1x42x128xbf16, #tpu.memory_space<vmem>>, %arg3: memref<9x128x128xbf16, #tpu.memory_space<vmem>>, %arg4: memref<1x128xf32, #tpu.memory_space<vmem>>, %arg5: memref<1x24x128xbf16, #tpu.memory_space<vmem>>, %arg6: memref<1x24x128xbf16, #tpu.memory_space<vmem>>) attributes {dimension_semantics = [#tpu.dimension_semantics<parallel>, #tpu.dimension_semantics<parallel>], iteration_bounds = array<i64: 2, 1>, scalar_prefetch = 0 : i64, scratch_operands = 0 : i64, tpu.core_type = #tpu.core_type<tc>, window_params = [{transform_indices = @transform_0, window_bounds = array<i64: 1, 42, 128>}, {transform_indices = @transform_1, window_bounds = array<i64: 9, 128, 128>}, {transform_indices = @transform_2, window_bounds = array<i64: 1, 128>}, {transform_indices = @transform_3, window_bounds = array<i64: 1, 24, 128>}, {transform_indices = @transform_4, window_bounds = array<i64: 1, 24, 128>}]} {
    %cst = arith.constant 0.000000e+00 : f32
    %0 = vector.broadcast %cst : f32 to vector<24x128xf32>
    %c0 = arith.constant 0 : index
    %c0_0 = arith.constant 0 : index
    %c0_1 = arith.constant 0 : index
    %1 = vector.load %arg2[%c0, %c0_0, %c0_1] : memref<1x42x128xbf16, #tpu.memory_space<vmem>>, vector<1x24x128xbf16>
    %2 = vector.shape_cast %1 : vector<1x24x128xbf16> to vector<24x128xbf16>
    %c0_2 = arith.constant 0 : index
    %c0_3 = arith.constant 0 : index
    %c0_4 = arith.constant 0 : index
    %3 = vector.load %arg3[%c0_2, %c0_3, %c0_4] : memref<9x128x128xbf16, #tpu.memory_space<vmem>>, vector<1x128x128xbf16>
    %4 = vector.shape_cast %3 : vector<1x128x128xbf16> to vector<128x128xbf16>
    %cst_5 = arith.constant dense<0.000000e+00> : vector<24x128xf32>
    %5 = tpu.matmul %2, %4, %cst_5 {dimension_numbers = #tpu.dot_dimension_numbers<[1], [0], [0], [1], [0, 0, 1, 1], [], []>} : vector<24x128xbf16>, vector<128x128xbf16>, vector<24x128xf32> -> vector<24x128xf32>
    %6 = arith.addf %0, %5 : vector<24x128xf32>
    %c0_6 = arith.constant 0 : index
    %c1 = arith.constant 1 : index
    %c0_7 = arith.constant 0 : index
    %7 = vector.load %arg2[%c0_6, %c1, %c0_7] : memref<1x42x128xbf16, #tpu.memory_space<vmem>>, vector<1x24x128xbf16>
    %8 = vector.shape_cast %7 : vector<1x24x128xbf16> to vector<24x128xbf16>
    %c1_8 = arith.constant 1 : index
    %c0_9 = arith.constant 0 : index
    %c0_10 = arith.constant 0 : index
    %9 = vector.load %arg3[%c1_8, %c0_9, %c0_10] : memref<9x128x128xbf16, #tpu.memory_space<vmem>>, vector<1x128x128xbf16>
    %10 = vector.shape_cast %9 : vector<1x128x128xbf16> to vector<128x128xbf16>
    %cst_11 = arith.constant dense<0.000000e+00> : vector<24x128xf32>
    %11 = tpu.matmul %8, %10, %cst_11 {dimension_numbers = #tpu.dot_dimension_numbers<[1], [0], [0], [1], [0, 0, 1, 1], [], []>} : vector<24x128xbf16>, vector<128x128xbf16>, vector<24x128xf32> -> vector<24x128xf32>
    %12 = arith.addf %6, %11 : vector<24x128xf32>
    %c0_12 = arith.constant 0 : index
    %c2 = arith.constant 2 : index
    %c0_13 = arith.constant 0 : index
    %13 = vector.load %arg2[%c0_12, %c2, %c0_13] : memref<1x42x128xbf16, #tpu.memory_space<vmem>>, vector<1x24x128xbf16>
    %14 = vector.shape_cast %13 : vector<1x24x128xbf16> to vector<24x128xbf16>
    %c2_14 = arith.constant 2 : index
    %c0_15 = arith.constant 0 : index
    %c0_16 = arith.constant 0 : index
    %15 = vector.load %arg3[%c2_14, %c0_15, %c0_16] : memref<9x128x128xbf16, #tpu.memory_space<vmem>>, vector<1x128x128xbf16>
    %16 = vector.shape_cast %15 : vector<1x128x128xbf16> to vector<128x128xbf16>
    %cst_17 = arith.constant dense<0.000000e+00> : vector<24x128xf32>
    %17 = tpu.matmul %14, %16, %cst_17 {dimension_numbers = #tpu.dot_dimension_numbers<[1], [0], [0], [1], [0, 0, 1, 1], [], []>} : vector<24x128xbf16>, vector<128x128xbf16>, vector<24x128xf32> -> vector<24x128xf32>
    %18 = arith.addf %12, %17 : vector<24x128xf32>
    %c0_18 = arith.constant 0 : index
    %c6 = arith.constant 6 : index
    %c0_19 = arith.constant 0 : index
    %19 = vector.load %arg2[%c0_18, %c6, %c0_19] : memref<1x42x128xbf16, #tpu.memory_space<vmem>>, vector<1x24x128xbf16>
    %20 = vector.shape_cast %19 : vector<1x24x128xbf16> to vector<24x128xbf16>
    %c3 = arith.constant 3 : index
    %c0_20 = arith.constant 0 : index
    %c0_21 = arith.constant 0 : index
    %21 = vector.load %arg3[%c3, %c0_20, %c0_21] : memref<9x128x128xbf16, #tpu.memory_space<vmem>>, vector<1x128x128xbf16>
    %22 = vector.shape_cast %21 : vector<1x128x128xbf16> to vector<128x128xbf16>
    %cst_22 = arith.constant dense<0.000000e+00> : vector<24x128xf32>
    %23 = tpu.matmul %20, %22, %cst_22 {dimension_numbers = #tpu.dot_dimension_numbers<[1], [0], [0], [1], [0, 0, 1, 1], [], []>} : vector<24x128xbf16>, vector<128x128xbf16>, vector<24x128xf32> -> vector<24x128xf32>
    %24 = arith.addf %18, %23 : vector<24x128xf32>
    %c0_23 = arith.constant 0 : index
    %c7 = arith.constant 7 : index
    %c0_24 = arith.constant 0 : index
    %25 = vector.load %arg2[%c0_23, %c7, %c0_24] : memref<1x42x128xbf16, #tpu.memory_space<vmem>>, vector<1x24x128xbf16>
    %26 = vector.shape_cast %25 : vector<1x24x128xbf16> to vector<24x128xbf16>
    %c4 = arith.constant 4 : index
    %c0_25 = arith.constant 0 : index
    %c0_26 = arith.constant 0 : index
    %27 = vector.load %arg3[%c4, %c0_25, %c0_26] : memref<9x128x128xbf16, #tpu.memory_space<vmem>>, vector<1x128x128xbf16>
    %28 = vector.shape_cast %27 : vector<1x128x128xbf16> to vector<128x128xbf16>
    %cst_27 = arith.constant dense<0.000000e+00> : vector<24x128xf32>
    %29 = tpu.matmul %26, %28, %cst_27 {dimension_numbers = #tpu.dot_dimension_numbers<[1], [0], [0], [1], [0, 0, 1, 1], [], []>} : vector<24x128xbf16>, vector<128x128xbf16>, vector<24x128xf32> -> vector<24x128xf32>
    %30 = arith.addf %24, %29 : vector<24x128xf32>
    %c0_28 = arith.constant 0 : index
    %c8 = arith.constant 8 : index
    %c0_29 = arith.constant 0 : index
    %31 = vector.load %arg2[%c0_28, %c8, %c0_29] : memref<1x42x128xbf16, #tpu.memory_space<vmem>>, vector<1x24x128xbf16>
    %32 = vector.shape_cast %31 : vector<1x24x128xbf16> to vector<24x128xbf16>
    %c5 = arith.constant 5 : index
    %c0_30 = arith.constant 0 : index
    %c0_31 = arith.constant 0 : index
    %33 = vector.load %arg3[%c5, %c0_30, %c0_31] : memref<9x128x128xbf16, #tpu.memory_space<vmem>>, vector<1x128x128xbf16>
    %34 = vector.shape_cast %33 : vector<1x128x128xbf16> to vector<128x128xbf16>
    %cst_32 = arith.constant dense<0.000000e+00> : vector<24x128xf32>
    %35 = tpu.matmul %32, %34, %cst_32 {dimension_numbers = #tpu.dot_dimension_numbers<[1], [0], [0], [1], [0, 0, 1, 1], [], []>} : vector<24x128xbf16>, vector<128x128xbf16>, vector<24x128xf32> -> vector<24x128xf32>
    %36 = arith.addf %30, %35 : vector<24x128xf32>
    %c0_33 = arith.constant 0 : index
    %c12 = arith.constant 12 : index
    %c0_34 = arith.constant 0 : index
    %37 = vector.load %arg2[%c0_33, %c12, %c0_34] : memref<1x42x128xbf16, #tpu.memory_space<vmem>>, vector<1x24x128xbf16>
    %38 = vector.shape_cast %37 : vector<1x24x128xbf16> to vector<24x128xbf16>
    %c6_35 = arith.constant 6 : index
    %c0_36 = arith.constant 0 : index
    %c0_37 = arith.constant 0 : index
    %39 = vector.load %arg3[%c6_35, %c0_36, %c0_37] : memref<9x128x128xbf16, #tpu.memory_space<vmem>>, vector<1x128x128xbf16>
    %40 = vector.shape_cast %39 : vector<1x128x128xbf16> to vector<128x128xbf16>
    %cst_38 = arith.constant dense<0.000000e+00> : vector<24x128xf32>
    %41 = tpu.matmul %38, %40, %cst_38 {dimension_numbers = #tpu.dot_dimension_numbers<[1], [0], [0], [1], [0, 0, 1, 1], [], []>} : vector<24x128xbf16>, vector<128x128xbf16>, vector<24x128xf32> -> vector<24x128xf32>
    %42 = arith.addf %36, %41 : vector<24x128xf32>
    %c0_39 = arith.constant 0 : index
    %c13 = arith.constant 13 : index
    %c0_40 = arith.constant 0 : index
    %43 = vector.load %arg2[%c0_39, %c13, %c0_40] : memref<1x42x128xbf16, #tpu.memory_space<vmem>>, vector<1x24x128xbf16>
    %44 = vector.shape_cast %43 : vector<1x24x128xbf16> to vector<24x128xbf16>
    %c7_41 = arith.constant 7 : index
    %c0_42 = arith.constant 0 : index
    %c0_43 = arith.constant 0 : index
    %45 = vector.load %arg3[%c7_41, %c0_42, %c0_43] : memref<9x128x128xbf16, #tpu.memory_space<vmem>>, vector<1x128x128xbf16>
    %46 = vector.shape_cast %45 : vector<1x128x128xbf16> to vector<128x128xbf16>
    %cst_44 = arith.constant dense<0.000000e+00> : vector<24x128xf32>
    %47 = tpu.matmul %44, %46, %cst_44 {dimension_numbers = #tpu.dot_dimension_numbers<[1], [0], [0], [1], [0, 0, 1, 1], [], []>} : vector<24x128xbf16>, vector<128x128xbf16>, vector<24x128xf32> -> vector<24x128xf32>
    %48 = arith.addf %42, %47 : vector<24x128xf32>
    %c0_45 = arith.constant 0 : index
    %c14 = arith.constant 14 : index
    %c0_46 = arith.constant 0 : index
    %49 = vector.load %arg2[%c0_45, %c14, %c0_46] : memref<1x42x128xbf16, #tpu.memory_space<vmem>>, vector<1x24x128xbf16>
    %50 = vector.shape_cast %49 : vector<1x24x128xbf16> to vector<24x128xbf16>
    %c8_47 = arith.constant 8 : index
    %c0_48 = arith.constant 0 : index
    %c0_49 = arith.constant 0 : index
    %51 = vector.load %arg3[%c8_47, %c0_48, %c0_49] : memref<9x128x128xbf16, #tpu.memory_space<vmem>>, vector<1x128x128xbf16>
    %52 = vector.shape_cast %51 : vector<1x128x128xbf16> to vector<128x128xbf16>
    %cst_50 = arith.constant dense<0.000000e+00> : vector<24x128xf32>
    %53 = tpu.matmul %50, %52, %cst_50 {dimension_numbers = #tpu.dot_dimension_numbers<[1], [0], [0], [1], [0, 0, 1, 1], [], []>} : vector<24x128xbf16>, vector<128x128xbf16>, vector<24x128xf32> -> vector<24x128xf32>
    %54 = arith.addf %48, %53 : vector<24x128xf32>
    %c0_51 = arith.constant 0 : index
    %c0_52 = arith.constant 0 : index
    %55 = vector.load %arg4[%c0_51, %c0_52] : memref<1x128xf32, #tpu.memory_space<vmem>>, vector<1x128xf32>
    %56 = vector.broadcast %55 : vector<1x128xf32> to vector<24x128xf32>
    %57 = arith.addf %54, %56 : vector<24x128xf32>
    %c0_53 = arith.constant 0 : index
    %c0_54 = arith.constant 0 : index
    %c0_55 = arith.constant 0 : index
    %58 = vector.load %arg5[%c0_53, %c0_54, %c0_55] : memref<1x24x128xbf16, #tpu.memory_space<vmem>>, vector<1x24x128xbf16>
    %59 = vector.shape_cast %58 : vector<1x24x128xbf16> to vector<24x128xbf16>
    %60 = arith.extf %59 : vector<24x128xbf16> to vector<24x128xf32>
    %61 = arith.addf %57, %60 : vector<24x128xf32>
    %cst_56 = arith.constant 0.000000e+00 : f32
    %62 = vector.broadcast %cst_56 : f32 to vector<24x128xf32>
    %63 = arith.maximumf %61, %62 : vector<24x128xf32>
    %64 = arith.truncf %63 : vector<24x128xf32> to vector<24x128xbf16>
    %c0_57 = arith.constant 0 : index
    %c0_58 = arith.constant 0 : index
    %c0_59 = arith.constant 0 : index
    %65 = vector.load %arg6[%c0_57, %c0_58, %c0_59] : memref<1x24x128xbf16, #tpu.memory_space<vmem>>, vector<1x24x128xbf16>
    %66 = vector.shape_cast %65 : vector<1x24x128xbf16> to vector<24x128xbf16>
    %67 = vector.shape_cast %64 : vector<24x128xbf16> to vector<1x24x128xbf16>
    tpu.vector_store %arg6[%c0_57, %c0_58, %c0_59], %67 {strides = array<i32>} : memref<1x24x128xbf16, #tpu.memory_space<vmem>>, vector<1x24x128xbf16>,
    return
  }
  func.func @transform_0(%arg0: i32, %arg1: i32) -> (i32, i32, i32) {
    %c0_i32 = arith.constant 0 : i32
    %c0_i32_0 = arith.constant 0 : i32
    %c0_i32_1 = arith.constant 0 : i32
    return %arg0, %c0_i32, %c0_i32_0 : i32, i32, i32
  }
  func.func @transform_1(%arg0: i32, %arg1: i32) -> (i32, i32, i32) {
    %c0_i32 = arith.constant 0 : i32
    %c0_i32_0 = arith.constant 0 : i32
    %c0_i32_1 = arith.constant 0 : i32
    return %c0_i32, %c0_i32_0, %arg1 : i32, i32, i32
  }
  func.func @transform_2(%arg0: i32, %arg1: i32) -> (i32, i32) {
    %c0_i32 = arith.constant 0 : i32
    %c0_i32_0 = arith.constant 0 : i32
    return %c0_i32, %arg1 : i32, i32
  }
  func.func @transform_3(%arg0: i32, %arg1: i32) -> (i32, i32, i32) {
    %c0_i32 = arith.constant 0 : i32
    %c0_i32_0 = arith.constant 0 : i32
    return %arg0, %c0_i32, %arg1 : i32, i32, i32
  }
  func.func @transform_4(%arg0: i32, %arg1: i32) -> (i32, i32, i32) {
    %c0_i32 = arith.constant 0 : i32
    %c0_i32_0 = arith.constant 0 : i32
    return %arg0, %c0_i32, %arg1 : i32, i32, i32
  }
}

module attributes {stable_mosaic.version = 11 : i64} {
  func.func @_mm_bias_kernel(%arg0: i32, %arg1: i32, %arg2: memref<32x64xbf16, #tpu.memory_space<vmem>>, %arg3: memref<64x128xbf16, #tpu.memory_space<vmem>>, %arg4: memref<1x128xf32, #tpu.memory_space<vmem>>, %arg5: memref<32x128xbf16, #tpu.memory_space<vmem>>) attributes {dimension_semantics = [#tpu.dimension_semantics<parallel>, #tpu.dimension_semantics<parallel>], iteration_bounds = array<i64: 1, 1>, scalar_prefetch = 0 : i64, scratch_operands = 0 : i64, tpu.core_type = #tpu.core_type<tc>, window_params = [{transform_indices = @transform_0, window_bounds = array<i64: 32, 64>}, {transform_indices = @transform_1, window_bounds = array<i64: 64, 128>}, {transform_indices = @transform_2, window_bounds = array<i64: 1, 128>}, {transform_indices = @transform_3, window_bounds = array<i64: 32, 128>}]} {
    %c0 = arith.constant 0 : index
    %c0_0 = arith.constant 0 : index
    %0 = vector.load %arg2[%c0, %c0_0] : memref<32x64xbf16, #tpu.memory_space<vmem>>, vector<32x64xbf16>
    %c0_1 = arith.constant 0 : index
    %c0_2 = arith.constant 0 : index
    %1 = vector.load %arg3[%c0_1, %c0_2] : memref<64x128xbf16, #tpu.memory_space<vmem>>, vector<64x128xbf16>
    %cst = arith.constant dense<0.000000e+00> : vector<32x128xf32>
    %2 = tpu.matmul %0, %1, %cst {dimension_numbers = #tpu.dot_dimension_numbers<[1], [0], [0], [1], [0, 0, 1, 1], [], []>} : vector<32x64xbf16>, vector<64x128xbf16>, vector<32x128xf32> -> vector<32x128xf32>
    %c0_3 = arith.constant 0 : index
    %c0_4 = arith.constant 0 : index
    %3 = vector.load %arg4[%c0_3, %c0_4] : memref<1x128xf32, #tpu.memory_space<vmem>>, vector<1x128xf32>
    %4 = vector.broadcast %3 : vector<1x128xf32> to vector<32x128xf32>
    %5 = arith.addf %2, %4 : vector<32x128xf32>
    %6 = arith.truncf %5 : vector<32x128xf32> to vector<32x128xbf16>
    %c0_5 = arith.constant 0 : index
    %c0_6 = arith.constant 0 : index
    %7 = vector.load %arg5[%c0_5, %c0_6] : memref<32x128xbf16, #tpu.memory_space<vmem>>, vector<32x128xbf16>
    tpu.vector_store %arg5[%c0_5, %c0_6], %6 {strides = array<i32>} : memref<32x128xbf16, #tpu.memory_space<vmem>>, vector<32x128xbf16>,
    return
  }
  func.func @transform_0(%arg0: i32, %arg1: i32) -> (i32, i32) {
    %c0_i32 = arith.constant 0 : i32
    %c0_i32_0 = arith.constant 0 : i32
    return %arg0, %c0_i32 : i32, i32
  }
  func.func @transform_1(%arg0: i32, %arg1: i32) -> (i32, i32) {
    %c0_i32 = arith.constant 0 : i32
    %c0_i32_0 = arith.constant 0 : i32
    return %c0_i32, %arg1 : i32, i32
  }
  func.func @transform_2(%arg0: i32, %arg1: i32) -> (i32, i32) {
    %c0_i32 = arith.constant 0 : i32
    %c0_i32_0 = arith.constant 0 : i32
    return %c0_i32, %arg1 : i32, i32
  }
  func.func @transform_3(%arg0: i32, %arg1: i32) -> (i32, i32) {
    %c0_i32 = arith.constant 0 : i32
    return %arg0, %arg1 : i32, i32
  }
}

module attributes {stable_mosaic.version = 11 : i64} {
  func.func @_mean_hw_kernel(%arg0: i32, %arg1: i32, %arg2: memref<2x16x128xbf16, #tpu.memory_space<vmem>>, %arg3: memref<2x128xf32, #tpu.memory_space<vmem>>) attributes {dimension_semantics = [#tpu.dimension_semantics<parallel>, #tpu.dimension_semantics<arbitrary>], iteration_bounds = array<i64: 1, 1>, scalar_prefetch = 0 : i64, scratch_operands = 0 : i64, tpu.core_type = #tpu.core_type<tc>, window_params = [{transform_indices = @transform_0, window_bounds = array<i64: 2, 16, 128>}, {transform_indices = @transform_1, window_bounds = array<i64: 2, 128>}]} {
    %c0_i32 = arith.constant 0 : i32
    %0 = arith.cmpi eq, %arg1, %c0_i32 : i32
    %1 = arith.extui %0 : i1 to i32
    %c0_i32_0 = arith.constant 0 : i32
    %2 = arith.cmpi ne, %1, %c0_i32_0 : i32
    scf.if %2 {
      %cst_8 = arith.constant 0.000000e+00 : f32
      %11 = vector.broadcast %cst_8 : f32 to vector<2x128xf32>
      %c0_9 = arith.constant 0 : index
      %c0_10 = arith.constant 0 : index
      %12 = vector.load %arg3[%c0_9, %c0_10] : memref<2x128xf32, #tpu.memory_space<vmem>>, vector<2x128xf32>
      tpu.vector_store %arg3[%c0_9, %c0_10], %11 {strides = array<i32>} : memref<2x128xf32, #tpu.memory_space<vmem>>, vector<2x128xf32>,
    } else {
    }
    %c0 = arith.constant 0 : index
    %c0_1 = arith.constant 0 : index
    %3 = vector.load %arg3[%c0, %c0_1] : memref<2x128xf32, #tpu.memory_space<vmem>>, vector<2x128xf32>
    %c0_2 = arith.constant 0 : index
    %c0_3 = arith.constant 0 : index
    %c0_4 = arith.constant 0 : index
    %4 = vector.load %arg2[%c0_2, %c0_3, %c0_4] : memref<2x16x128xbf16, #tpu.memory_space<vmem>>, vector<2x16x128xbf16>
    %5 = arith.extf %4 : vector<2x16x128xbf16> to vector<2x16x128xf32>
    %cst = arith.constant dense<0.000000e+00> : vector<2x128xf32>
    %6 = vector.multi_reduction <add>, %5, %cst [1] : vector<2x16x128xf32> to vector<2x128xf32>
    %cst_5 = arith.constant 6.250000e-02 : f32
    %7 = vector.broadcast %cst_5 : f32 to vector<2x128xf32>
    %8 = arith.mulf %6, %7 : vector<2x128xf32>
    %9 = arith.addf %3, %8 : vector<2x128xf32>
    %c0_6 = arith.constant 0 : index
    %c0_7 = arith.constant 0 : index
    %10 = vector.load %arg3[%c0_6, %c0_7] : memref<2x128xf32, #tpu.memory_space<vmem>>, vector<2x128xf32>
    tpu.vector_store %arg3[%c0_6, %c0_7], %9 {strides = array<i32>} : memref<2x128xf32, #tpu.memory_space<vmem>>, vector<2x128xf32>,
    return
  }
  func.func @transform_0(%arg0: i32, %arg1: i32) -> (i32, i32, i32) {
    %c0_i32 = arith.constant 0 : i32
    %c0_i32_0 = arith.constant 0 : i32
    return %arg0, %arg1, %c0_i32 : i32, i32, i32
  }
  func.func @transform_1(%arg0: i32, %arg1: i32) -> (i32, i32) {
    %c0_i32 = arith.constant 0 : i32
    %c0_i32_0 = arith.constant 0 : i32
    return %arg0, %c0_i32 : i32, i32
  }
}

</mosaic_0001>

<bundles_post_ra>
// kernel: resnet_forward.8
= control target key start
LH: loop header
LB: loop body
LE: loop exit
PB: predicated region body
PF: predicated region fallthrough
CT: control target
= control target key end

     0   :  { %s1288_s12 = smov 0   ;;  %s1290_s13 = smov 0   ;;  %s1508_s0 = inlined_call_operand.vmem [shape: bf16[512,147], index: 0, kind: input, shape index: {}]   ;;  %s1509_s1 = inlined_call_operand.vmem [shape: bf16[147,64], index: 1, kind: input, shape index: {}]   ;;  %s1510_s2 = inlined_call_operand.vmem [shape: f32[1,64], index: 2, kind: input, shape index: {}]   ;;  %s1511_s3 = inlined_call_operand.vmem [shape: bf16[512,64], index: 3, kind: output, shape index: {}]  }
   0x1   :  { %s1292_s14 = smov 0  }
   0x2 LB: > { %s25_s15 = sadd.s32 1, %s1260_s13  ;;  %p1006_p0 = scmp.ge.s32.totalorder %s1264_s14, 1  ;;  %s1264_s14 = sphi %s1292_s14, %s13_s14   ;;  %s1260_s13 = sphi %s1290_s13, %s1513_s13   ;;  %s1256_s12 = sphi %s1288_s12, %s1512_s12  }
   0x3   : > { %p27_p1 = scmp.ge.s32.totalorder %s25_s15, 2  ;;  %p170_p2 = scmp.lt.s32.totalorder %s1264_s14, 3 }
   0x5   : > { %s1515_s15 = smov (%p27_p1, %s25_s15), 0  ;;  %p171_p3 = pnand %p1006_p0, %p170_p2 }
   0x6   : > { %v1184_v0 = vld [vmem:[%s1509_s1] sm:$0xff] (!%p171_p3)   ;;  %v1266_v1 = vmov (!%p171_p3), 0   ;;  %v1185_v2 = vld [vmem:[%s1509_s1 + $0x8] sm:$0xff] (!%p171_p3)   ;;  %v1186_v3 = vld [vmem:[%s1509_s1 + $0x10] sm:$0xff] (!%p171_p3)   ;;  %s1007_s22 = sshll.u32 (!%p171_p3), %s1256_s12, 5  ;;  %vm488_vm0 = vcmask (!%p171_p3), 154624  }
   0x7   : > { %174 = sbr.rel (%p171_p3) target bundleno = 324 (0x144), region = 32  ;;  %544 = vmatprep.subr.bf16.mxu0 (!%p171_p3), %v1266_v1  ;;  %1138 = vmatprep.subr.bf16.mxu1 (!%p171_p3), %v1266_v1  ;;  %p206_p4 = scmp.lt.s32.totalorder (!%p171_p3), %s1007_s22, 63  ;;  %v1187_v4 = vld [vmem:[%s1509_s1 + $0x18] sm:$0xff] (!%p171_p3)   ;;  %v1188_v5 = vld [vmem:[%s1509_s1 + $0x20] sm:$0xff] (!%p171_p3)   ;;  %v1189_v8 = vld [vmem:[%s1509_s1 + $0x28] sm:$0xff] (!%p171_p3)   ;;  %vm537_vm1 = vcmask (!%p171_p3), 1040384  }
   0x8   : > { %545 = vmatpush1.bf16.msra.mxu0 (!%p171_p3), %v1184_v0  ;;  %1148 = vmatpush1.bf16.msra.mxu1 (!%p171_p3), %v1184_v0  ;;  %v1190_v9 = vld [vmem:[%s1509_s1 + $0x30] sm:$0xff] (!%p171_p3)   ;;  %v1191_v10 = vld [vmem:[%s1509_s1 + $0x38] sm:$0xff] (!%p171_p3)   ;;  %vm538_vm2 = vcmask (!%p171_p3), 1041408   ;;  %v1267_v11 = vmov (!%p171_p3), 65535   ;;  %v1192_v13 = vld [vmem:[%s1509_s1 + $0x40] sm:$0xff] (!%p171_p3)   ;;  %vm865_vm3 = vcmask (!%p171_p3), 519168  }
   0x9   : > { %546 = vmatprep.subr.bf16.mxu0 (!%p171_p3), %v1266_v1  ;;  %1139 = vmatprep.subr.bf16.mxu1 (!%p171_p3), %v1266_v1  ;;  %v539_v12 = vsel (!%p171_p3), %vm537_vm1, 4294967295, %v1267_v11  ;;  %v1193_v14 = vld [vmem:[%s1509_s1 + $0x48] ss:$0 sps:$4 sm:$0x33] (!%p171_p3)   ;;  %v1395_v47 = vld [vmem:[%s1510_s2] ss:$0 sm:$0xff] (!%p171_p3) }
   0xa   : > { %v540_v15 = vsel (!%p171_p3), %vm538_vm2, %v539_v12, 0 }
   0xb   : > { %v542_v16 = vand.u32 (!%p171_p3), %v1193_v14, %v540_v15 }
   0xc   : > { %547 = vmatpush1.bf16.msra.mxu0 (!%p171_p3), %v1185_v2  ;;  %1149 = vmatpush1.bf16.msra.mxu1 (!%p171_p3), %v1185_v2 }
   0xd   : > { %548 = vmatprep.subr.bf16.mxu0 (!%p171_p3), %v1266_v1  ;;  %1140 = vmatprep.subr.bf16.mxu1 (!%p171_p3), %v1266_v1 }
   0xe   : > { %s1517_s22 = smov (!%p206_p4, %s1007_s22), 63 }
   0xf   : > { %s1105_s25 = sshll.u32 %s1517_s22, 3  ;;  %s1011_s19 = sshll.u32 %s1517_s22, 2 }
  0x10   : > { %549 = vmatpush1.bf16.msra.mxu0 %v1186_v3  ;;  %1150 = vmatpush1.bf16.msra.mxu1 %v1186_v3  ;;  %s1324_s28 = scalar_lea.vmem %s1508_s0, %s1105_s25  ;;  %s1405_s22 = scalar_lea.vmem %s1511_s3, %s1011_s19 }
  0x11   : > { %550 = vmatprep.subr.bf16.mxu0 %v1266_v1  ;;  %1141 = vmatprep.subr.bf16.mxu1 %v1266_v1  ;;  %v1196_v6 = vld [vmem:[%s1324_s28 + $0x4] ss:$8 sps:$4 sm:$0xff]   ;;  %v1194_v17 = vld [vmem:[%s1324_s28] ss:$8 sps:$4 sm:$0xff]   ;;  %v1200_v19 = vld [vmem:[%s1324_s28 + $0x14] ss:$8 sps:$4 sm:$0xff]  }
  0x12   : > { %v1199_v7 = vld [vmem:[%s1324_s28 + $0x84] ss:$8 sps:$4 sm:$0xff]   ;;  %1055 = vmatprep.mubr.msk.bf16.mxu0 %vm488_vm0, %v1196_v6  ;;  %v1197_v18 = vld [vmem:[%s1324_s28 + $0x80] ss:$8 sps:$4 sm:$0xff]   ;;  %v1202_v20 = vld [vmem:[%s1324_s28 + $0x94] ss:$8 sps:$4 sm:$0xff]  }
  0x13   : > { %1063 = vmatprep.mubr.msk.bf16.mxu1 %vm488_vm0, %v1199_v7  ;;  %v1204_v21 = vld [vmem:[%s1324_s28 + $0x10] ss:$8 sps:$4 sm:$0xff]   ;;  %v1206_v23 = vld [vmem:[%s1324_s28 + $0x24] ss:$8 sps:$4 sm:$0xff]   ;;  %v1210_v25 = vld [vmem:[%s1324_s28 + $0x20] ss:$8 sps:$4 sm:$0xff]  }
  0x14   : > { %551 = vmatpush1.bf16.msra.mxu0 %v1187_v4  ;;  %1151 = vmatpush1.bf16.msra.mxu1 %v1187_v4  ;;  %v1205_v22 = vld [vmem:[%s1324_s28 + $0x90] ss:$8 sps:$4 sm:$0xff]   ;;  %v1208_v24 = vld [vmem:[%s1324_s28 + $0xa4] ss:$8 sps:$4 sm:$0xff]   ;;  %v1211_v26 = vld [vmem:[%s1324_s28 + $0xa0] ss:$8 sps:$4 sm:$0xff]  }
  0x15   : > { %552 = vmatprep.subr.bf16.mxu0 %v1266_v1  ;;  %1142 = vmatprep.subr.bf16.mxu1 %v1266_v1  ;;  %v1212_v27 = vld [vmem:[%s1324_s28 + $0x34] ss:$8 sps:$4 sm:$0xff]   ;;  %v1216_v29 = vld [vmem:[%s1324_s28 + $0x30] ss:$8 sps:$4 sm:$0xff]   ;;  %v1218_v31 = vld [vmem:[%s1324_s28 + $0x44] ss:$8 sps:$4 sm:$0xff]  }
  0x16   : > { %v1214_v28 = vld [vmem:[%s1324_s28 + $0xb4] ss:$8 sps:$4 sm:$0xff]   ;;  %v1217_v30 = vld [vmem:[%s1324_s28 + $0xb0] ss:$8 sps:$4 sm:$0xff]   ;;  %v1220_v32 = vld [vmem:[%s1324_s28 + $0xc4] ss:$8 sps:$4 sm:$0xff]  }
  0x17   : > { %v1222_v33 = vld [vmem:[%s1324_s28 + $0x40] ss:$8 sps:$4 sm:$0xff]   ;;  %v1224_v35 = vld [vmem:[%s1324_s28 + $0x54] ss:$8 sps:$4 sm:$0xff]   ;;  %v1228_v37 = vld [vmem:[%s1324_s28 + $0x50] ss:$8 sps:$4 sm:$0xff]  }
  0x18   : > { %553 = vmatpush1.bf16.msra.mxu0 %v1188_v5  ;;  %1152 = vmatpush1.bf16.msra.mxu1 %v1188_v5  ;;  %v1223_v34 = vld [vmem:[%s1324_s28 + $0xc0] ss:$8 sps:$4 sm:$0xff]   ;;  %v1226_v36 = vld [vmem:[%s1324_s28 + $0xd4] ss:$8 sps:$4 sm:$0xff]   ;;  %v1229_v38 = vld [vmem:[%s1324_s28 + $0xd0] ss:$8 sps:$4 sm:$0xff]  }
  0x19   : > { %554 = vmatprep.subr.bf16.mxu0 %v1266_v1  ;;  %1143 = vmatprep.subr.bf16.mxu1 %v1266_v1  ;;  %v1230_v39 = vld [vmem:[%s1324_s28 + $0x64] ss:$8 sps:$4 sm:$0xff]   ;;  %v1234_v41 = vld [vmem:[%s1324_s28 + $0x60] ss:$8 sps:$4 sm:$0xff]   ;;  %v1236_v43 = vld [vmem:[%s1324_s28 + $0x74] ss:$8 sps:$4 sm:$0xff]  }
  0x1a   : > { %v1232_v40 = vld [vmem:[%s1324_s28 + $0xe4] ss:$8 sps:$4 sm:$0xff]   ;;  %v1235_v42 = vld [vmem:[%s1324_s28 + $0xe0] ss:$8 sps:$4 sm:$0xff]   ;;  %v1238_v44 = vld [vmem:[%s1324_s28 + $0xf4] ss:$8 sps:$4 sm:$0xff]  }
  0x1b   : > { %v1240_v45 = vld [vmem:[%s1324_s28 + $0x70] ss:$8 sps:$4 sm:$0xff]  }
  0x1c   : > { %555 = vmatpush1.bf16.msra.mxu0 %v1189_v8  ;;  %1153 = vmatpush1.bf16.msra.mxu1 %v1189_v8  ;;  %v1241_v46 = vld [vmem:[%s1324_s28 + $0xf0] ss:$8 sps:$4 sm:$0xff]  }
  0x1d   : > { %556 = vmatprep.subr.bf16.mxu0 %v1266_v1  ;;  %1144 = vmatprep.subr.bf16.mxu1 %v1266_v1 }
  0x20   : > { %557 = vmatpush1.bf16.msra.mxu0 %v1190_v9  ;;  %1154 = vmatpush1.bf16.msra.mxu1 %v1190_v9 }
  0x21   : > { %558 = vmatprep.subr.bf16.mxu0 %v1266_v1  ;;  %1145 = vmatprep.subr.bf16.mxu1 %v1266_v1 }
  0x24   : > { %559 = vmatpush1.bf16.msra.mxu0 %v1191_v10  ;;  %1155 = vmatpush1.bf16.msra.mxu1 %v1191_v10 }
  0x25   : > { %560 = vmatprep.subr.bf16.mxu0 %v1266_v1  ;;  %1146 = vmatprep.subr.bf16.mxu1 %v1266_v1 }
  0x28   : > { %561 = vmatpush1.bf16.msra.mxu0 %v1192_v13  ;;  %1156 = vmatpush1.bf16.msra.mxu1 %v1192_v13 }
  0x29   : > { %562 = vmatprep.subr.bf16.mxu0 %v1266_v1  ;;  %1147 = vmatprep.subr.bf16.mxu1 %v1266_v1 }
  0x2c   : > { %563 = vmatpush1.bf16.msra.mxu0 %v542_v16  ;;  %1157 = vmatpush1.bf16.msra.mxu1 %v542_v16 }
  0x2f   : > { %577 = vmatmul.mubr.bf16.vlgmr.msra.gmra.mrb[0].mxu0 %v1194_v17  ;;  %641 = vmatmul.mubr.bf16.vlgmr.msra.gmra.mrb[0].mxu1 %v1197_v18 }
  0x30   : > { %1056 = vmatprep.mubr.msk.bf16.mxu0 %vm488_vm0, %v1200_v19  ;;  %1064 = vmatprep.mubr.msk.bf16.mxu1 %vm488_vm0, %v1202_v20 }
  0x37   : > { %585 = vmatmul.mubr.bf16.gmra.mrb[4].mxu0 %v1204_v21  ;;  %649 = vmatmul.mubr.bf16.gmra.mrb[4].mxu1 %v1205_v22 }
  0x38   : > { %1057 = vmatprep.mubr.msk.bf16.mxu0 %vm488_vm0, %v1206_v23  ;;  %1065 = vmatprep.mubr.msk.bf16.mxu1 %vm488_vm0, %v1208_v24 }
  0x3f   : > { %593 = vmatmul.mubr.bf16.gmra.mrb[8].mxu0 %v1210_v25  ;;  %657 = vmatmul.mubr.bf16.gmra.mrb[8].mxu1 %v1211_v26 }
  0x40   : > { %1058 = vmatprep.mubr.msk.bf16.mxu0 %vm488_vm0, %v1212_v27  ;;  %1066 = vmatprep.mubr.msk.bf16.mxu1 %vm488_vm0, %v1214_v28 }
  0x47   : > { %601 = vmatmul.mubr.bf16.gmra.mrb[12].mxu0 %v1216_v29  ;;  %665 = vmatmul.mubr.bf16.gmra.mrb[12].mxu1 %v1217_v30 }
  0x48   : > { %1059 = vmatprep.mubr.msk.bf16.mxu0 %vm488_vm0, %v1218_v31  ;;  %1067 = vmatprep.mubr.msk.bf16.mxu1 %vm488_vm0, %v1220_v32 }
  0x4f   : > { %609 = vmatmul.mubr.bf16.gmra.mrb[16].mxu0 %v1222_v33  ;;  %673 = vmatmul.mubr.bf16.gmra.mrb[16].mxu1 %v1223_v34 }
  0x50   : > { %1060 = vmatprep.mubr.msk.bf16.mxu0 %vm488_vm0, %v1224_v35  ;;  %1068 = vmatprep.mubr.msk.bf16.mxu1 %vm488_vm0, %v1226_v36 }
  0x57   : > { %617 = vmatmul.mubr.bf16.gmra.mrb[20].mxu0 %v1228_v37  ;;  %681 = vmatmul.mubr.bf16.gmra.mrb[20].mxu1 %v1229_v38 }
  0x58   : > { %1061 = vmatprep.mubr.msk.bf16.mxu0 %vm488_vm0, %v1230_v39  ;;  %1069 = vmatprep.mubr.msk.bf16.mxu1 %vm488_vm0, %v1232_v40 }
  0x5f   : > { %625 = vmatmul.mubr.bf16.gmra.mrb[24].mxu0 %v1234_v41  ;;  %689 = vmatmul.mubr.bf16.gmra.mrb[24].mxu1 %v1235_v42 }
  0x60   : > { %1062 = vmatprep.mubr.msk.bf16.mxu0 %vm488_vm0, %v1236_v43  ;;  %1070 = vmatprep.mubr.msk.bf16.mxu1 %vm488_vm0, %v1238_v44 }
  0x67   : > { %633 = vmatmul.mubr.bf16.gmra.mrb[28].mxu0 %v1240_v45  ;;  %697 = vmatmul.mubr.bf16.gmra.mrb[28].mxu1 %v1241_v46 }
 0x102   : > { %v578_v48 = vpop.f32.mrb[0].mxu0  ;;  %v642_v49 = vpop.f32.mrb[0].mxu1 }
 0x103   : > { %v579_v50 = vadd.f32 %v1395_v47, %v578_v48  ;;  %v643_v51 = vadd.f32 %v1395_v47, %v642_v49  ;;  %v580_v52 = vpop.f32.mrb[1].mxu0  ;;  %v644_v53 = vpop.f32.mrb[1].mxu1 }
 0x104   : > { %v581_v54 = vpop.f32.mrb[2].mxu0  ;;  %v645_v55 = vpop.f32.mrb[2].mxu1 }
 0x105   : > { %v705_v56 = vmax.f32 %v579_v50, 0.0  ;;  %v721_v57 = vmax.f32 %v643_v51, 0.0  ;;  %v582_v58 = vadd.f32 %v1395_v47, %v581_v54  ;;  %v646_v59 = vadd.f32 %v1395_v47, %v645_v55  ;;  %v583_v60 = vpop.f32.mrb[3].mxu0  ;;  %v647_v61 = vpop.f32.mrb[3].mxu1 }
 0x107   : > { %v1106_v62 = vpack.c.bf16 %v705_v56, %v705_v56  ;;  %v1122_v63 = vpack.c.bf16 %v721_v57, %v721_v57  ;;  %v706_v0 = vmax.f32 %v582_v58, 0.0  ;;  %v722_v1 = vmax.f32 %v646_v59, 0.0 }
 0x109   : > { %866 = vst.msk [vmem:[%s1405_s22] sm:$0xf] %vm865_vm3, %v1106_v62  ;;  %882 = vst.msk [vmem:[%s1405_s22 + $0x40] sm:$0xf] %vm865_vm3, %v1122_v63  ;;  %v1107_v2 = vpack.c.bf16 %v706_v0, %v706_v0  ;;  %v1123_v3 = vpack.c.bf16 %v722_v1, %v722_v1 }
 0x10a   : > { %v586_v4 = vpop.f32.mrb[4].mxu0  ;;  %v650_v5 = vpop.f32.mrb[4].mxu1 }
 0x10b   : > { %867 = vst.msk [vmem:[%s1405_s22 + $0x4] sm:$0xf] %vm865_vm3, %v1107_v2  ;;  %883 = vst.msk [vmem:[%s1405_s22 + $0x44] sm:$0xf] %vm865_vm3, %v1123_v3  ;;  %v587_v6 = vadd.f32 %v1395_v47, %v586_v4  ;;  %v651_v7 = vadd.f32 %v1395_v47, %v650_v5  ;;  %v588_v8 = vpop.f32.mrb[5].mxu0  ;;  %v652_v9 = vpop.f32.mrb[5].mxu1 }
 0x10c   : > { %v589_v10 = vpop.f32.mrb[6].mxu0  ;;  %v653_v11 = vpop.f32.mrb[6].mxu1 }
 0x10d   : > { %v707_v12 = vmax.f32 %v587_v6, 0.0  ;;  %v723_v13 = vmax.f32 %v651_v7, 0.0  ;;  %v590_v14 = vadd.f32 %v1395_v47, %v589_v10  ;;  %v654_v15 = vadd.f32 %v1395_v47, %v653_v11  ;;  %v591_v16 = vpop.f32.mrb[7].mxu0  ;;  %v655_v17 = vpop.f32.mrb[7].mxu1 }
 0x10f   : > { %v1108_v18 = vpack.c.bf16 %v707_v12, %v707_v12  ;;  %v1124_v19 = vpack.c.bf16 %v723_v13, %v723_v13  ;;  %v708_v20 = vmax.f32 %v590_v14, 0.0  ;;  %v724_v21 = vmax.f32 %v654_v15, 0.0 }
 0x111   : > { %868 = vst.msk [vmem:[%s1405_s22 + $0x8] sm:$0xf] %vm865_vm3, %v1108_v18  ;;  %884 = vst.msk [vmem:[%s1405_s22 + $0x48] sm:$0xf] %vm865_vm3, %v1124_v19  ;;  %v1109_v22 = vpack.c.bf16 %v708_v20, %v708_v20  ;;  %v1125_v23 = vpack.c.bf16 %v724_v21, %v724_v21 }
 0x112   : > { %v594_v24 = vpop.f32.mrb[8].mxu0  ;;  %v658_v25 = vpop.f32.mrb[8].mxu1 }
 0x113   : > { %869 = vst.msk [vmem:[%s1405_s22 + $0xc] sm:$0xf] %vm865_vm3, %v1109_v22  ;;  %885 = vst.msk [vmem:[%s1405_s22 + $0x4c] sm:$0xf] %vm865_vm3, %v1125_v23  ;;  %v595_v26 = vadd.f32 %v1395_v47, %v594_v24  ;;  %v659_v27 = vadd.f32 %v1395_v47, %v658_v25  ;;  %v596_v28 = vpop.f32.mrb[9].mxu0  ;;  %v660_v29 = vpop.f32.mrb[9].mxu1 }
 0x114   : > { %v597_v30 = vpop.f32.mrb[10].mxu0  ;;  %v661_v31 = vpop.f32.mrb[10].mxu1 }
 0x115   : > { %v709_v32 = vmax.f32 %v595_v26, 0.0  ;;  %v725_v33 = vmax.f32 %v659_v27, 0.0  ;;  %v598_v34 = vadd.f32 %v1395_v47, %v597_v30  ;;  %v662_v35 = vadd.f32 %v1395_v47, %v661_v31  ;;  %v599_v36 = vpop.f32.mrb[11].mxu0  ;;  %v663_v37 = vpop.f32.mrb[11].mxu1 }
 0x117   : > { %v1110_v38 = vpack.c.bf16 %v709_v32, %v709_v32  ;;  %v1126_v39 = vpack.c.bf16 %v725_v33, %v725_v33  ;;  %v710_v40 = vmax.f32 %v598_v34, 0.0  ;;  %v726_v41 = vmax.f32 %v662_v35, 0.0 }
 0x119   : > { %870 = vst.msk [vmem:[%s1405_s22 + $0x10] sm:$0xf] %vm865_vm3, %v1110_v38  ;;  %886 = vst.msk [vmem:[%s1405_s22 + $0x50] sm:$0xf] %vm865_vm3, %v1126_v39  ;;  %v1111_v42 = vpack.c.bf16 %v710_v40, %v710_v40  ;;  %v1127_v43 = vpack.c.bf16 %v726_v41, %v726_v41 }
 0x11a   : > { %v602_v44 = vpop.f32.mrb[12].mxu0  ;;  %v666_v45 = vpop.f32.mrb[12].mxu1 }
 0x11b   : > { %871 = vst.msk [vmem:[%s1405_s22 + $0x14] sm:$0xf] %vm865_vm3, %v1111_v42  ;;  %887 = vst.msk [vmem:[%s1405_s22 + $0x54] sm:$0xf] %vm865_vm3, %v1127_v43  ;;  %v603_v46 = vadd.f32 %v1395_v47, %v602_v44  ;;  %v667_v48 = vadd.f32 %v1395_v47, %v666_v45  ;;  %v604_v49 = vpop.f32.mrb[13].mxu0  ;;  %v668_v50 = vpop.f32.mrb[13].mxu1 }
 0x11c   : > { %v605_v51 = vpop.f32.mrb[14].mxu0  ;;  %v669_v52 = vpop.f32.mrb[14].mxu1 }
 0x11d   : > { %v711_v53 = vmax.f32 %v603_v46, 0.0  ;;  %v727_v54 = vmax.f32 %v667_v48, 0.0  ;;  %v606_v55 = vadd.f32 %v1395_v47, %v605_v51  ;;  %v670_v56 = vadd.f32 %v1395_v47, %v669_v52  ;;  %v607_v57 = vpop.f32.mrb[15].mxu0  ;;  %v671_v58 = vpop.f32.mrb[15].mxu1 }
 0x11f   : > { %v1112_v59 = vpack.c.bf16 %v711_v53, %v711_v53  ;;  %v1128_v60 = vpack.c.bf16 %v727_v54, %v727_v54  ;;  %v712_v61 = vmax.f32 %v606_v55, 0.0  ;;  %v728_v62 = vmax.f32 %v670_v56, 0.0 }
 0x121   : > { %872 = vst.msk [vmem:[%s1405_s22 + $0x18] sm:$0xf] %vm865_vm3, %v1112_v59  ;;  %888 = vst.msk [vmem:[%s1405_s22 + $0x58] sm:$0xf] %vm865_vm3, %v1128_v60  ;;  %v1113_v63 = vpack.c.bf16 %v712_v61, %v712_v61  ;;  %v1129_v0 = vpack.c.bf16 %v728_v62, %v728_v62 }
 0x122   : > { %v610_v1 = vpop.f32.mrb[16].mxu0  ;;  %v674_v2 = vpop.f32.mrb[16].mxu1 }
 0x123   : > { %873 = vst.msk [vmem:[%s1405_s22 + $0x1c] sm:$0xf] %vm865_vm3, %v1113_v63  ;;  %889 = vst.msk [vmem:[%s1405_s22 + $0x5c] sm:$0xf] %vm865_vm3, %v1129_v0  ;;  %v611_v3 = vadd.f32 %v1395_v47, %v610_v1  ;;  %v675_v4 = vadd.f32 %v1395_v47, %v674_v2  ;;  %v612_v5 = vpop.f32.mrb[17].mxu0  ;;  %v676_v6 = vpop.f32.mrb[17].mxu1 }
 0x124   : > { %v613_v7 = vpop.f32.mrb[18].mxu0  ;;  %v677_v8 = vpop.f32.mrb[18].mxu1 }
 0x125   : > { %v713_v9 = vmax.f32 %v611_v3, 0.0  ;;  %v729_v10 = vmax.f32 %v675_v4, 0.0  ;;  %v614_v11 = vadd.f32 %v1395_v47, %v613_v7  ;;  %v678_v12 = vadd.f32 %v1395_v47, %v677_v8  ;;  %v615_v13 = vpop.f32.mrb[19].mxu0  ;;  %v679_v14 = vpop.f32.mrb[19].mxu1 }
 0x127   : > { %v1114_v15 = vpack.c.bf16 %v713_v9, %v713_v9  ;;  %v1130_v16 = vpack.c.bf16 %v729_v10, %v729_v10  ;;  %v714_v17 = vmax.f32 %v614_v11, 0.0  ;;  %v730_v18 = vmax.f32 %v678_v12, 0.0 }
 0x129   : > { %874 = vst.msk [vmem:[%s1405_s22 + $0x20] sm:$0xf] %vm865_vm3, %v1114_v15  ;;  %890 = vst.msk [vmem:[%s1405_s22 + $0x60] sm:$0xf] %vm865_vm3, %v1130_v16  ;;  %v1115_v19 = vpack.c.bf16 %v714_v17, %v714_v17  ;;  %v1131_v20 = vpack.c.bf16 %v730_v18, %v730_v18 }
 0x12a   : > { %v618_v21 = vpop.f32.mrb[20].mxu0  ;;  %v682_v22 = vpop.f32.mrb[20].mxu1 }
 0x12b   : > { %875 = vst.msk [vmem:[%s1405_s22 + $0x24] sm:$0xf] %vm865_vm3, %v1115_v19  ;;  %891 = vst.msk [vmem:[%s1405_s22 + $0x64] sm:$0xf] %vm865_vm3, %v1131_v20  ;;  %v619_v23 = vadd.f32 %v1395_v47, %v618_v21  ;;  %v683_v24 = vadd.f32 %v1395_v47, %v682_v22  ;;  %v620_v25 = vpop.f32.mrb[21].mxu0  ;;  %v684_v26 = vpop.f32.mrb[21].mxu1 }
 0x12c   : > { %v621_v27 = vpop.f32.mrb[22].mxu0  ;;  %v685_v28 = vpop.f32.mrb[22].mxu1 }
 0x12d   : > { %v715_v29 = vmax.f32 %v619_v23, 0.0  ;;  %v731_v30 = vmax.f32 %v683_v24, 0.0  ;;  %v622_v31 = vadd.f32 %v1395_v47, %v621_v27  ;;  %v686_v32 = vadd.f32 %v1395_v47, %v685_v28  ;;  %v623_v33 = vpop.f32.mrb[23].mxu0  ;;  %v687_v34 = vpop.f32.mrb[23].mxu1 }
 0x12f   : > { %v1116_v35 = vpack.c.bf16 %v715_v29, %v715_v29  ;;  %v1132_v36 = vpack.c.bf16 %v731_v30, %v731_v30  ;;  %v716_v37 = vmax.f32 %v622_v31, 0.0  ;;  %v732_v38 = vmax.f32 %v686_v32, 0.0 }
 0x131   : > { %876 = vst.msk [vmem:[%s1405_s22 + $0x28] sm:$0xf] %vm865_vm3, %v1116_v35  ;;  %892 = vst.msk [vmem:[%s1405_s22 + $0x68] sm:$0xf] %vm865_vm3, %v1132_v36  ;;  %v1117_v39 = vpack.c.bf16 %v716_v37, %v716_v37  ;;  %v1133_v40 = vpack.c.bf16 %v732_v38, %v732_v38 }
 0x132   : > { %v626_v41 = vpop.f32.mrb[24].mxu0  ;;  %v690_v42 = vpop.f32.mrb[24].mxu1 }
 0x133   : > { %877 = vst.msk [vmem:[%s1405_s22 + $0x2c] sm:$0xf] %vm865_vm3, %v1117_v39  ;;  %893 = vst.msk [vmem:[%s1405_s22 + $0x6c] sm:$0xf] %vm865_vm3, %v1133_v40  ;;  %v627_v43 = vadd.f32 %v1395_v47, %v626_v41  ;;  %v691_v44 = vadd.f32 %v1395_v47, %v690_v42  ;;  %v628_v45 = vpop.f32.mrb[25].mxu0  ;;  %v692_v46 = vpop.f32.mrb[25].mxu1 }
 0x134   : > { %v629_v48 = vpop.f32.mrb[26].mxu0  ;;  %v693_v49 = vpop.f32.mrb[26].mxu1 }
 0x135   : > { %v717_v50 = vmax.f32 %v627_v43, 0.0  ;;  %v733_v51 = vmax.f32 %v691_v44, 0.0  ;;  %v630_v52 = vadd.f32 %v1395_v47, %v629_v48  ;;  %v694_v53 = vadd.f32 %v1395_v47, %v693_v49  ;;  %v631_v54 = vpop.f32.mrb[27].mxu0  ;;  %v695_v55 = vpop.f32.mrb[27].mxu1 }
 0x137   : > { %v1118_v56 = vpack.c.bf16 %v717_v50, %v717_v50  ;;  %v1134_v57 = vpack.c.bf16 %v733_v51, %v733_v51  ;;  %v718_v58 = vmax.f32 %v630_v52, 0.0  ;;  %v734_v59 = vmax.f32 %v694_v53, 0.0 }
 0x139   : > { %878 = vst.msk [vmem:[%s1405_s22 + $0x30] sm:$0xf] %vm865_vm3, %v1118_v56  ;;  %894 = vst.msk [vmem:[%s1405_s22 + $0x70] sm:$0xf] %vm865_vm3, %v1134_v57  ;;  %v1119_v60 = vpack.c.bf16 %v718_v58, %v718_v58  ;;  %v1135_v61 = vpack.c.bf16 %v734_v59, %v734_v59 }
 0x13a   : > { %v634_v62 = vpop.f32.mrb[28].mxu0  ;;  %v698_v63 = vpop.f32.mrb[28].mxu1 }
 0x13b   : > { %879 = vst.msk [vmem:[%s1405_s22 + $0x34] sm:$0xf] %vm865_vm3, %v1119_v60  ;;  %895 = vst.msk [vmem:[%s1405_s22 + $0x74] sm:$0xf] %vm865_vm3, %v1135_v61  ;;  %v635_v0 = vadd.f32 %v1395_v47, %v634_v62  ;;  %v699_v1 = vadd.f32 %v1395_v47, %v698_v63  ;;  %v636_v2 = vpop.f32.mrb[29].mxu0  ;;  %v700_v3 = vpop.f32.mrb[29].mxu1 }
 0x13c   : > { %v637_v4 = vpop.f32.mrb[30].mxu0  ;;  %v701_v5 = vpop.f32.mrb[30].mxu1 }
 0x13d   : > { %v719_v6 = vmax.f32 %v635_v0, 0.0  ;;  %v735_v7 = vmax.f32 %v699_v1, 0.0  ;;  %v638_v8 = vadd.f32 %v1395_v47, %v637_v4  ;;  %v702_v9 = vadd.f32 %v1395_v47, %v701_v5  ;;  %v639_v10 = vpop.f32.mrb[31].mxu0  ;;  %v703_v11 = vpop.f32.mrb[31].mxu1 }
 0x13f   : > { %v1120_v12 = vpack.c.bf16 %v719_v6, %v719_v6  ;;  %v1136_v13 = vpack.c.bf16 %v735_v7, %v735_v7  ;;  %v720_v14 = vmax.f32 %v638_v8, 0.0  ;;  %v736_v15 = vmax.f32 %v702_v9, 0.0 }
 0x141   : > { %880 = vst.msk [vmem:[%s1405_s22 + $0x38] sm:$0xf] %vm865_vm3, %v1120_v12  ;;  %896 = vst.msk [vmem:[%s1405_s22 + $0x78] sm:$0xf] %vm865_vm3, %v1136_v13  ;;  %v1121_v16 = vpack.c.bf16 %v720_v14, %v720_v14  ;;  %v1137_v17 = vpack.c.bf16 %v736_v15, %v736_v15 }
 0x143   : > { %881 = vst.msk [vmem:[%s1405_s22 + $0x3c] sm:$0xf] %vm865_vm3, %v1121_v16  ;;  %897 = vst.msk [vmem:[%s1405_s22 + $0x7c] sm:$0xf] %vm865_vm3, %v1137_v17 }
 0x144 PF: > { %s13_s14 = sadd.s32 1, %s1264_s14   ;;  %s1512_s12 = smov %s1260_s13 }
 0x145   : > { %p10_p5 = scmp.ge.s32.totalorder %s13_s14, 4   ;;  %s1513_s13 = smov %s1515_s15 }
 0x147   :  { %12 = sbr.rel (!%p10_p5) target bundleno = 2 (0x2), region = 68 }

// kernel: resnet_forward.9
= control target key start
LH: loop header
LB: loop body
LE: loop exit
PB: predicated region body
PF: predicated region fallthrough
CT: control target
= control target key end

     0   :  { %s779_s6 = smov 0   ;;  %s1043_s0 = inlined_call_operand.vmem [shape: bf16[2,4,9,9,64], index: 0, kind: input, shape index: {}]   ;;  %s1044_s1 = inlined_call_operand.vmem [shape: bf16[2,8,8,64], index: 1, kind: output, shape index: {}]  }
   0x1 LB: > { %s685_s7 = sadd.s32 4294967295, %s767_s6   ;;  %p689_p0 = scmp.ge.s32.totalorder %s767_s6, 1  ;;  %s767_s6 = sphi %s779_s6, %s11_s6  }
   0x2   : > { %p87_p1 = scmp.lt.s32.totalorder %s767_s6, 3 }
   0x4   : > { %p88_p2 = pnand %p689_p0, %p87_p1 }
   0x5   : > { %p107_p3 = scmp.lt.s32.totalorder (!%p88_p2), %s685_s7, 1  ;;  %vm150_vm0 = vsmask.f32 (!%p88_p2), 3328  ;;  %vm151_vm1 = vsmask.f32 (!%p88_p2), 7440  ;;  %vm621_vm3 = vcmask (!%p88_p2), 519168  }
   0x6   : > { %91 = sbr.rel (%p88_p2) target bundleno = 100 (0x64), region = 24  ;;  %vm809_vm2 = vmor (!%p88_p2), %vm150_vm0, %vm151_vm1 }
   0xd   : > { %s1048_s7 = smov (!%p107_p3, %s685_s7), 1 }
   0xe   : > { %s752_s8 = smul.u32 288, %s1048_s7  ;;  %s751_s12 = sshll.u32 %s1048_s7, 5 }
   0xf   : > { %s868_s15 = scalar_lea.vmem %s1044_s1, %s751_s12 }
  0x10   : > { %s793_s11 = scalar_lea.vmem %s1043_s0, %s752_s8 }
  0x11   : > { %v117_v0 = vld [vmem:[%s793_s11] sm:$0xf]  ;;  %v142_v1 = vld [vmem:[%s793_s11 + $0x4] sm:$0x1]  ;;  %v701_v5 = vld [vmem:[%s793_s11 + $0x90] sm:$0xf] }
  0x12   : > { %v154_v2 = vshrl.u32 %v117_v0, 16  ;;  %v157_v3 = vshll.u32 %v117_v0, 16  ;;  %v163_v4 = vshll.u32 %v142_v1, 16  ;;  %v693_v6 = vld [vmem:[%s793_s11 + $0x48] sm:$0xf]  ;;  %v324_v8 = vshrl.u32 %v701_v5, 16 }
  0x13   : > { %v717_v7 = vld [vmem:[%s793_s11 + $0x94] sm:$0x1]  ;;  %v327_v9 = vshll.u32 %v701_v5, 16  ;;  %v801_v13 = vld [vmem:[%s793_s11 + $0x8] sm:$0xf]  ;;  %v134_v22 = vmax.bf16 %v693_v6, %v117_v0 }
  0x14   : > { %v156_v10 = vrot.slane %v154_v2, 4  ;;  %v159_v11 = vrot.slane %v157_v3, 5  ;;  %v333_v12 = vshll.u32 %v717_v7, 16  ;;  %v326_v14 = vrot.slane %v324_v8, 4  ;;  %v741_v16 = vld [vmem:[%s793_s11 + $0xc] sm:$0x1] }
  0x15   : > { %v329_v15 = vrot.slane %v327_v9, 5  ;;  %v165_v18 = vrot.slane %v163_v4, 5  ;;  %v494_v19 = vshrl.u32 %v801_v13, 16  ;;  %v497_v20 = vshll.u32 %v801_v13, 16  ;;  %v118_v21 = vld [vmem:[%s793_s11 + $0x8] sm:$0xf] }
  0x16   : > { %v160_v17 = vor.u32 %v159_v11, %v156_v10  ;;  %v503_v25 = vshll.u32 %v741_v16, 16  ;;  %v694_v26 = vld [vmem:[%s793_s11 + $0x50] sm:$0xf]  ;;  %v143_v27 = vld [vmem:[%s793_s11 + $0xc] sm:$0x1]  ;;  %v168_v28 = vshrl.u32 %v118_v21, 16 }
  0x17   : > { %v330_v24 = vor.u32 %v329_v15, %v326_v14  ;;  %v335_v30 = vrot.slane %v333_v12, 5  ;;  %v496_v31 = vrot.slane %v494_v19, 4  ;;  %v499_v32 = vrot.slane %v497_v20, 5  ;;  %v816_v33 = vld [vmem:[%s793_s11 + $0x98] sm:$0xf] }
  0x18   : > { %v161_v29 = vrot.slane %v160_v17, 4  ;;  %v135_v35 = vmax.bf16 %v694_v26, %v118_v21  ;;  %v170_v36 = vrot.slane %v168_v28, 4  ;;  %v171_v37 = vshll.u32 %v118_v21, 16  ;;  %v718_v41 = vld [vmem:[%s793_s11 + $0x9c] sm:$0x1] }
  0x19   : > { %v331_v34 = vrot.slane %v330_v24, 4  ;;  %v500_v39 = vor.u32 %v499_v32, %v496_v31  ;;  %v177_v40 = vshll.u32 %v143_v27, 16  ;;  %v338_v42 = vshrl.u32 %v816_v33, 16  ;;  %v823_v43 = vld [vmem:[%s793_s11 + $0x10] sm:$0xf] }
  0x1a   : > { %v166_v38 = vsel %vm809_vm2, %v161_v29, %v165_v18  ;;  %v825_v45 = vrot.slane %v503_v25, 5  ;;  %v173_v46 = vrot.slane %v171_v37, 5  ;;  %v341_v47 = vshll.u32 %v816_v33, 16  ;;  %v742_v48 = vld [vmem:[%s793_s11 + $0x14] sm:$0x1] }
  0x1b   : > { %v273_v44 = vmax.bf16 %v166_v38, %v134_v22  ;;  %v709_v49 = vld [vmem:[%s793_s11 + $0xd8] sm:$0xf]  ;;  %v501_v50 = vrot.slane %v500_v39, 4  ;;  %v179_v51 = vrot.slane %v177_v40, 5  ;;  %v340_v52 = vrot.slane %v338_v42, 4 }
  0x1c   : > { %v347_v53 = vshll.u32 %v718_v41, 16  ;;  %v174_v55 = vor.u32 %v173_v46, %v170_v36  ;;  %v343_v56 = vrot.slane %v341_v47, 5  ;;  %v508_v57 = vshrl.u32 %v823_v43, 16  ;;  %v832_v58 = vld [vmem:[%s793_s11 + $0x10] sm:$0xf] }
  0x1d   : > { %v290_v54 = vmax.bf16 %v701_v5, %v273_v44  ;;  %v336_v59 = vsel %vm809_vm2, %v331_v34, %v335_v30  ;;  %v511_v61 = vshll.u32 %v823_v43, 16  ;;  %v517_v62 = vshll.u32 %v742_v48, 16  ;;  %v144_v3 = vld [vmem:[%s793_s11 + $0x14] sm:$0x1]  ;;  %v845_v8 = vld [vmem:[%s793_s11 + $0xa0] sm:$0xf] }
  0x1e   : > { %v349_v60 = vrot.slane %v347_v53, 5  ;;  %v175_v0 = vrot.slane %v174_v55, 4  ;;  %v344_v1 = vor.u32 %v343_v56, %v340_v52  ;;  %v510_v2 = vrot.slane %v508_v57, 4  ;;  %v733_v10 = vld [vmem:[%s793_s11 + $0x50] sm:$0xf] }
  0x1f   : > { %v307_v63 = vmax.bf16 %v709_v49, %v290_v54  ;;  %v506_v4 = vsel %vm809_vm2, %v501_v50, %v825_v45  ;;  %v513_v5 = vrot.slane %v511_v61, 5  ;;  %v841_v6 = vrot.slane %v517_v62, 5  ;;  %v710_v16 = vld [vmem:[%s793_s11 + $0xe0] sm:$0xf]  ;;  %v719_v20 = vld [vmem:[%s793_s11 + $0xa4] sm:$0x1] }
  0x20   : > { %v182_v7 = vshrl.u32 %v832_v58, 16  ;;  %v180_v11 = vsel %vm809_vm2, %v175_v0, %v179_v51  ;;  %v345_v12 = vrot.slane %v344_v1, 4  ;;  %v185_v14 = vshll.u32 %v832_v58, 16  ;;  %v695_v24 = vld [vmem:[%s793_s11 + $0x58] sm:$0xf] }
  0x21   : > { %v443_v9 = vmax.bf16 %v336_v59, %v307_v63  ;;  %v274_v15 = vmax.bf16 %v180_v11, %v135_v35  ;;  %v514_v17 = vor.u32 %v513_v5, %v510_v2  ;;  %v191_v19 = vshll.u32 %v144_v3, 16  ;;  %v860_v27 = vld [vmem:[%s793_s11 + $0x18] sm:$0xf]  ;;  %v743_v36 = vld [vmem:[%s793_s11 + $0x1c] sm:$0x1] }
  0x22   : > { %v184_v18 = vrot.slane %v182_v7, 4  ;;  %v350_v22 = vsel %vm809_vm2, %v345_v12, %v349_v60  ;;  %v187_v25 = vrot.slane %v185_v14, 5  ;;  %v352_v26 = vshrl.u32 %v845_v8, 16  ;;  %v873_v40 = vld [vmem:[%s793_s11 + $0x18] sm:$0xf] }
  0x23   : > { %v460_v21 = vmax.bf16 %v801_v13, %v443_v9  ;;  %v291_v28 = vmax.bf16 %v816_v33, %v274_v15  ;;  %v515_v29 = vrot.slane %v514_v17, 4  ;;  %v193_v30 = vrot.slane %v191_v19, 5  ;;  %v880_v46 = vld [vmem:[%s793_s11 + $0x60] sm:$0xf]  ;;  %v734_v48 = vld [vmem:[%s793_s11 + $0x58] sm:$0xf] }
  0x24   : > { %v355_v31 = vshll.u32 %v845_v8, 16  ;;  %v188_v34 = vor.u32 %v187_v25, %v184_v18  ;;  %v354_v13 = vrot.slane %v352_v26, 4  ;;  %v361_v35 = vshll.u32 %v719_v20, 16  ;;  %v145_v52 = vld [vmem:[%s793_s11 + $0x1c] sm:$0x1] }
  0x25   : > { %v477_v32 = vmax.bf16 %v733_v10, %v460_v21  ;;  %v308_v37 = vmax.bf16 %v710_v16, %v291_v28  ;;  %v136_v33 = vmax.bf16 %v695_v24, %v832_v58  ;;  %v522_v39 = vshrl.u32 %v860_v27, 16  ;;  %v890_v57 = vld [vmem:[%s793_s11 + $0xa8] sm:$0xf]  ;;  %v720_v3 = vld [vmem:[%s793_s11 + $0xac] sm:$0x1] }
  0x26   : > { %v357_v38 = vrot.slane %v355_v31, 5  ;;  %v520_v42 = vsel %vm809_vm2, %v515_v29, %v841_v6  ;;  %v189_v44 = vrot.slane %v188_v34, 4  ;;  %v525_v45 = vshll.u32 %v860_v27, 16  ;;  %v711_v60 = vld [vmem:[%s793_s11 + $0xe8] sm:$0xf] }
  0x27   : > { %v613_v41 = vmax.bf16 %v506_v4, %v477_v32  ;;  %v444_v47 = vmax.bf16 %v350_v22, %v308_v37  ;;  %v524_v50 = vrot.slane %v522_v39, 4  ;;  %v531_v51 = vshll.u32 %v743_v36, 16  ;;  %v901_v7 = vld [vmem:[%s793_s11 + $0x20] sm:$0xf]  ;;  %v744_v14 = vld [vmem:[%s793_s11 + $0x24] sm:$0x1] }
  0x28   : > { %v358_v49 = vor.u32 %v357_v38, %v354_v13  ;;  %v194_v53 = vsel %vm809_vm2, %v189_v44, %v193_v30  ;;  %v363_v54 = vrot.slane %v361_v35, 5  ;;  %v527_v55 = vrot.slane %v525_v45, 5  ;;  %v909_v22 = vld [vmem:[%s793_s11 + $0x20] sm:$0xf]  ;;  %v146_v29 = vld [vmem:[%s793_s11 + $0x24] sm:$0x1] }
  0x29   : > { %622 = vst.msk [vmem:[%s868_s15] sm:$0xf] %vm621_vm3, %v613_v41  ;;  %v196_v56 = vshrl.u32 %v873_v40, 16  ;;  %v461_v58 = vmax.bf16 %v823_v43, %v444_v47  ;;  %v275_v59 = vmax.bf16 %v194_v53, %v136_v33  ;;  %v137_v62 = vmax.bf16 %v880_v46, %v873_v40  ;;  %v735_v30 = vld [vmem:[%s793_s11 + $0x60] sm:$0xf] }
  0x2a   : > { %v359_v61 = vrot.slane %v358_v49, 4  ;;  %v528_v63 = vor.u32 %v527_v55, %v524_v50  ;;  %v199_v1 = vshll.u32 %v873_v40, 16  ;;  %v205_v2 = vshll.u32 %v145_v52, 16  ;;  %v923_v38 = vld [vmem:[%s793_s11 + $0xb0] sm:$0xf] }
  0x2b   : > { %v198_v0 = vrot.slane %v196_v56, 4  ;;  %v478_v4 = vmax.bf16 %v734_v48, %v461_v58  ;;  %v292_v5 = vmax.bf16 %v845_v8, %v275_v59  ;;  %v533_v6 = vrot.slane %v531_v51, 5  ;;  %v712_v40 = vld [vmem:[%s793_s11 + $0xf0] sm:$0xf]  ;;  %v721_v48 = vld [vmem:[%s793_s11 + $0xb4] sm:$0x1] }
  0x2c   : > { %v366_v43 = vshrl.u32 %v890_v57, 16  ;;  %v364_v9 = vsel %vm809_vm2, %v359_v61, %v363_v54  ;;  %v529_v10 = vrot.slane %v528_v63, 4  ;;  %v201_v11 = vrot.slane %v199_v1, 5  ;;  %v931_v49 = vld [vmem:[%s793_s11 + $0x28] sm:$0xf] }
  0x2d   : > { %v369_v12 = vshll.u32 %v890_v57, 16  ;;  %v614_v15 = vmax.bf16 %v520_v42, %v478_v4  ;;  %v309_v16 = vmax.bf16 %v711_v60, %v292_v5  ;;  %v375_v17 = vshll.u32 %v720_v3, 16  ;;  %v697_v51 = vld [vmem:[%s793_s11 + $0x68] sm:$0xf]  ;;  %v745_v63 = vld [vmem:[%s793_s11 + $0x2c] sm:$0x1] }
  0x2e   : > { %v368_v8 = vrot.slane %v366_v43, 4  ;;  %v202_v18 = vor.u32 %v201_v11, %v198_v0  ;;  %v207_v19 = vrot.slane %v205_v2, 5  ;;  %v536_v21 = vshrl.u32 %v901_v7, 16  ;;  %v122_v4 = vld [vmem:[%s793_s11 + $0x28] sm:$0xf] }
  0x2f   : > { %v371_v20 = vrot.slane %v369_v12, 5  ;;  %623 = vst.msk [vmem:[%s868_s15 + $0x4] sm:$0xf] %vm621_vm3, %v614_v15  ;;  %v445_v24 = vmax.bf16 %v364_v9, %v309_v16  ;;  %v534_v25 = vsel %vm809_vm2, %v529_v10, %v533_v6  ;;  %v539_v26 = vshll.u32 %v901_v7, 16  ;;  %v698_v5 = vld [vmem:[%s793_s11 + $0x70] sm:$0xf] }
  0x30   : > { %v545_v28 = vshll.u32 %v744_v14, 16  ;;  %v203_v31 = vrot.slane %v202_v18, 4  ;;  %v377_v34 = vrot.slane %v375_v17, 5  ;;  %v538_v13 = vrot.slane %v536_v21, 4  ;;  %v147_v16 = vld [vmem:[%s793_s11 + $0x2c] sm:$0x1] }
  0x31   : > { %v372_v32 = vor.u32 %v371_v20, %v368_v8  ;;  %v462_v35 = vmax.bf16 %v860_v27, %v445_v24  ;;  %v541_v36 = vrot.slane %v539_v26, 5  ;;  %v210_v33 = vshrl.u32 %v909_v22, 16  ;;  %v952_v8 = vld [vmem:[%s793_s11 + $0xb8] sm:$0xf]  ;;  %v736_v17 = vld [vmem:[%s793_s11 + $0x68] sm:$0xf] }
  0x32   : > { %v919_v37 = vrot.slane %v545_v28, 5  ;;  %v208_v39 = vsel %vm809_vm2, %v203_v31, %v207_v19  ;;  %v213_v42 = vshll.u32 %v909_v22, 16  ;;  %v219_v44 = vshll.u32 %v146_v29, 16 }
  0x33   : > { %v373_v41 = vrot.slane %v372_v32, 4  ;;  %v479_v45 = vmax.bf16 %v735_v30, %v462_v35  ;;  %v276_v46 = vmax.bf16 %v208_v39, %v137_v62  ;;  %v542_v47 = vor.u32 %v541_v36, %v538_v13  ;;  %v722_v32 = vld [vmem:[%s793_s11 + $0xbc] sm:$0x1] }
  0x34   : > { %v212_v27 = vrot.slane %v210_v33, 4  ;;  %v215_v52 = vrot.slane %v213_v42, 5  ;;  %v221_v53 = vrot.slane %v219_v44, 5  ;;  %v380_v54 = vshrl.u32 %v923_v38, 16  ;;  %v746_v42 = vld [vmem:[%s793_s11 + $0x34] sm:$0x1] }
  0x35   : > { %v378_v50 = vsel %vm809_vm2, %v373_v41, %v377_v34  ;;  %v615_v55 = vmax.bf16 %v534_v25, %v479_v45  ;;  %v293_v56 = vmax.bf16 %v890_v57, %v276_v46  ;;  %v543_v58 = vrot.slane %v542_v47, 4  ;;  %v713_v25 = vld [vmem:[%s793_s11 + $0xf8] sm:$0xf] }
  0x36   : > { %v383_v59 = vshll.u32 %v923_v38, 16  ;;  %v216_v60 = vor.u32 %v215_v52, %v212_v27  ;;  %v382_v61 = vrot.slane %v380_v54, 4  ;;  %v389_v62 = vshll.u32 %v721_v48, 16 }
  0x37   : > { %v550_v0 = vshrl.u32 %v931_v49, 16  ;;  %624 = vst.msk [vmem:[%s868_s15 + $0x8] sm:$0xf] %vm621_vm3, %v615_v55  ;;  %v310_v1 = vmax.bf16 %v712_v40, %v293_v56  ;;  %v138_v2 = vmax.bf16 %v697_v51, %v909_v22  ;;  %v553_v57 = vshll.u32 %v931_v49, 16  ;;  %v972_v51 = vld [vmem:[%s793_s11 + $0x30] sm:$0xf] }
  0x38   : > { %v385_v3 = vrot.slane %v383_v59, 5  ;;  %v548_v6 = vsel %vm809_vm2, %v543_v58, %v919_v37  ;;  %v217_v43 = vrot.slane %v216_v60, 4  ;;  %v391_v9 = vrot.slane %v389_v62, 5  ;;  %v148_v55 = vld [vmem:[%s793_s11 + $0x34] sm:$0x1] }
  0x39   : > { %v552_v10 = vrot.slane %v550_v0, 4  ;;  %v446_v11 = vmax.bf16 %v378_v50, %v310_v1  ;;  %v555_v14 = vrot.slane %v553_v57, 5  ;;  %v559_v15 = vshll.u32 %v745_v63, 16  ;;  %v737_v56 = vld [vmem:[%s793_s11 + $0x70] sm:$0xf] }
  0x3a   : > { %v386_v12 = vor.u32 %v385_v3, %v382_v61  ;;  %v222_v18 = vsel %vm809_vm2, %v217_v43, %v221_v53  ;;  %v139_v19 = vmax.bf16 %v698_v5, %v122_v4  ;;  %v224_v20 = vshrl.u32 %v122_v4, 16  ;;  %v981_v62 = vld [vmem:[%s793_s11 + $0xc0] sm:$0xf] }
  0x3b   : > { %v227_v21 = vshll.u32 %v122_v4, 16  ;;  %v463_v22 = vmax.bf16 %v901_v7, %v446_v11  ;;  %v277_v24 = vmax.bf16 %v222_v18, %v138_v2  ;;  %v556_v28 = vor.u32 %v555_v14, %v552_v10  ;;  %v965_v7 = vld [vmem:[%s793_s11 + $0x30] sm:$0xf]  ;;  %v714_v3 = vld [vmem:[%s793_s11 + $0x100] sm:$0xf] }
  0x3c   : > { %v387_v26 = vrot.slane %v386_v12, 4  ;;  %v226_v29 = vrot.slane %v224_v20, 4  ;;  %v233_v31 = vshll.u32 %v147_v16, 16  ;;  %v394_v34 = vshrl.u32 %v952_v8, 16  ;;  %v993_v12 = vld [vmem:[%s793_s11 + $0x38] sm:$0xf] }
  0x3d   : > { %v229_v30 = vrot.slane %v227_v21, 5  ;;  %v480_v13 = vmax.bf16 %v736_v17, %v463_v22  ;;  %v294_v35 = vmax.bf16 %v923_v38, %v277_v24  ;;  %v561_v37 = vrot.slane %v559_v15, 5  ;;  %v699_v17 = vld [vmem:[%s793_s11 + $0x78] sm:$0xf]  ;;  %v747_v22 = vld [vmem:[%s793_s11 + $0x3c] sm:$0x1] }
  0x3e   : > { %v392_v36 = vsel %vm809_vm2, %v387_v26, %v391_v9  ;;  %v235_v39 = vrot.slane %v233_v31, 5  ;;  %v396_v40 = vrot.slane %v394_v34, 4  ;;  %v397_v41 = vshll.u32 %v952_v8, 16  ;;  %v738_v24 = vld [vmem:[%s793_s11 + $0x78] sm:$0xf] }
  0x3f   : > { %v230_v33 = vor.u32 %v229_v30, %v226_v29  ;;  %v616_v44 = vmax.bf16 %v548_v6, %v480_v13  ;;  %v311_v45 = vmax.bf16 %v713_v25, %v294_v35  ;;  %v557_v46 = vrot.slane %v556_v28, 4  ;;  %v124_v13 = vld [vmem:[%s793_s11 + $0x38] sm:$0xf]  ;;  %v149_v35 = vld [vmem:[%s793_s11 + $0x3c] sm:$0x1] }
  0x40   : > { %v403_v38 = vshll.u32 %v722_v32, 16  ;;  %v399_v27 = vrot.slane %v397_v41, 5  ;;  %v564_v48 = vshrl.u32 %v965_v7, 16  ;;  %v567_v50 = vshll.u32 %v965_v7, 16 }
  0x41   : > { %v231_v47 = vrot.slane %v230_v33, 4  ;;  %625 = vst.msk [vmem:[%s868_s15 + $0xc] sm:$0xf] %vm621_vm3, %v616_v44  ;;  %v447_v52 = vmax.bf16 %v392_v36, %v311_v45  ;;  %v573_v54 = vshll.u32 %v746_v42, 16  ;;  %v562_v0 = vsel %vm809_vm2, %v557_v46, %v561_v37  ;;  %v708_v46 = vld [vmem:[%s793_s11 + $0xc8] sm:$0xf] }
  0x42   : > { %v405_v53 = vrot.slane %v403_v38, 5  ;;  %v400_v59 = vor.u32 %v399_v27, %v396_v40  ;;  %v566_v60 = vrot.slane %v564_v48, 4  ;;  %v569_v61 = vrot.slane %v567_v50, 5  ;;  %v700_v40 = vld [vmem:[%s793_s11 + $0x80] sm:$0xf] }
  0x43   : > { %v236_v58 = vsel %vm809_vm2, %v231_v47, %v235_v39  ;;  %v464_v63 = vmax.bf16 %v931_v49, %v447_v52  ;;  %v238_v2 = vshrl.u32 %v972_v51, 16  ;;  %v241_v5 = vshll.u32 %v972_v51, 16  ;;  %v723_v49 = vld [vmem:[%s793_s11 + $0xc4] sm:$0x1]  ;;  %v715_v52 = vld [vmem:[%s793_s11 + $0x108] sm:$0xf] }
  0x44   : > { %v278_v1 = vmax.bf16 %v236_v58, %v139_v19  ;;  %v401_v57 = vrot.slane %v400_v59, 4  ;;  %v570_v4 = vor.u32 %v569_v61, %v566_v60  ;;  %v247_v6 = vshll.u32 %v148_v55, 16  ;;  %v724_v55 = vld [vmem:[%s793_s11 + $0xcc] sm:$0x1]  ;;  %v732_v60 = vld [vmem:[%s793_s11 + $0x40] sm:$0xf] }
  0x45   : > { %v481_v43 = vmax.bf16 %v737_v56, %v464_v63  ;;  %v240_v10 = vrot.slane %v238_v2, 4  ;;  %v408_v11 = vshrl.u32 %v981_v62, 16  ;;  %v575_v16 = vrot.slane %v573_v54, 5  ;;  %v748_v2 = vld [vmem:[%s793_s11 + $0x44] sm:$0x1] }
  0x46   : > { %v295_v9 = vmax.bf16 %v952_v8, %v278_v1  ;;  %v406_v14 = vsel %vm809_vm2, %v401_v57, %v405_v53  ;;  %v571_v15 = vrot.slane %v570_v4, 4  ;;  %v243_v18 = vrot.slane %v241_v5, 5 }
  0x47   : > { %v617_v19 = vmax.bf16 %v562_v0, %v481_v43  ;;  %v410_v21 = vrot.slane %v408_v11, 4  ;;  %v411_v8 = vshll.u32 %v981_v62, 16  ;;  %v249_v26 = vrot.slane %v247_v6, 5 }
  0x48   : > { %v312_v20 = vmax.bf16 %v714_v3, %v295_v9  ;;  %v244_v25 = vor.u32 %v243_v18, %v240_v10  ;;  %v417_v28 = vshll.u32 %v723_v49, 16  ;;  %v578_v29 = vshrl.u32 %v993_v12, 16  ;;  %v739_v18 = vld [vmem:[%s793_s11 + $0x80] sm:$0xf] }
  0x49   : > { %626 = vst.msk [vmem:[%s868_s15 + $0x10] sm:$0xf] %vm621_vm3, %v617_v19  ;;  %v140_v31 = vmax.bf16 %v699_v17, %v972_v51  ;;  %v413_v32 = vrot.slane %v411_v8, 5  ;;  %v581_v34 = vshll.u32 %v993_v12, 16  ;;  %v576_v36 = vsel %vm809_vm2, %v571_v15, %v575_v16 }
  0x4a   : > { %v448_v30 = vmax.bf16 %v406_v14, %v312_v20  ;;  %v245_v37 = vrot.slane %v244_v25, 4  ;;  %v580_v33 = vrot.slane %v578_v29, 4  ;;  %v587_v39 = vshll.u32 %v747_v22, 16 }
  0x4b   : > { %v414_v42 = vor.u32 %v413_v32, %v410_v21  ;;  %v419_v44 = vrot.slane %v417_v28, 5  ;;  %v583_v45 = vrot.slane %v581_v34, 5  ;;  %v252_v47 = vshrl.u32 %v124_v13, 16  ;;  %v716_v28 = vld [vmem:[%s793_s11 + $0x110] sm:$0xf] }
  0x4c   : > { %v465_v41 = vmax.bf16 %v965_v7, %v448_v30  ;;  %v250_v38 = vsel %vm809_vm2, %v245_v37, %v249_v26  ;;  %v255_v27 = vshll.u32 %v124_v13, 16  ;;  %v261_v48 = vshll.u32 %v149_v35, 16  ;;  %v740_v37 = vld [vmem:[%s793_s11 + $0x88] sm:$0xf] }
  0x4d   : > { %v279_v51 = vmax.bf16 %v250_v38, %v140_v31  ;;  %v415_v53 = vrot.slane %v414_v42, 4  ;;  %v141_v54 = vmax.bf16 %v700_v40, %v124_v13  ;;  %v584_v7 = vor.u32 %v583_v45, %v580_v33 }
  0x4e   : > { %v482_v50 = vmax.bf16 %v738_v24, %v465_v41  ;;  %v254_v56 = vrot.slane %v252_v47, 4  ;;  %v257_v58 = vrot.slane %v255_v27, 5  ;;  %v422_v59 = vshrl.u32 %v708_v46, 16 }
  0x4f   : > { %v296_v63 = vmax.bf16 %v981_v62, %v279_v51  ;;  %v420_v0 = vsel %vm809_vm2, %v415_v53, %v419_v44  ;;  %v263_v1 = vrot.slane %v261_v48, 5  ;;  %v425_v4 = vshll.u32 %v708_v46, 16 }
  0x50   : > { %v618_v61 = vmax.bf16 %v576_v36, %v482_v50  ;;  %v258_v3 = vor.u32 %v257_v58, %v254_v56  ;;  %v424_v57 = vrot.slane %v422_v59, 4  ;;  %v431_v5 = vshll.u32 %v724_v55, 16 }
  0x51   : > { %v313_v6 = vmax.bf16 %v715_v52, %v296_v63  ;;  %v589_v43 = vrot.slane %v587_v39, 5  ;;  %v592_v9 = vshrl.u32 %v732_v60, 16  ;;  %v595_v10 = vshll.u32 %v732_v60, 16 }
  0x52   : > { %627 = vst.msk [vmem:[%s868_s15 + $0x14] sm:$0xf] %vm621_vm3, %v618_v61  ;;  %v585_v49 = vrot.slane %v584_v7, 4  ;;  %v259_v11 = vrot.slane %v258_v3, 4  ;;  %v427_v62 = vrot.slane %v425_v4, 5  ;;  %v601_v14 = vshll.u32 %v748_v2, 16 }
  0x53   : > { %v449_v15 = vmax.bf16 %v420_v0, %v313_v6  ;;  %v594_v16 = vrot.slane %v592_v9, 4  ;;  %v597_v17 = vrot.slane %v595_v10, 5  ;;  %v433_v21 = vrot.slane %v431_v5, 5 }
  0x54   : > { %v264_v19 = vsel %vm809_vm2, %v259_v11, %v263_v1  ;;  %v428_v20 = vor.u32 %v427_v62, %v424_v57  ;;  %v603_v25 = vrot.slane %v601_v14, 5  ;;  %v590_v26 = vsel %vm809_vm2, %v585_v49, %v589_v43 }
  0x55   : > { %v466_v8 = vmax.bf16 %v993_v12, %v449_v15  ;;  %v280_v22 = vmax.bf16 %v264_v19, %v141_v54  ;;  %v598_v24 = vor.u32 %v597_v17, %v594_v16 }
  0x56   : > { %v429_v29 = vrot.slane %v428_v20, 4 }
  0x57   : > { %v483_v30 = vmax.bf16 %v739_v18, %v466_v8  ;;  %v297_v31 = vmax.bf16 %v708_v46, %v280_v22  ;;  %v599_v32 = vrot.slane %v598_v24, 4 }
  0x58   : > { %v434_v34 = vsel %vm809_vm2, %v429_v29, %v433_v21 }
  0x59   : > { %v619_v13 = vmax.bf16 %v590_v26, %v483_v30  ;;  %v314_v35 = vmax.bf16 %v716_v28, %v297_v31  ;;  %v604_v12 = vsel %vm809_vm2, %v599_v32, %v603_v25 }
  0x5b   : > { %628 = vst.msk [vmem:[%s868_s15 + $0x18] sm:$0xf] %vm621_vm3, %v619_v13  ;;  %v450_v36 = vmax.bf16 %v434_v34, %v314_v35 }
  0x5d   : > { %v467_v33 = vmax.bf16 %v732_v60, %v450_v36 }
  0x5f   : > { %v484_v39 = vmax.bf16 %v740_v37, %v467_v33 }
  0x61   : > { %v620_v40 = vmax.bf16 %v604_v12, %v484_v39 }
  0x63   : > { %629 = vst.msk [vmem:[%s868_s15 + $0x1c] sm:$0xf] %vm621_vm3, %v620_v40 }
  0x64 PF: > { %s11_s6 = sadd.s32 1, %s767_s6  }
  0x65   : > { %p8_p4 = scmp.ge.s32.totalorder %s11_s6, 4  }
  0x67   :  { %10 = sbr.rel (!%p8_p4) target bundleno = 1 (0x1), region = 59 }

// kernel: resnet_forward.10
= control target key start
LH: loop header
LB: loop body
LE: loop exit
PB: predicated region body
PF: predicated region fallthrough
CT: control target
= control target key end

     0   :  { %s2582_s12 = smov 0   ;;  %s2584_s13 = smov 0   ;;  %s3144_s0 = inlined_call_operand.vmem [shape: bf16[2,110,64], index: 0, kind: input, shape index: {}]   ;;  %s3145_s1 = inlined_call_operand.vmem [shape: bf16[9,64,64], index: 1, kind: input, shape index: {}]   ;;  %s3146_s2 = inlined_call_operand.vmem [shape: f32[1,64], index: 2, kind: input, shape index: {}]   ;;  %s3147_s3 = inlined_call_operand.vmem [shape: bf16[2,80,64], index: 3, kind: output, shape index: {}]  }
   0x1   :  { %s2586_s14 = smov 0  }
   0x2 LB: > { %s25_s15 = sadd.s32 1, %s2554_s13  ;;  %p1914_p0 = scmp.ge.s32.totalorder %s2558_s14, 1  ;;  %s2558_s14 = sphi %s2586_s14, %s13_s14   ;;  %s2554_s13 = sphi %s2584_s13, %s3149_s13   ;;  %s2550_s12 = sphi %s2582_s12, %s3148_s12  }
   0x3   : > { %p27_p1 = scmp.ge.s32.totalorder %s25_s15, 2  ;;  %p168_p2 = scmp.lt.s32.totalorder %s2558_s14, 3 }
   0x5   : > { %s3151_s15 = smov (%p27_p1, %s25_s15), 0  ;;  %p169_p3 = pnand %p1914_p0, %p168_p2 }
   0x6   : > { %v2477_v0 = vld [vmem:[%s3145_s1 + $0x20] sm:$0xff] (!%p169_p3)   ;;  %v2560_v1 = vmov (!%p169_p3), 0.0   ;;  %v2478_v2 = vld [vmem:[%s3145_s1 + $0x28] sm:$0xff] (!%p169_p3)   ;;  %p202_p4 = scmp.lt.s32.totalorder (!%p169_p3), %s2550_s12, 1  ;;  %vm2561_vm0 = vmmov (!%p169_p3), 0   ;;  %v2479_v3 = vld [vmem:[%s3145_s1 + $0x30] sm:$0xff] (!%p169_p3)  }
   0x7   : > { %172 = sbr.rel (%p169_p3) target bundleno = 427 (0x1ab), region = 32  ;;  %2441 = vmatprep.subr.bf16.mxu1 (!%p169_p3), %v2560_v1  ;;  %2189 = vmatprep.subr.bf16.mxu0 (!%p169_p3), %v2560_v1  ;;  %v2480_v4 = vld [vmem:[%s3145_s1 + $0x38] sm:$0xff] (!%p169_p3)   ;;  %vm279_vm1 = vsmask.f32 (!%p169_p3), 7424  ;;  %vm348_vm2 = vcmask (!%p169_p3), 523264   ;;  %v2483_v21 = vld [vmem:[%s3145_s1] sm:$0xff] (!%p169_p3)  }
   0x8   : > { %2445 = vmatpush3.bf16.msra.mxu1 (!%p169_p3), %v2477_v0  ;;  %2190 = vmatpush3.bf16.msra.mxu0 (!%p169_p3), %v2477_v0  ;;  %v2488_v28 = vld [vmem:[%s3145_s1 + $0x40] sm:$0xff] (!%p169_p3)   ;;  %v2484_v31 = vld [vmem:[%s3145_s1 + $0x8] sm:$0xff] (!%p169_p3)   ;;  %v2489_v35 = vld [vmem:[%s3145_s1 + $0x10] sm:$0xff] (!%p169_p3)   ;;  %vm557_vm3 = vcmask (!%p169_p3), 1046528   ;;  %vm885_vm4 = vsmask.f32 (!%p169_p3), 6400 }
   0x9   : > { %2442 = vmatprep.subr.bf16.mxu1 (!%p169_p3), %v2560_v1  ;;  %2191 = vmatprep.subr.bf16.mxu0 (!%p169_p3), %v2560_v1  ;;  %v2490_v36 = vld [vmem:[%s3145_s1 + $0x48] sm:$0xff] (!%p169_p3)   ;;  %v2492_v43 = vld [vmem:[%s3145_s1 + $0x50] sm:$0xff] (!%p169_p3)   ;;  %v2493_v47 = vld [vmem:[%s3145_s1 + $0x18] sm:$0xff] (!%p169_p3)   ;;  %vm1074_vm5 = vcmask (!%p169_p3), 1045504   ;;  %vm1591_vm6 = vcmask (!%p169_p3), 1044480   ;;  %vm1792_vm8 = vcmask (!%p169_p3), 519168  }
   0xa   : > { %2205 = vmatprep.mubr.msk.bf16.mxu1 (!%p169_p3), %vm2561_vm0, %v2560_v1  ;;  %2197 = vmatprep.mubr.msk.bf16.mxu0 (!%p169_p3), %vm2561_vm0, %v2560_v1  ;;  %v2494_v48 = vld [vmem:[%s3145_s1 + $0x58] sm:$0xff] (!%p169_p3)   ;;  %v2497_v53 = vld [vmem:[%s3145_s1 + $0x80] sm:$0xff] (!%p169_p3)   ;;  %v2499_v55 = vld [vmem:[%s3145_s1 + $0x88] sm:$0xff] (!%p169_p3)   ;;  %vm1402_vm7 = vsmask.f32 (!%p169_p3), 5376 }
   0xb   : > { %v2496_v56 = vld [vmem:[%s3145_s1 + $0x60] sm:$0xff] (!%p169_p3)   ;;  %v2501_v60 = vld [vmem:[%s3145_s1 + $0x90] sm:$0xff] (!%p169_p3)   ;;  %v2498_v0 = vld [vmem:[%s3145_s1 + $0x68] sm:$0xff] (!%p169_p3)  }
   0xc   : > { %2446 = vmatpush3.bf16.msra.mxu1 (!%p169_p3), %v2478_v2  ;;  %2192 = vmatpush3.bf16.msra.mxu0 (!%p169_p3), %v2478_v2 }
   0xd   : > { %2443 = vmatprep.subr.bf16.mxu1 (!%p169_p3), %v2560_v1  ;;  %2193 = vmatprep.subr.bf16.mxu0 (!%p169_p3), %v2560_v1 }
   0xe   : > { %s3153_s12 = smov (!%p202_p4, %s2550_s12), 1 }
   0xf   : > { %s2449_s22 = smul.u32 56, %s3153_s12 }
  0x10   : > { %2447 = vmatpush3.bf16.msra.mxu1 %v2479_v3  ;;  %2194 = vmatpush3.bf16.msra.mxu0 %v2479_v3  ;;  %s2450_s26 = smul.u32 40, %s3153_s12 }
  0x11   : > { %s2628_s27 = scalar_lea.vmem %s3144_s0, %s2449_s22  ;;  %2444 = vmatprep.subr.bf16.mxu1 %v2560_v1  ;;  %2195 = vmatprep.subr.bf16.mxu0 %v2560_v1 }
  0x12   : > { %v2631_v5 = vld [vmem:[%s2628_s27 + $0x10] sm:$0xff]   ;;  %v2634_v6 = vld [vmem:[%s2628_s27 + $0x18] sm:$0xff]   ;;  %v223_v7 = vld [vmem:[%s2628_s27] sm:$0xf]  ;;  %s3097_s30 = scalar_lea.vmem %s3147_s3, %s2450_s26 }
  0x13   : > { %v2640_v8 = vld [vmem:[%s2628_s27 + $0x4] sm:$0xf]  ;;  %v296_v9 = vshll.u32 %v2631_v5, 16  ;;  %v300_v10 = vshrl.u32 %v2631_v5, 16  ;;  %v304_v11 = vshll.u32 %v2634_v6, 16  ;;  %v2649_v13 = vld [vmem:[%s2628_s27 + $0x8] sm:$0xff]  }
  0x14   : > { %v2646_v12 = vcombine.low %v223_v7, %v2640_v8  ;;  %v2652_v14 = vld [vmem:[%s2628_s27 + $0x20] sm:$0xff]   ;;  %2448 = vmatpush3.bf16.msra.mxu1 %v2480_v4  ;;  %2196 = vmatpush3.bf16.msra.mxu0 %v2480_v4  ;;  %v288_v19 = vshll.u32 %v2649_v13, 16  ;;  %v308_v23 = vshrl.u32 %v2634_v6, 16  ;;  %v292_v29 = vshrl.u32 %v2649_v13, 16  ;;  %v2503_v7 = vld [vmem:[%s3145_s1 + $0x98] sm:$0xff]  }
  0x15   : > { %v298_v15 = vrot.slane %v296_v9, 1  ;;  %v306_v16 = vrot.slane %v304_v11, 1  ;;  %2217 = vmatprep.subr.bf16.mxu1 %v2560_v1  ;;  %2245 = vmatprep.subr.bf16.mxu0 %v2560_v1  ;;  %v312_v24 = vshll.u32 %v2652_v14, 16  ;;  %v2671_v30 = vld [vmem:[%s2628_s27 + $0x28] ss:$0 sps:$4 sm:$0x11]  }
  0x16   : > { %v281_v17 = vshrl.u32 %v2646_v12, 16  ;;  %v283_v18 = vshll.u32 %v2646_v12, 16  ;;  %v290_v25 = vrot.slane %v288_v19, 1  ;;  %v544_v38 = vld [vmem:[%s2628_s27] sm:$0xe]  ;;  %v316_v40 = vshrl.u32 %v2652_v14, 16 }
  0x17   : > { %v302_v20 = vor.u32 %v300_v10, %v298_v15  ;;  %v310_v33 = vor.u32 %v308_v23, %v306_v16  ;;  %v314_v34 = vrot.slane %v312_v24, 1  ;;  %v320_v41 = vshll.u32 %v2671_v30, 16  ;;  %v2738_v57 = vld [vmem:[%s2628_s27 + $0x1c] sm:$0xff]   ;;  %v2741_v58 = vld [vmem:[%s2628_s27 + $0x24] sm:$0xff]   ;;  %v2500_v9 = vld [vmem:[%s3145_s1 + $0x70] sm:$0xff]  }
  0x18   : > { %v285_v22 = vrot.slane %v283_v18, 1  ;;  %v294_v37 = vor.u32 %v292_v29, %v290_v25  ;;  %v1957_v44 = vcombine.low %v544_v38, %v2640_v8  ;;  %v559_v50 = vrot.slane %v2649_v13, 1  ;;  %v2516_v63 = vld [vmem:[%s2628_s27 + $0x2c] ss:$0 sps:$4 sm:$0x11]  }
  0x19   : > { %v307_v26 = vsel %vm279_vm1, %v302_v20, %v306_v16  ;;  %v315_v39 = vsel %vm279_vm1, %v310_v33, %v314_v34  ;;  %v318_v45 = vor.u32 %v316_v40, %v314_v34  ;;  %v322_v46 = vrot.slane %v320_v41, 1  ;;  %v2801_v18 = vld [vmem:[%s2628_s27 + $0xc] sm:$0xff]  }
  0x1a   : > { %v286_v27 = vor.u32 %v285_v22, %v281_v17  ;;  %2206 = vmatmul.mubr.msk.bf16.vlgmr.msra.gmra.mrb[0].mxu1 %vm348_vm2, %v307_v26  ;;  %v299_v42 = vsel %vm279_vm1, %v294_v37, %v298_v15  ;;  %v558_v49 = vrot.slane %v1957_v44, 1  ;;  %v561_v54 = vrot.slane %v2631_v5, 1  ;;  %v2795_v15 = vld [vmem:[%s2628_s27 + $0x8] sm:$0xf] }
  0x1b   : > { %2218 = vmatpush3.bf16.msra.mxu1 %v2483_v21  ;;  %2209 = vmatprep.mubr.msk.bf16.mxu1 %vm2561_vm0, %v2560_v1  ;;  %v323_v51 = vsel %vm279_vm1, %v318_v45, %v322_v46  ;;  %v744_v61 = vrot.slane %v2738_v57, 1  ;;  %v746_v62 = vrot.slane %v2741_v58, 1  ;;  %v748_v3 = vrot.slane %v2516_v63, 1  ;;  %v2513_v46 = vld [vmem:[%s3145_s1 + $0xd0] sm:$0xff]  }
  0x1c   : > { %v291_v32 = vsel %vm279_vm1, %v286_v27, %v290_v25  ;;  %2219 = vmatprep.subr.bf16.mxu1 %v2560_v1  ;;  %v560_v52 = vsel %vm557_vm3, %v558_v49, %v559_v50  ;;  %v562_v59 = vsel %vm557_vm3, %v559_v50, %v561_v54  ;;  %v563_v4 = vrot.slane %v2634_v6, 1 }
  0x1d   : > { %2198 = vmatmul.mubr.msk.bf16.vlgmr.msra.gmra.mrb[0].mxu0 %vm348_vm2, %v291_v32  ;;  %v2761_v2 = vsel %vm557_vm3, %v744_v61, %v746_v62  ;;  %v2773_v8 = vsel %vm557_vm3, %v746_v62, %v748_v3  ;;  %v565_v11 = vrot.slane %v2652_v14, 1  ;;  %v567_v19 = vrot.slane %v2671_v30, 1  ;;  %v2515_v62 = vld [vmem:[%s3145_s1 + $0xb8] sm:$0xff]  }
  0x1e   : > { %2246 = vmatpush3.bf16.msra.mxu0 %v2488_v28  ;;  %2201 = vmatprep.mubr.msk.bf16.mxu0 %vm2561_vm0, %v2560_v1  ;;  %v564_v10 = vsel %vm557_vm3, %v561_v54, %v563_v4  ;;  %v895_v22 = vshrl.u32 %v2801_v18, 16  ;;  %v898_v23 = vshll.u32 %v2801_v18, 16  ;;  %v2815_v28 = vld [vmem:[%s2628_s27 + $0x14] sm:$0xff]   ;;  %v740_v37 = vrot.slane %v2801_v18, 1 }
  0x1f   : > { %2247 = vmatprep.subr.bf16.mxu0 %v2560_v1  ;;  %2220 = vmatpush3.bf16.msra.mxu1 %v2484_v31  ;;  %v566_v16 = vsel %vm557_vm3, %v563_v4, %v565_v11  ;;  %v568_v24 = vsel %vm557_vm3, %v565_v11, %v567_v19  ;;  %v904_v31 = vshrl.u32 %v2815_v28, 16  ;;  %v907_v32 = vshll.u32 %v2815_v28, 16  ;;  %v2512_v54 = vld [vmem:[%s3145_s1 + $0xb0] sm:$0xff]   ;;  %v1061_v19 = vld [vmem:[%s2628_s27 + $0x4] sm:$0xc] }
  0x20   : > { %2221 = vmatprep.subr.bf16.mxu1 %v2560_v1  ;;  %v897_v26 = vrot.slane %v895_v22, 1  ;;  %v900_v27 = vrot.slane %v898_v23, 2  ;;  %v913_v40 = vshrl.u32 %v2738_v57, 16  ;;  %v922_v50 = vshrl.u32 %v2741_v58, 16 }
  0x21   : > { %v906_v34 = vrot.slane %v904_v31, 1  ;;  %v2016_v22 = vcombine.low %v1061_v19, %v2795_v15  ;;  %v1078_v31 = vrot.slane %v2815_v28, 2 }
  0x22   : > { %2248 = vmatpush3.bf16.msra.mxu0 %v2490_v36  ;;  %2210 = vmatmul.mubr.msk.bf16.gmra.mrb[4].mxu1 %vm348_vm2, %v315_v39  ;;  %v901_v30 = vor.u32 %v900_v27, %v897_v26  ;;  %v2510_v39 = vld [vmem:[%s3145_s1 + $0xc8] sm:$0xff]   ;;  %v915_v44 = vrot.slane %v913_v40, 1 }
  0x23   : > { %2249 = vmatprep.subr.bf16.mxu0 %v2560_v1  ;;  %2222 = vmatpush3.bf16.msra.mxu1 %v2489_v35  ;;  %v909_v35 = vrot.slane %v907_v32, 2  ;;  %v2526_v26 = vld [vmem:[%s3145_s1 + $0x108] sm:$0xff]  }
  0x24   : > { %2213 = vmatprep.mubr.msk.bf16.mxu1 %vm2561_vm0, %v2560_v1  ;;  %2223 = vmatprep.subr.bf16.mxu1 %v2560_v1  ;;  %v2525_v32 = vld [vmem:[%s3145_s1 + $0xe8] sm:$0xff]  }
  0x25   : > { %2202 = vmatmul.mubr.msk.bf16.gmra.mrb[4].mxu0 %vm348_vm2, %v299_v42  ;;  %v910_v38 = vor.u32 %v909_v35, %v906_v34  ;;  %v2506_v42 = vld [vmem:[%s3145_s1 + $0xa0] sm:$0xff]   ;;  %v2528_v34 = vld [vmem:[%s3145_s1 + $0xf0] sm:$0xff]  }
  0x26   : > { %2250 = vmatpush3.bf16.msra.mxu0 %v2492_v43  ;;  %2253 = vmatprep.mubr.msk.bf16.mxu0 %vm2561_vm0, %v2560_v1 }
  0x27   : > { %2251 = vmatprep.subr.bf16.mxu0 %v2560_v1  ;;  %2224 = vmatpush3.bf16.msra.mxu1 %v2493_v47  ;;  %v911_v43 = vsel %vm885_vm4, %v901_v30, %v910_v38  ;;  %v742_v47 = vrot.slane %v2815_v28, 1 }
  0x28   : > { %2273 = vmatprep.subr.bf16.mxu1 %v2560_v1 }
  0x29   : > { %v745_v4 = vsel %vm557_vm3, %v742_v47, %v744_v61  ;;  %v1208_v61 = vld [vmem:[%s2628_s27 + $0x8] sm:$0xc] }
  0x2a   : > { %2252 = vmatpush3.bf16.msra.mxu0 %v2494_v48  ;;  %2214 = vmatmul.mubr.msk.bf16.gmra.mrb[8].mxu1 %vm348_vm2, %v323_v51  ;;  %v2509_v48 = vld [vmem:[%s3145_s1 + $0xa8] sm:$0xff]   ;;  %v925_v51 = vshll.u32 %v2741_v58, 16 }
  0x2b   : > { %2301 = vmatprep.subr.bf16.mxu0 %v2560_v1  ;;  %2225 = vmatprep.mubr.msk.bf16.mxu1 %vm2561_vm0, %v2560_v1 }
  0x2d   : > { %2254 = vmatmul.mubr.msk.bf16.vlgmr.msra.gmra.mrb[8].mxu0 %vm348_vm2, %v560_v52  ;;  %v2518_v52 = vld [vmem:[%s3145_s1 + $0xd8] sm:$0xff]  }
  0x2e   : > { %2302 = vmatpush3.bf16.msra.mxu0 %v2497_v53  ;;  %2257 = vmatprep.mubr.msk.bf16.mxu0 %vm2561_vm0, %v2560_v1  ;;  %v743_v53 = vsel %vm557_vm3, %v740_v37, %v742_v47 }
  0x2f   : > { %2303 = vmatprep.subr.bf16.mxu0 %v2560_v1 }
  0x32   : > { %2304 = vmatpush3.bf16.msra.mxu0 %v2499_v55  ;;  %2226 = vmatmul.mubr.msk.bf16.vlgmr.msra.gmra.mrb[12].mxu1 %vm348_vm2, %v2646_v12  ;;  %v2502_v12 = vld [vmem:[%s3145_s1 + $0x78] sm:$0xff]  }
  0x33   : > { %2305 = vmatprep.subr.bf16.mxu0 %v2560_v1  ;;  %2274 = vmatpush3.bf16.msra.mxu1 %v2496_v56  ;;  %v924_v56 = vrot.slane %v922_v50, 1 }
  0x34   : > { %2229 = vmatprep.mubr.msk.bf16.mxu1 %vm2561_vm0, %v2560_v1  ;;  %2275 = vmatprep.subr.bf16.mxu1 %v2560_v1 }
  0x35   : > { %2258 = vmatmul.mubr.msk.bf16.gmra.mrb[12].mxu0 %vm348_vm2, %v562_v59  ;;  %v927_v59 = vrot.slane %v925_v51, 2 }
  0x36   : > { %2261 = vmatprep.mubr.msk.bf16.mxu0 %vm2561_vm0, %v2560_v1  ;;  %2306 = vmatpush3.bf16.msra.mxu0 %v2501_v60  ;;  %v2877_v60 = vld [vmem:[%s2628_s27 + $0x2c] ss:$0 sps:$4 sm:$0x33]  }
  0x37   : > { %2307 = vmatprep.subr.bf16.mxu0 %v2560_v1  ;;  %2276 = vmatpush3.bf16.msra.mxu1 %v2498_v0  ;;  %v928_v63 = vor.u32 %v927_v59, %v924_v56  ;;  %v931_v0 = vshrl.u32 %v2877_v60, 16  ;;  %v934_v3 = vshll.u32 %v2877_v60, 16  ;;  %v1084_v47 = vrot.slane %v2877_v60, 2 }
  0x38   : > { %2277 = vmatprep.subr.bf16.mxu1 %v2560_v1 }
  0x3a   : > { %2308 = vmatpush3.bf16.msra.mxu0 %v2503_v7  ;;  %2230 = vmatmul.mubr.msk.bf16.gmra.mrb[16].mxu1 %vm348_vm2, %v2649_v13  ;;  %v691_v13 = vld [vmem:[%s2628_s27 + $0x4] sm:$0xe] }
  0x3b   : > { %2357 = vmatprep.subr.bf16.mxu0 %v2560_v1  ;;  %2233 = vmatprep.mubr.msk.bf16.mxu1 %vm2561_vm0, %v2560_v1  ;;  %v1975_v17 = vcombine.low %v691_v13, %v2795_v15 }
  0x3c   : > { %2278 = vmatpush3.bf16.msra.mxu1 %v2500_v9  ;;  %v933_v9 = vrot.slane %v931_v0, 1 }
  0x3d   : > { %2262 = vmatmul.mubr.msk.bf16.gmra.mrb[16].mxu0 %vm348_vm2, %v564_v10  ;;  %2279 = vmatprep.subr.bf16.mxu1 %v2560_v1  ;;  %v887_v20 = vshrl.u32 %v1975_v17, 16  ;;  %v890_v21 = vshll.u32 %v1975_v17, 16  ;;  %v739_v36 = vrot.slane %v1975_v17, 1  ;;  %v936_v10 = vrot.slane %v934_v3, 2  ;;  %v2912_v17 = vld [vmem:[%s2628_s27 + $0x10] sm:$0xff]  }
  0x3e   : > { %2265 = vmatprep.mubr.msk.bf16.mxu0 %vm2561_vm0, %v2560_v1  ;;  %v1415_v50 = vshll.u32 %v2912_v17, 16 }
  0x3f   : > { %v889_v25 = vrot.slane %v887_v20, 1  ;;  %v741_v41 = vsel %vm557_vm3, %v739_v36, %v740_v37  ;;  %v937_v11 = vor.u32 %v936_v10, %v933_v9  ;;  %v2980_v36 = vld [vmem:[%s2628_s27 + $0x28] sm:$0xff]   ;;  %v1080_v37 = vrot.slane %v2738_v57, 2 }
  0x40   : > { %2280 = vmatpush3.bf16.msra.mxu1 %v2502_v12  ;;  %v2905_v12 = vld [vmem:[%s2628_s27 + $0xc] sm:$0xf]  ;;  %v1417_v59 = vrot.slane %v1415_v50, 3 }
  0x41   : > { %2329 = vmatprep.subr.bf16.mxu1 %v2560_v1  ;;  %v938_v13 = vsel %vm885_vm4, %v928_v63, %v937_v11  ;;  %v1081_v40 = vsel %vm1074_vm5, %v1078_v31, %v1080_v37 }
  0x42   : > { %2234 = vmatmul.mubr.msk.bf16.gmra.mrb[20].mxu1 %vm348_vm2, %v2631_v5  ;;  %v892_v5 = vrot.slane %v890_v21, 2  ;;  %v1257_v21 = vrot.slane %v2912_v17, 2 }
  0x43   : > { %2237 = vmatprep.mubr.msk.bf16.mxu1 %vm2561_vm0, %v2560_v1 }
  0x44   : > { %v893_v29 = vor.u32 %v892_v5, %v889_v25  ;;  %v1075_v25 = vrot.slane %v2016_v22, 2  ;;  %v1076_v5 = vrot.slane %v2801_v18, 2  ;;  %v2522_v18 = vld [vmem:[%s3145_s1 + $0xe0] sm:$0xff]  }
  0x45   : > { %2266 = vmatmul.mubr.msk.bf16.gmra.mrb[20].mxu0 %vm348_vm2, %v566_v16  ;;  %v2909_v16 = vcombine.low %v1208_v61, %v2905_v12 }
  0x46   : > { %2269 = vmatprep.mubr.msk.bf16.mxu0 %vm2561_vm0, %v2560_v1  ;;  %v902_v33 = vsel %vm885_vm4, %v893_v29, %v901_v30  ;;  %v2951_v29 = vld [vmem:[%s2628_s27 + $0x20] sm:$0xff]   ;;  %v2529_v30 = vld [vmem:[%s3145_s1 + $0x110] sm:$0xff]   ;;  %v1079_v28 = vsel %vm1074_vm5, %v1076_v5, %v1078_v31 }
  0x47   : > { %v1256_v20 = vrot.slane %v2909_v16, 2 }
  0x49   : > { %v1258_v23 = vsel %vm1074_vm5, %v1256_v20, %v1257_v21 }
  0x4a   : > { %2238 = vmatmul.mubr.msk.bf16.gmra.mrb[24].mxu1 %vm348_vm2, %v2634_v6  ;;  %v2507_v6 = vld [vmem:[%s3145_s1 + $0xc0] sm:$0xff]  }
  0x4b   : > { %2241 = vmatprep.mubr.msk.bf16.mxu1 %vm2561_vm0, %v2560_v1 }
  0x4d   : > { %2270 = vmatmul.mubr.msk.bf16.gmra.mrb[24].mxu0 %vm348_vm2, %v568_v24  ;;  %v2930_v24 = vld [vmem:[%s2628_s27 + $0x18] sm:$0xff]  }
  0x4e   : > { %2309 = vmatprep.mubr.msk.bf16.mxu0 %vm2561_vm0, %v2560_v1  ;;  %v1259_v15 = vrot.slane %v2930_v24, 2  ;;  %v1421_v0 = vshrl.u32 %v2930_v24, 16  ;;  %v1424_v3 = vshll.u32 %v2930_v24, 16 }
  0x50   : > { %v1260_v27 = vsel %vm1074_vm5, %v1257_v21, %v1259_v15  ;;  %v1423_v9 = vrot.slane %v1421_v0, 2  ;;  %v1426_v10 = vrot.slane %v1424_v3, 3 }
  0x52   : > { %2242 = vmatmul.mubr.msk.bf16.gmra.mrb[28].mxu1 %vm348_vm2, %v2652_v14  ;;  %v916_v14 = vshll.u32 %v2738_v57, 16  ;;  %v1427_v61 = vor.u32 %v1426_v10, %v1423_v9 }
  0x53   : > { %2281 = vmatprep.mubr.msk.bf16.mxu1 %vm2561_vm0, %v2560_v1 }
  0x54   : > { %v918_v45 = vrot.slane %v916_v14, 2  ;;  %v2532_v14 = vld [vmem:[%s2628_s27 + $0x30] ss:$0 sps:$4 sm:$0x33]  }
  0x55   : > { %2310 = vmatmul.mubr.msk.bf16.vlgmr.msra.gmra.mrb[28].mxu0 %vm348_vm2, %v902_v33  ;;  %v1261_v33 = vrot.slane %v2951_v29, 2 }
  0x56   : > { %2358 = vmatpush3.bf16.msra.mxu0 %v2507_v6  ;;  %2313 = vmatprep.mubr.msk.bf16.mxu0 %vm2561_vm0, %v2560_v1  ;;  %v919_v49 = vor.u32 %v918_v45, %v915_v44  ;;  %v2533_v6 = vld [vmem:[%s3145_s1 + $0x118] sm:$0xff]  }
  0x57   : > { %2359 = vmatprep.subr.bf16.mxu0 %v2560_v1  ;;  %v1262_v35 = vsel %vm1074_vm5, %v1259_v15, %v1261_v33 }
  0x58   : > { %v920_v55 = vsel %vm885_vm4, %v910_v38, %v919_v49  ;;  %v929_v7 = vsel %vm885_vm4, %v919_v49, %v928_v63  ;;  %v2531_v38 = vld [vmem:[%s3145_s1 + $0xf8] sm:$0xff]   ;;  %v1412_v49 = vshrl.u32 %v2912_v17, 16 }
  0x5a   : > { %2360 = vmatpush3.bf16.msra.mxu0 %v2510_v39  ;;  %2282 = vmatmul.mubr.msk.bf16.vlgmr.msra.gmra.mrb[32].mxu1 %vm348_vm2, %v741_v41  ;;  %v1263_v39 = vrot.slane %v2980_v36, 2  ;;  %v1082_v41 = vrot.slane %v2741_v58, 2  ;;  %v1404_v58 = vshrl.u32 %v2909_v16, 16  ;;  %v1414_v56 = vrot.slane %v1412_v49, 2 }
  0x5b   : > { %2361 = vmatprep.subr.bf16.mxu0 %v2560_v1  ;;  %2330 = vmatpush3.bf16.msra.mxu1 %v2506_v42  ;;  %v1265_v42 = vrot.slane %v2532_v14, 2 }
  0x5c   : > { %2285 = vmatprep.mubr.msk.bf16.mxu1 %vm2561_vm0, %v2560_v1  ;;  %2331 = vmatprep.subr.bf16.mxu1 %v2560_v1  ;;  %v1264_v57 = vsel %vm1074_vm5, %v1261_v33, %v1263_v39  ;;  %v1083_v44 = vsel %vm1074_vm5, %v1080_v37, %v1082_v41  ;;  %v1418_v63 = vor.u32 %v1417_v59, %v1414_v56 }
  0x5d   : > { %2314 = vmatmul.mubr.msk.bf16.gmra.mrb[32].mxu0 %vm348_vm2, %v911_v43  ;;  %v1578_v43 = vld [vmem:[%s2628_s27 + $0x8] sm:$0x8]  ;;  %v1266_v45 = vsel %vm1074_vm5, %v1263_v39, %v1265_v42 }
  0x5e   : > { %2317 = vmatprep.mubr.msk.bf16.mxu0 %vm2561_vm0, %v2560_v1  ;;  %2362 = vmatpush3.bf16.msra.mxu0 %v2513_v46  ;;  %v2075_v46 = vcombine.low %v1578_v43, %v2905_v12  ;;  %v1430_v12 = vshrl.u32 %v2951_v29, 16 }
  0x5f   : > { %2363 = vmatprep.subr.bf16.mxu0 %v2560_v1  ;;  %2332 = vmatpush3.bf16.msra.mxu1 %v2509_v48  ;;  %v1407_v48 = vshll.u32 %v2909_v16, 16  ;;  %v1597_v16 = vrot.slane %v2951_v29, 3 }
  0x60   : > { %2333 = vmatprep.subr.bf16.mxu1 %v2560_v1  ;;  %v1592_v51 = vrot.slane %v2075_v46, 3  ;;  %v1432_v19 = vrot.slane %v1430_v12, 2 }
  0x62   : > { %2364 = vmatpush3.bf16.msra.mxu0 %v2518_v52  ;;  %2286 = vmatmul.mubr.msk.bf16.gmra.mrb[36].mxu1 %vm348_vm2, %v743_v53  ;;  %v1593_v52 = vrot.slane %v2912_v17, 3  ;;  %v1085_v53 = vsel %vm1074_vm5, %v1082_v41, %v1084_v47  ;;  %v1428_v17 = vsel %vm1402_vm7, %v1418_v63, %v1427_v61 }
  0x63   : > { %2413 = vmatprep.subr.bf16.mxu0 %v2560_v1  ;;  %2289 = vmatprep.mubr.msk.bf16.mxu1 %vm2561_vm0, %v2560_v1 }
  0x64   : > { %2334 = vmatpush3.bf16.msra.mxu1 %v2512_v54  ;;  %v1406_v54 = vrot.slane %v1404_v58, 2  ;;  %v1594_v60 = vsel %vm1591_vm6, %v1592_v51, %v1593_v52 }
  0x65   : > { %2318 = vmatmul.mubr.msk.bf16.gmra.mrb[36].mxu0 %vm348_vm2, %v920_v55  ;;  %2335 = vmatprep.subr.bf16.mxu1 %v2560_v1  ;;  %v1409_v55 = vrot.slane %v1407_v48, 3 }
  0x66   : > { %2321 = vmatprep.mubr.msk.bf16.mxu0 %vm2561_vm0, %v2560_v1 }
  0x68   : > { %2336 = vmatpush3.bf16.msra.mxu1 %v2515_v62  ;;  %v1410_v62 = vor.u32 %v1409_v55, %v1406_v54 }
  0x69   : > { %2385 = vmatprep.subr.bf16.mxu1 %v2560_v1 }
  0x6a   : > { %2290 = vmatmul.mubr.msk.bf16.gmra.mrb[40].mxu1 %vm348_vm2, %v745_v4  ;;  %v1595_v4 = vrot.slane %v2930_v24, 3  ;;  %v1599_v24 = vrot.slane %v2980_v36, 3 }
  0x6b   : > { %2293 = vmatprep.mubr.msk.bf16.mxu1 %vm2561_vm0, %v2560_v1 }
  0x6c   : > { %v1596_v11 = vsel %vm1591_vm6, %v1593_v52, %v1595_v4  ;;  %v1598_v21 = vsel %vm1591_vm6, %v1595_v4, %v1597_v16 }
  0x6d   : > { %2322 = vmatmul.mubr.msk.bf16.gmra.mrb[40].mxu0 %vm348_vm2, %v929_v7  ;;  %v1419_v7 = vsel %vm1402_vm7, %v1410_v62, %v1418_v63 }
  0x6e   : > { %2325 = vmatprep.mubr.msk.bf16.mxu0 %vm2561_vm0, %v2560_v1 }
  0x72   : > { %2294 = vmatmul.mubr.msk.bf16.gmra.mrb[44].mxu1 %vm348_vm2, %v2761_v2  ;;  %v2523_v2 = vld [vmem:[%s3145_s1 + $0x100] sm:$0xff]  }
  0x73   : > { %2297 = vmatprep.mubr.msk.bf16.mxu1 %vm2561_vm0, %v2560_v1 }
  0x75   : > { %2326 = vmatmul.mubr.msk.bf16.gmra.mrb[44].mxu0 %vm348_vm2, %v938_v13  ;;  %v1433_v13 = vshll.u32 %v2951_v29, 16 }
  0x76   : > { %2365 = vmatprep.mubr.msk.bf16.mxu0 %vm2561_vm0, %v2560_v1 }
  0x77   : > { %v1435_v20 = vrot.slane %v1433_v13, 3 }
  0x79   : > { %v1436_v22 = vor.u32 %v1435_v20, %v1432_v19 }
  0x7a   : > { %2298 = vmatmul.mubr.msk.bf16.gmra.mrb[48].mxu1 %vm348_vm2, %v2773_v8  ;;  %v1077_v8 = vsel %vm1074_vm5, %v1075_v25, %v1076_v5 }
  0x7b   : > { %2337 = vmatprep.mubr.msk.bf16.mxu1 %vm2561_vm0, %v2560_v1  ;;  %v1437_v25 = vsel %vm1402_vm7, %v1427_v61, %v1436_v22 }
  0x7d   : > { %2366 = vmatmul.mubr.msk.bf16.vlgmr.msra.gmra.mrb[48].mxu0 %vm348_vm2, %v1258_v23  ;;  %v1439_v23 = vshrl.u32 %v2980_v36, 16 }
  0x7e   : > { %2414 = vmatpush3.bf16.msra.mxu0 %v2523_v2  ;;  %2369 = vmatprep.mubr.msk.bf16.mxu0 %vm2561_vm0, %v2560_v1  ;;  %v1442_v2 = vshll.u32 %v2980_v36, 16 }
  0x7f   : > { %2415 = vmatprep.subr.bf16.mxu0 %v2560_v1  ;;  %v1441_v5 = vrot.slane %v1439_v23, 2 }
  0x80   : > { %v1444_v15 = vrot.slane %v1442_v2, 3 }
  0x82   : > { %2416 = vmatpush3.bf16.msra.mxu0 %v2526_v26  ;;  %2338 = vmatmul.mubr.msk.bf16.vlgmr.msra.gmra.mrb[52].mxu1 %vm348_vm2, %v1077_v8  ;;  %v2535_v26 = vld [vmem:[%s2628_s27 + $0x30] ss:$0 sps:$4 sm:$0x77]   ;;  %v1600_v8 = vsel %vm1591_vm6, %v1597_v16, %v1599_v24 }
  0x83   : > { %2417 = vmatprep.subr.bf16.mxu0 %v2560_v1  ;;  %2386 = vmatpush3.bf16.msra.mxu1 %v2522_v18  ;;  %v1445_v18 = vor.u32 %v1444_v15, %v1441_v5  ;;  %v1451_v29 = vshll.u32 %v2535_v26, 16 }
  0x84   : > { %2341 = vmatprep.mubr.msk.bf16.mxu1 %vm2561_vm0, %v2560_v1  ;;  %2387 = vmatprep.subr.bf16.mxu1 %v2560_v1 }
  0x85   : > { %2370 = vmatmul.mubr.msk.bf16.gmra.mrb[52].mxu0 %vm348_vm2, %v1260_v27  ;;  %v1448_v27 = vshrl.u32 %v2535_v26, 16  ;;  %v1446_v31 = vsel %vm1402_vm7, %v1436_v22, %v1445_v18  ;;  %v1453_v33 = vrot.slane %v1451_v29, 3 }
  0x86   : > { %2373 = vmatprep.mubr.msk.bf16.mxu0 %vm2561_vm0, %v2560_v1  ;;  %2418 = vmatpush3.bf16.msra.mxu0 %v2529_v30  ;;  %v1601_v30 = vrot.slane %v2535_v26, 3 }
  0x87   : > { %2419 = vmatprep.subr.bf16.mxu0 %v2560_v1  ;;  %2388 = vmatpush3.bf16.msra.mxu1 %v2525_v32  ;;  %v1450_v32 = vrot.slane %v1448_v27, 2 }
  0x88   : > { %2389 = vmatprep.subr.bf16.mxu1 %v2560_v1 }
  0x8a   : > { %2420 = vmatpush3.bf16.msra.mxu0 %v2533_v6  ;;  %2342 = vmatmul.mubr.msk.bf16.gmra.mrb[56].mxu1 %vm348_vm2, %v1079_v28  ;;  %v1602_v6 = vsel %vm1591_vm6, %v1599_v24, %v1601_v30  ;;  %v1454_v28 = vor.u32 %v1453_v33, %v1450_v32 }
  0x8b   : > { %2345 = vmatprep.mubr.msk.bf16.mxu1 %vm2561_vm0, %v2560_v1  ;;  %2390 = vmatpush3.bf16.msra.mxu1 %v2528_v34 }
  0x8c   : > { %2391 = vmatprep.subr.bf16.mxu1 %v2560_v1  ;;  %v1455_v34 = vsel %vm1402_vm7, %v1445_v18, %v1454_v28 }
  0x8d   : > { %2374 = vmatmul.mubr.msk.bf16.gmra.mrb[56].mxu0 %vm348_vm2, %v1262_v35 }
  0x8e   : > { %2377 = vmatprep.mubr.msk.bf16.mxu0 %vm2561_vm0, %v2560_v1 }
  0x8f   : > { %2392 = vmatpush3.bf16.msra.mxu1 %v2531_v38 }
  0x92   : > { %2346 = vmatmul.mubr.msk.bf16.gmra.mrb[60].mxu1 %vm348_vm2, %v1081_v40 }
  0x93   : > { %2349 = vmatprep.mubr.msk.bf16.mxu1 %vm2561_vm0, %v2560_v1 }
  0x95   : > { %2378 = vmatmul.mubr.msk.bf16.gmra.mrb[60].mxu0 %vm348_vm2, %v1264_v57 }
  0x96   : > { %2381 = vmatprep.mubr.msk.bf16.mxu0 %vm2561_vm0, %v2560_v1 }
  0x9a   : > { %2350 = vmatmul.mubr.msk.bf16.gmra.mrb[64].mxu1 %vm348_vm2, %v1083_v44 }
  0x9b   : > { %2353 = vmatprep.mubr.msk.bf16.mxu1 %vm2561_vm0, %v2560_v1 }
  0x9d   : > { %2382 = vmatmul.mubr.msk.bf16.gmra.mrb[64].mxu0 %vm348_vm2, %v1266_v45 }
  0x9e   : > { %2421 = vmatprep.mubr.msk.bf16.mxu0 %vm2561_vm0, %v2560_v1 }
  0xa2   : > { %2354 = vmatmul.mubr.msk.bf16.gmra.mrb[68].mxu1 %vm348_vm2, %v1085_v53 }
  0xa3   : > { %2393 = vmatprep.mubr.msk.bf16.mxu1 %vm2561_vm0, %v2560_v1 }
  0xa5   : > { %2422 = vmatmul.mubr.msk.bf16.vlgmr.msra.gmra.mrb[68].mxu0 %vm348_vm2, %v1594_v60 }
  0xa6   : > { %2425 = vmatprep.mubr.msk.bf16.mxu0 %vm2561_vm0, %v2560_v1 }
  0xaa   : > { %2394 = vmatmul.mubr.msk.bf16.vlgmr.msra.gmra.mrb[72].mxu1 %vm348_vm2, %v1419_v7 }
  0xab   : > { %2397 = vmatprep.mubr.msk.bf16.mxu1 %vm2561_vm0, %v2560_v1 }
  0xad   : > { %2426 = vmatmul.mubr.msk.bf16.gmra.mrb[72].mxu0 %vm348_vm2, %v1596_v11 }
  0xae   : > { %2429 = vmatprep.mubr.msk.bf16.mxu0 %vm2561_vm0, %v2560_v1 }
  0xb2   : > { %2398 = vmatmul.mubr.msk.bf16.gmra.mrb[76].mxu1 %vm348_vm2, %v1428_v17 }
  0xb3   : > { %2401 = vmatprep.mubr.msk.bf16.mxu1 %vm2561_vm0, %v2560_v1 }
  0xb5   : > { %2430 = vmatmul.mubr.msk.bf16.gmra.mrb[76].mxu0 %vm348_vm2, %v1598_v21 }
  0xb6   : > { %2433 = vmatprep.mubr.msk.bf16.mxu0 %vm2561_vm0, %v2560_v1 }
  0xba   : > { %2402 = vmatmul.mubr.msk.bf16.gmra.mrb[80].mxu1 %vm348_vm2, %v1437_v25 }
  0xbb   : > { %2405 = vmatprep.mubr.msk.bf16.mxu1 %vm2561_vm0, %v2560_v1 }
  0xbd   : > { %2434 = vmatmul.mubr.msk.bf16.gmra.mrb[80].mxu0 %vm348_vm2, %v1600_v8 }
  0xbe   : > { %2437 = vmatprep.mubr.msk.bf16.mxu0 %vm2561_vm0, %v2560_v1 }
  0xc2   : > { %2406 = vmatmul.mubr.msk.bf16.gmra.mrb[84].mxu1 %vm348_vm2, %v1446_v31 }
  0xc3   : > { %2409 = vmatprep.mubr.msk.bf16.mxu1 %vm2561_vm0, %v2560_v1 }
  0xc5   : > { %2438 = vmatmul.mubr.msk.bf16.gmra.mrb[84].mxu0 %vm348_vm2, %v1602_v6 }
  0xca   : > { %2410 = vmatmul.mubr.msk.bf16.gmra.mrb[88].mxu1 %vm348_vm2, %v1455_v34 }
  0xed   : > { %v414_v35 = vpop.f32.mrb[0].mxu1 }
  0xee   : > { %v2207_v36 = vpop.f32.mrb[1].mxu1 }
  0xef   : > { %v417_v37 = vpop.f32.mrb[2].mxu1 }
  0xf0   : > { %v398_v38 = vpop.f32.mrb[0].mxu0  ;;  %v2208_v39 = vpop.f32.mrb[3].mxu1 }
  0xf1   : > { %v2199_v40 = vpop.f32.mrb[1].mxu0 }
  0xf2   : > { %v401_v57 = vpop.f32.mrb[2].mxu0 }
  0xf3   : > { %v2200_v14 = vpop.f32.mrb[3].mxu0 }
  0xf5   : > { %v422_v41 = vpop.f32.mrb[4].mxu1 }
  0xf6   : > { %v2211_v42 = vpop.f32.mrb[5].mxu1 }
  0xf7   : > { %v425_v43 = vpop.f32.mrb[6].mxu1 }
  0xf8   : > { %v406_v44 = vpop.f32.mrb[4].mxu0  ;;  %v2212_v1 = vpop.f32.mrb[7].mxu1 }
  0xf9   : > { %v2203_v45 = vpop.f32.mrb[5].mxu0 }
  0xfa   : > { %v409_v46 = vpop.f32.mrb[6].mxu0 }
  0xfb   : > { %v2204_v47 = vpop.f32.mrb[7].mxu0 }
  0xfd   : > { %v430_v58 = vpop.f32.mrb[8].mxu1 }
  0xfe   : > { %v2215_v48 = vpop.f32.mrb[9].mxu1 }
  0xff   : > { %v433_v49 = vpop.f32.mrb[10].mxu1 }
 0x100   : > { %v642_v50 = vpop.f32.mrb[8].mxu0  ;;  %v2216_v51 = vpop.f32.mrb[11].mxu1 }
 0x101   : > { %v2255_v52 = vpop.f32.mrb[9].mxu0 }
 0x102   : > { %v645_v53 = vpop.f32.mrb[10].mxu0 }
 0x103   : > { %v2256_v54 = vpop.f32.mrb[11].mxu0 }
 0x105   : > { %v505_v55 = vpop.f32.mrb[12].mxu1 }
 0x106   : > { %v506_v56 = vadd.f32 %v505_v55, %v398_v38  ;;  %v2227_v59 = vpop.f32.mrb[13].mxu1 }
 0x107   : > { %v508_v60 = vpop.f32.mrb[14].mxu1 }
 0x108   : > { %v650_v62 = vpop.f32.mrb[12].mxu0  ;;  %v681_v63 = vadd.f32 %v642_v50, %v506_v56  ;;  %v509_v0 = vadd.f32 %v508_v60, %v401_v57  ;;  %v2228_v3 = vpop.f32.mrb[15].mxu1 }
 0x109   : > { %v2259_v4 = vpop.f32.mrb[13].mxu0 }
 0x10a   : > { %v653_v7 = vpop.f32.mrb[14].mxu0  ;;  %v682_v9 = vadd.f32 %v645_v53, %v509_v0 }
 0x10b   : > { %v2260_v10 = vpop.f32.mrb[15].mxu0 }
 0x10d   : > { %v513_v11 = vpop.f32.mrb[16].mxu1 }
 0x10e   : > { %v514_v61 = vadd.f32 %v513_v11, %v406_v44  ;;  %v2231_v12 = vpop.f32.mrb[17].mxu1 }
 0x10f   : > { %v516_v13 = vpop.f32.mrb[18].mxu1 }
 0x110   : > { %v658_v16 = vpop.f32.mrb[16].mxu0  ;;  %v683_v17 = vadd.f32 %v650_v62, %v514_v61  ;;  %v517_v19 = vadd.f32 %v516_v13, %v409_v46  ;;  %v2232_v20 = vpop.f32.mrb[19].mxu1 }
 0x111   : > { %v2263_v21 = vpop.f32.mrb[17].mxu0 }
 0x112   : > { %v661_v22 = vpop.f32.mrb[18].mxu0  ;;  %v684_v23 = vadd.f32 %v653_v7, %v517_v19 }
 0x113   : > { %v2264_v2 = vpop.f32.mrb[19].mxu0 }
 0x115   : > { %v521_v24 = vpop.f32.mrb[20].mxu1 }
 0x116   : > { %v522_v25 = vadd.f32 %v521_v24, %v414_v35  ;;  %v2235_v5 = vpop.f32.mrb[21].mxu1 }
 0x117   : > { %v524_v15 = vpop.f32.mrb[22].mxu1 }
 0x118   : > { %v666_v26 = vpop.f32.mrb[20].mxu0  ;;  %v685_v8 = vadd.f32 %v658_v16, %v522_v25  ;;  %v525_v18 = vadd.f32 %v524_v15, %v417_v37  ;;  %v2236_v27 = vpop.f32.mrb[23].mxu1 }
 0x119   : > { %v2267_v29 = vpop.f32.mrb[21].mxu0 }
 0x11a   : > { %v669_v30 = vpop.f32.mrb[22].mxu0  ;;  %v686_v31 = vadd.f32 %v661_v22, %v525_v18 }
 0x11b   : > { %v2268_v32 = vpop.f32.mrb[23].mxu0 }
 0x11d   : > { %v529_v33 = vpop.f32.mrb[24].mxu1 }
 0x11e   : > { %v530_v6 = vadd.f32 %v529_v33, %v422_v41  ;;  %v2239_v28 = vpop.f32.mrb[25].mxu1 }
 0x11f   : > { %v532_v34 = vpop.f32.mrb[26].mxu1 }
 0x120   : > { %v674_v36 = vpop.f32.mrb[24].mxu0  ;;  %v687_v38 = vadd.f32 %v666_v26, %v530_v6  ;;  %v533_v39 = vadd.f32 %v532_v34, %v425_v43  ;;  %v2240_v40 = vpop.f32.mrb[27].mxu1 }
 0x121   : > { %v2271_v57 = vpop.f32.mrb[25].mxu0 }
 0x122   : > { %v677_v35 = vpop.f32.mrb[26].mxu0  ;;  %v688_v14 = vadd.f32 %v669_v30, %v533_v39 }
 0x123   : > { %v2272_v42 = vpop.f32.mrb[27].mxu0 }
 0x125   : > { %v537_v44 = vpop.f32.mrb[28].mxu1 }
 0x126   : > { %v538_v1 = vadd.f32 %v537_v44, %v430_v58  ;;  %v2243_v37 = vpop.f32.mrb[29].mxu1 }
 0x127   : > { %v540_v45 = vpop.f32.mrb[30].mxu1 }
 0x128   : > { %v1012_v46 = vpop.f32.mrb[28].mxu0  ;;  %v689_v47 = vadd.f32 %v674_v36, %v538_v1  ;;  %v541_v48 = vadd.f32 %v540_v45, %v433_v49  ;;  %v2244_v50 = vpop.f32.mrb[31].mxu1 }
 0x129   : > { %v2311_v51 = vpop.f32.mrb[29].mxu0 }
 0x12a   : > { %v1015_v41 = vpop.f32.mrb[30].mxu0  ;;  %v690_v52 = vadd.f32 %v677_v35, %v541_v48 }
 0x12b   : > { %v2312_v53 = vpop.f32.mrb[31].mxu0 }
 0x12d   : > { %v823_v54 = vpop.f32.mrb[32].mxu1 }
 0x12e   : > { %v862_v55 = vadd.f32 %v823_v54, %v681_v63  ;;  %v2283_v43 = vpop.f32.mrb[33].mxu1 }
 0x12f   : > { %v826_v56 = vpop.f32.mrb[34].mxu1 }
 0x130   : > { %v1020_v59 = vpop.f32.mrb[32].mxu0  ;;  %v1051_v60 = vadd.f32 %v1012_v46, %v862_v55  ;;  %v863_v62 = vadd.f32 %v826_v56, %v682_v9  ;;  %v2284_v0 = vpop.f32.mrb[35].mxu1 }
 0x131   : > { %v2315_v3 = vpop.f32.mrb[33].mxu0 }
 0x132   : > { %v1023_v58 = vpop.f32.mrb[34].mxu0  ;;  %v1052_v4 = vadd.f32 %v1015_v41, %v863_v62 }
 0x133   : > { %v2316_v7 = vpop.f32.mrb[35].mxu0 }
 0x135   : > { %v831_v10 = vpop.f32.mrb[36].mxu1 }
 0x136   : > { %v864_v11 = vadd.f32 %v831_v10, %v683_v17  ;;  %v2287_v49 = vpop.f32.mrb[37].mxu1 }
 0x137   : > { %v834_v61 = vpop.f32.mrb[38].mxu1 }
 0x138   : > { %v1028_v12 = vpop.f32.mrb[36].mxu0  ;;  %v1053_v13 = vadd.f32 %v1020_v59, %v864_v11  ;;  %v865_v16 = vadd.f32 %v834_v61, %v684_v23  ;;  %v2288_v19 = vpop.f32.mrb[39].mxu1 }
 0x139   : > { %v2319_v20 = vpop.f32.mrb[37].mxu0 }
 0x13a   : > { %v1031_v63 = vpop.f32.mrb[38].mxu0  ;;  %v1054_v21 = vadd.f32 %v1023_v58, %v865_v16 }
 0x13b   : > { %v2320_v22 = vpop.f32.mrb[39].mxu0 }
 0x13d   : > { %v839_v2 = vpop.f32.mrb[40].mxu1 }
 0x13e   : > { %v866_v24 = vadd.f32 %v839_v2, %v685_v8  ;;  %v2291_v9 = vpop.f32.mrb[41].mxu1 }
 0x13f   : > { %v842_v25 = vpop.f32.mrb[42].mxu1 }
 0x140   : > { %v1036_v5 = vpop.f32.mrb[40].mxu0  ;;  %v1055_v15 = vadd.f32 %v1028_v12, %v866_v24  ;;  %v867_v26 = vadd.f32 %v842_v25, %v686_v31  ;;  %v2292_v18 = vpop.f32.mrb[43].mxu1 }
 0x141   : > { %v2323_v27 = vpop.f32.mrb[41].mxu0 }
 0x142   : > { %v1039_v17 = vpop.f32.mrb[42].mxu0  ;;  %v1056_v29 = vadd.f32 %v1031_v63, %v867_v26 }
 0x143   : > { %v2324_v30 = vpop.f32.mrb[43].mxu0 }
 0x145   : > { %v847_v32 = vpop.f32.mrb[44].mxu1 }
 0x146   : > { %v868_v33 = vadd.f32 %v847_v32, %v687_v38  ;;  %v2295_v23 = vpop.f32.mrb[45].mxu1 }
 0x147   : > { %v850_v6 = vpop.f32.mrb[46].mxu1 }
 0x148   : > { %v1044_v28 = vpop.f32.mrb[44].mxu0  ;;  %v1057_v34 = vadd.f32 %v1036_v5, %v868_v33  ;;  %v869_v36 = vadd.f32 %v850_v6, %v688_v14  ;;  %v2296_v39 = vpop.f32.mrb[47].mxu1 }
 0x149   : > { %v2327_v40 = vpop.f32.mrb[45].mxu0 }
 0x14a   : > { %v1047_v8 = vpop.f32.mrb[46].mxu0  ;;  %v1058_v57 = vadd.f32 %v1039_v17, %v869_v36 }
 0x14b   : > { %v2328_v35 = vpop.f32.mrb[47].mxu0 }
 0x14d   : > { %v855_v42 = vpop.f32.mrb[48].mxu1 }
 0x14e   : > { %v870_v44 = vadd.f32 %v855_v42, %v689_v47  ;;  %v2299_v31 = vpop.f32.mrb[49].mxu1 }
 0x14f   : > { %v858_v1 = vpop.f32.mrb[50].mxu1 }
 0x150   : > { %v1340_v37 = vpop.f32.mrb[48].mxu0  ;;  %v1059_v45 = vadd.f32 %v1044_v28, %v870_v44  ;;  %v871_v46 = vadd.f32 %v858_v1, %v690_v52  ;;  %v2300_v48 = vpop.f32.mrb[51].mxu1 }
 0x151   : > { %v2367_v50 = vpop.f32.mrb[49].mxu0 }
 0x152   : > { %v1343_v38 = vpop.f32.mrb[50].mxu0  ;;  %v1060_v51 = vadd.f32 %v1047_v8, %v871_v46 }
 0x153   : > { %v2368_v41 = vpop.f32.mrb[51].mxu0 }
 0x155   : > { %v1159_v53 = vpop.f32.mrb[52].mxu1 }
 0x156   : > { %v1198_v54 = vadd.f32 %v1159_v53, %v1051_v60  ;;  %v2339_v14 = vpop.f32.mrb[53].mxu1 }
 0x157   : > { %v1162_v55 = vpop.f32.mrb[54].mxu1 }
 0x158   : > { %v1348_v43 = vpop.f32.mrb[52].mxu0  ;;  %v1379_v56 = vadd.f32 %v1340_v37, %v1198_v54  ;;  %v1199_v59 = vadd.f32 %v1162_v55, %v1052_v4  ;;  %v2340_v62 = vpop.f32.mrb[55].mxu1 }
 0x159   : > { %v2371_v0 = vpop.f32.mrb[53].mxu0 }
 0x15a   : > { %v1351_v47 = vpop.f32.mrb[54].mxu0  ;;  %v1380_v3 = vadd.f32 %v1343_v38, %v1199_v59 }
 0x15b   : > { %v2372_v58 = vpop.f32.mrb[55].mxu0 }
 0x15d   : > { %v1167_v7 = vpop.f32.mrb[56].mxu1 }
 0x15e   : > { %v1200_v10 = vadd.f32 %v1167_v7, %v1053_v13  ;;  %v2343_v52 = vpop.f32.mrb[57].mxu1 }
 0x15f   : > { %v1170_v11 = vpop.f32.mrb[58].mxu1 }
 0x160   : > { %v1356_v49 = vpop.f32.mrb[56].mxu0  ;;  %v3070_v61 = vadd.f32 %v1348_v43, %v1200_v10  ;;  %v1201_v12 = vadd.f32 %v1170_v11, %v1054_v21  ;;  %v2344_v16 = vpop.f32.mrb[59].mxu1 }
 0x161   : > { %v2375_v60 = vpop.f32.mrb[57].mxu0 }
 0x162   : > { %v1359_v19 = vpop.f32.mrb[58].mxu0  ;;  %v3072_v20 = vadd.f32 %v1351_v47, %v1201_v12 }
 0x163   : > { %v2376_v63 = vpop.f32.mrb[59].mxu0 }
 0x165   : > { %v1175_v4 = vpop.f32.mrb[60].mxu1 }
 0x166   : > { %v1202_v22 = vadd.f32 %v1175_v4, %v1055_v15  ;;  %v2347_v2 = vpop.f32.mrb[61].mxu1 }
 0x167   : > { %v1178_v24 = vpop.f32.mrb[62].mxu1 }
 0x168   : > { %v1364_v9 = vpop.f32.mrb[60].mxu0  ;;  %v3074_v25 = vadd.f32 %v1356_v49, %v1202_v22  ;;  %v1203_v13 = vadd.f32 %v1178_v24, %v1056_v29  ;;  %v2348_v5 = vpop.f32.mrb[63].mxu1 }
 0x169   : > { %v2379_v26 = vpop.f32.mrb[61].mxu0 }
 0x16a   : > { %v1367_v18 = vpop.f32.mrb[62].mxu0  ;;  %v3076_v27 = vadd.f32 %v1359_v19, %v1203_v13 }
 0x16b   : > { %v2380_v21 = vpop.f32.mrb[63].mxu0 }
 0x16d   : > { %v1183_v17 = vpop.f32.mrb[64].mxu1 }
 0x16e   : > { %v1204_v30 = vadd.f32 %v1183_v17, %v1057_v34  ;;  %v2351_v32 = vpop.f32.mrb[65].mxu1 }
 0x16f   : > { %v1186_v33 = vpop.f32.mrb[66].mxu1 }
 0x170   : > { %v1372_v23 = vpop.f32.mrb[64].mxu0  ;;  %v3078_v6 = vadd.f32 %v1364_v9, %v1204_v30  ;;  %v1205_v15 = vadd.f32 %v1186_v33, %v1058_v57  ;;  %v2352_v28 = vpop.f32.mrb[67].mxu1 }
 0x171   : > { %v2383_v36 = vpop.f32.mrb[65].mxu0 }
 0x172   : > { %v1375_v39 = vpop.f32.mrb[66].mxu0  ;;  %v3080_v40 = vadd.f32 %v1367_v18, %v1205_v15 }
 0x173   : > { %v2384_v29 = vpop.f32.mrb[67].mxu0 }
 0x175   : > { %v1191_v8 = vpop.f32.mrb[68].mxu1 }
 0x176   : > { %v1206_v35 = vadd.f32 %v1191_v8, %v1059_v45  ;;  %v2355_v42 = vpop.f32.mrb[69].mxu1  ;;  %v3089_v45 = vld [vmem:[%s3146_s2] ss:$0 sm:$0xff] }
 0x177   : > { %v1194_v44 = vpop.f32.mrb[70].mxu1 }
 0x178   : > { %v1676_v31 = vpop.f32.mrb[68].mxu0  ;;  %v3082_v1 = vadd.f32 %v1372_v23, %v1206_v35  ;;  %v1207_v34 = vadd.f32 %v1194_v44, %v1060_v51  ;;  %v2356_v37 = vpop.f32.mrb[71].mxu1 }
 0x179   : > { %v2423_v46 = vpop.f32.mrb[69].mxu0 }
 0x17a   : > { %v1679_v48 = vpop.f32.mrb[70].mxu0  ;;  %v3084_v50 = vadd.f32 %v1375_v39, %v1207_v34 }
 0x17b   : > { %v2424_v57 = vpop.f32.mrb[71].mxu0 }
 0x17d   : > { %v1529_v38 = vpop.f32.mrb[72].mxu1 }
 0x17e   : > { %v1568_v41 = vadd.f32 %v1529_v38, %v1379_v56  ;;  %v2395_v53 = vpop.f32.mrb[73].mxu1 }
 0x17f   : > { %v1532_v54 = vpop.f32.mrb[74].mxu1 }
 0x180   : > { %v1684_v14 = vpop.f32.mrb[72].mxu0  ;;  %v1715_v55 = vadd.f32 %v1676_v31, %v1568_v41  ;;  %v1569_v43 = vadd.f32 %v1532_v54, %v1380_v3  ;;  %v2396_v51 = vpop.f32.mrb[75].mxu1 }
 0x181   : > { %v2427_v59 = vpop.f32.mrb[73].mxu0 }
 0x182   : > { %v1687_v62 = vpop.f32.mrb[74].mxu0  ;;  %v1732_v0 = vadd.f32 %v3089_v45, %v1715_v55  ;;  %v1716_v47 = vadd.f32 %v1679_v48, %v1569_v43 }
 0x183   : > { %v2428_v58 = vpop.f32.mrb[75].mxu0 }
 0x184   : > { %v1742_v7 = vmax.f32 %v1732_v0, 0.0  ;;  %v1733_v56 = vadd.f32 %v3089_v45, %v1716_v47 }
 0x185   : > { %v1537_v3 = vpop.f32.mrb[76].mxu1 }
 0x186   : > { %v2098_v10 = vpack.c.bf16 %v1742_v7, %v1742_v7  ;;  %v1743_v52 = vmax.f32 %v1733_v56, 0.0  ;;  %v1570_v11 = vadd.f32 %v1537_v3, %v3070_v61  ;;  %v2399_v49 = vpop.f32.mrb[77].mxu1 }
 0x187   : > { %v1540_v12 = vpop.f32.mrb[78].mxu1 }
 0x188   : > { %v1692_v16 = vpop.f32.mrb[76].mxu0  ;;  %1793 = vst.msk [vmem:[%s3097_s30] sm:$0xf] %vm1792_vm8, %v2098_v10  ;;  %v2099_v60 = vpack.c.bf16 %v1743_v52, %v1743_v52  ;;  %v1717_v19 = vadd.f32 %v1684_v14, %v1570_v11  ;;  %v1571_v63 = vadd.f32 %v1540_v12, %v3072_v20  ;;  %v2400_v4 = vpop.f32.mrb[79].mxu1 }
 0x189   : > { %v2431_v22 = vpop.f32.mrb[77].mxu0 }
 0x18a   : > { %v1695_v2 = vpop.f32.mrb[78].mxu0  ;;  %1794 = vst.msk [vmem:[%s3097_s30 + $0x4] sm:$0xf] %vm1792_vm8, %v2099_v60  ;;  %v1734_v24 = vadd.f32 %v3089_v45, %v1717_v19  ;;  %v1718_v9 = vadd.f32 %v1687_v62, %v1571_v63 }
 0x18b   : > { %v2432_v13 = vpop.f32.mrb[79].mxu0 }
 0x18c   : > { %v1744_v61 = vmax.f32 %v1734_v24, 0.0  ;;  %v1735_v5 = vadd.f32 %v3089_v45, %v1718_v9 }
 0x18d   : > { %v1545_v26 = vpop.f32.mrb[80].mxu1 }
 0x18e   : > { %v2100_v18 = vpack.c.bf16 %v1744_v61, %v1744_v61  ;;  %v1745_v21 = vmax.f32 %v1735_v5, 0.0  ;;  %v1572_v17 = vadd.f32 %v1545_v26, %v3074_v25  ;;  %v2403_v20 = vpop.f32.mrb[81].mxu1 }
 0x18f   : > { %v1548_v30 = vpop.f32.mrb[82].mxu1 }
 0x190   : > { %v1700_v32 = vpop.f32.mrb[80].mxu0  ;;  %1795 = vst.msk [vmem:[%s3097_s30 + $0x8] sm:$0xf] %vm1792_vm8, %v2100_v18  ;;  %v2101_v33 = vpack.c.bf16 %v1745_v21, %v1745_v21  ;;  %v1719_v23 = vadd.f32 %v1692_v16, %v1572_v17  ;;  %v1573_v15 = vadd.f32 %v1548_v30, %v3076_v27  ;;  %v2404_v28 = vpop.f32.mrb[83].mxu1 }
 0x191   : > { %v2435_v36 = vpop.f32.mrb[81].mxu0 }
 0x192   : > { %v1703_v39 = vpop.f32.mrb[82].mxu0  ;;  %1796 = vst.msk [vmem:[%s3097_s30 + $0xc] sm:$0xf] %vm1792_vm8, %v2101_v33  ;;  %v1736_v29 = vadd.f32 %v3089_v45, %v1719_v23  ;;  %v1720_v8 = vadd.f32 %v1695_v2, %v1573_v15 }
 0x193   : > { %v2436_v35 = vpop.f32.mrb[83].mxu0 }
 0x194   : > { %v1746_v25 = vmax.f32 %v1736_v29, 0.0  ;;  %v1737_v42 = vadd.f32 %v3089_v45, %v1720_v8 }
 0x195   : > { %v1553_v44 = vpop.f32.mrb[84].mxu1 }
 0x196   : > { %v2102_v31 = vpack.c.bf16 %v1746_v25, %v1746_v25  ;;  %v1747_v34 = vmax.f32 %v1737_v42, 0.0  ;;  %v1574_v37 = vadd.f32 %v1553_v44, %v3078_v6  ;;  %v2407_v27 = vpop.f32.mrb[85].mxu1 }
 0x197   : > { %v1556_v46 = vpop.f32.mrb[86].mxu1 }
 0x198   : > { %v1708_v48 = vpop.f32.mrb[84].mxu0  ;;  %1797 = vst.msk [vmem:[%s3097_s30 + $0x10] sm:$0xf] %vm1792_vm8, %v2102_v31  ;;  %v2103_v57 = vpack.c.bf16 %v1747_v34, %v1747_v34  ;;  %v1721_v38 = vadd.f32 %v1700_v32, %v1574_v37  ;;  %v1575_v41 = vadd.f32 %v1556_v46, %v3080_v40  ;;  %v2408_v53 = vpop.f32.mrb[87].mxu1 }
 0x199   : > { %v2439_v54 = vpop.f32.mrb[85].mxu0 }
 0x19a   : > { %v1711_v14 = vpop.f32.mrb[86].mxu0  ;;  %1798 = vst.msk [vmem:[%s3097_s30 + $0x14] sm:$0xf] %vm1792_vm8, %v2103_v57  ;;  %v1738_v55 = vadd.f32 %v3089_v45, %v1721_v38  ;;  %v1722_v43 = vadd.f32 %v1703_v39, %v1575_v41 }
 0x19b   : > { %v2440_v6 = vpop.f32.mrb[87].mxu0 }
 0x19c   : > { %v1748_v51 = vmax.f32 %v1738_v55, 0.0  ;;  %v1739_v59 = vadd.f32 %v3089_v45, %v1722_v43 }
 0x19d   : > { %v1561_v62 = vpop.f32.mrb[88].mxu1 }
 0x19e   : > { %v2104_v0 = vpack.c.bf16 %v1748_v51, %v1748_v51  ;;  %v1749_v47 = vmax.f32 %v1739_v59, 0.0  ;;  %v1576_v40 = vadd.f32 %v1561_v62, %v3082_v1  ;;  %v2411_v58 = vpop.f32.mrb[89].mxu1 }
 0x19f   : > { %v1564_v7 = vpop.f32.mrb[90].mxu1 }
 0x1a0   : > { %1799 = vst.msk [vmem:[%s3097_s30 + $0x18] sm:$0xf] %vm1792_vm8, %v2104_v0  ;;  %v2105_v56 = vpack.c.bf16 %v1749_v47, %v1749_v47  ;;  %v1723_v3 = vadd.f32 %v1708_v48, %v1576_v40  ;;  %v1577_v10 = vadd.f32 %v1564_v7, %v3084_v50  ;;  %v2412_v52 = vpop.f32.mrb[91].mxu1 }
 0x1a2   : > { %1800 = vst.msk [vmem:[%s3097_s30 + $0x1c] sm:$0xf] %vm1792_vm8, %v2105_v56  ;;  %v1740_v11 = vadd.f32 %v3089_v45, %v1723_v3  ;;  %v1724_v49 = vadd.f32 %v1711_v14, %v1577_v10 }
 0x1a4   : > { %v1750_v12 = vmax.f32 %v1740_v11, 0.0  ;;  %v1741_v16 = vadd.f32 %v3089_v45, %v1724_v49 }
 0x1a6   : > { %v2106_v60 = vpack.c.bf16 %v1750_v12, %v1750_v12  ;;  %v1751_v1 = vmax.f32 %v1741_v16, 0.0 }
 0x1a8   : > { %1801 = vst.msk [vmem:[%s3097_s30 + $0x20] sm:$0xf] %vm1792_vm8, %v2106_v60  ;;  %v2107_v19 = vpack.c.bf16 %v1751_v1, %v1751_v1 }
 0x1aa   : > { %1802 = vst.msk [vmem:[%s3097_s30 + $0x24] sm:$0xf] %vm1792_vm8, %v2107_v19 }
 0x1ab PF: > { %s13_s14 = sadd.s32 1, %s2558_s14   ;;  %s3148_s12 = smov %s2554_s13 }
 0x1ac   : > { %p10_p5 = scmp.ge.s32.totalorder %s13_s14, 4   ;;  %s3149_s13 = smov %s3151_s15 }
 0x1ae   :  { %12 = sbr.rel (!%p10_p5) target bundleno = 2 (0x2), region = 76 }

// kernel: resnet_forward.11
= control target key start
LH: loop header
LB: loop body
LE: loop exit
PB: predicated region body
PF: predicated region fallthrough
CT: control target
= control target key end

     0   :  { %s2718_s15 = smov 0   ;;  %s2720_s16 = smov 0   ;;  %s3294_s0 = inlined_call_operand.vmem [shape: bf16[2,110,64], index: 0, kind: input, shape index: {}]   ;;  %s3295_s1 = inlined_call_operand.vmem [shape: bf16[9,64,64], index: 1, kind: input, shape index: {}]   ;;  %s3296_s2 = inlined_call_operand.vmem [shape: f32[1,64], index: 2, kind: input, shape index: {}]   ;;  %s3297_s3 = inlined_call_operand.vmem [shape: bf16[2,80,64], index: 3, kind: input, shape index: {}]   ;;  %s3298_s4 = inlined_call_operand.vmem [shape: bf16[2,80,64], index: 4, kind: output, shape index: {}]  }
   0x1   :  { %s2722_s17 = smov 0  }
   0x2 LB: > { %s26_s18 = sadd.s32 1, %s2685_s16  ;;  %p2020_p0 = scmp.ge.s32.totalorder %s2689_s17, 1  ;;  %s2689_s17 = sphi %s2722_s17, %s14_s17   ;;  %s2685_s16 = sphi %s2720_s16, %s3300_s16   ;;  %s2681_s15 = sphi %s2718_s15, %s3299_s15  }
   0x3   : > { %p28_p1 = scmp.ge.s32.totalorder %s26_s18, 2  ;;  %p208_p2 = scmp.lt.s32.totalorder %s2689_s17, 3 }
   0x5   : > { %s3302_s18 = smov (%p28_p1, %s26_s18), 0  ;;  %p209_p3 = pnand %p2020_p0, %p208_p2 }
   0x6   : > { %v2608_v0 = vld [vmem:[%s3295_s1 + $0x20] sm:$0xff] (!%p209_p3)   ;;  %v2691_v1 = vmov (!%p209_p3), 0.0   ;;  %v2609_v2 = vld [vmem:[%s3295_s1 + $0x28] sm:$0xff] (!%p209_p3)   ;;  %p252_p4 = scmp.lt.s32.totalorder (!%p209_p3), %s2681_s15, 1  ;;  %vm2692_vm0 = vmmov (!%p209_p3), 0   ;;  %v2610_v3 = vld [vmem:[%s3295_s1 + $0x30] sm:$0xff] (!%p209_p3)  }
   0x7   : > { %212 = sbr.rel (%p209_p3) target bundleno = 429 (0x1ad), region = 36  ;;  %2572 = vmatprep.subr.bf16.mxu1 (!%p209_p3), %v2691_v1  ;;  %2320 = vmatprep.subr.bf16.mxu0 (!%p209_p3), %v2691_v1  ;;  %v2611_v4 = vld [vmem:[%s3295_s1 + $0x38] sm:$0xff] (!%p209_p3)   ;;  %vm337_vm1 = vsmask.f32 (!%p209_p3), 7424  ;;  %vm406_vm2 = vcmask (!%p209_p3), 523264   ;;  %v2614_v21 = vld [vmem:[%s3295_s1] sm:$0xff] (!%p209_p3)  }
   0x8   : > { %2576 = vmatpush3.bf16.msra.mxu1 (!%p209_p3), %v2608_v0  ;;  %2321 = vmatpush3.bf16.msra.mxu0 (!%p209_p3), %v2608_v0  ;;  %v2619_v28 = vld [vmem:[%s3295_s1 + $0x40] sm:$0xff] (!%p209_p3)   ;;  %v2615_v31 = vld [vmem:[%s3295_s1 + $0x8] sm:$0xff] (!%p209_p3)   ;;  %v2620_v35 = vld [vmem:[%s3295_s1 + $0x10] sm:$0xff] (!%p209_p3)   ;;  %vm615_vm3 = vcmask (!%p209_p3), 1046528   ;;  %vm943_vm4 = vsmask.f32 (!%p209_p3), 6400 }
   0x9   : > { %2573 = vmatprep.subr.bf16.mxu1 (!%p209_p3), %v2691_v1  ;;  %2322 = vmatprep.subr.bf16.mxu0 (!%p209_p3), %v2691_v1  ;;  %v2621_v36 = vld [vmem:[%s3295_s1 + $0x48] sm:$0xff] (!%p209_p3)   ;;  %v2623_v43 = vld [vmem:[%s3295_s1 + $0x50] sm:$0xff] (!%p209_p3)   ;;  %v2624_v47 = vld [vmem:[%s3295_s1 + $0x18] sm:$0xff] (!%p209_p3)   ;;  %vm1132_vm5 = vcmask (!%p209_p3), 1045504   ;;  %vm1649_vm6 = vcmask (!%p209_p3), 1044480   ;;  %vm1880_vm8 = vcmask (!%p209_p3), 519168  }
   0xa   : > { %2336 = vmatprep.mubr.msk.bf16.mxu1 (!%p209_p3), %vm2692_vm0, %v2691_v1  ;;  %2328 = vmatprep.mubr.msk.bf16.mxu0 (!%p209_p3), %vm2692_vm0, %v2691_v1  ;;  %v2625_v48 = vld [vmem:[%s3295_s1 + $0x58] sm:$0xff] (!%p209_p3)   ;;  %v2628_v53 = vld [vmem:[%s3295_s1 + $0x80] sm:$0xff] (!%p209_p3)   ;;  %v2630_v55 = vld [vmem:[%s3295_s1 + $0x88] sm:$0xff] (!%p209_p3)   ;;  %vm1460_vm7 = vsmask.f32 (!%p209_p3), 5376 }
   0xb   : > { %v2627_v56 = vld [vmem:[%s3295_s1 + $0x60] sm:$0xff] (!%p209_p3)   ;;  %v2632_v60 = vld [vmem:[%s3295_s1 + $0x90] sm:$0xff] (!%p209_p3)   ;;  %v2629_v0 = vld [vmem:[%s3295_s1 + $0x68] sm:$0xff] (!%p209_p3)  }
   0xc   : > { %2577 = vmatpush3.bf16.msra.mxu1 (!%p209_p3), %v2609_v2  ;;  %2323 = vmatpush3.bf16.msra.mxu0 (!%p209_p3), %v2609_v2 }
   0xd   : > { %2574 = vmatprep.subr.bf16.mxu1 (!%p209_p3), %v2691_v1  ;;  %2324 = vmatprep.subr.bf16.mxu0 (!%p209_p3), %v2691_v1 }
   0xe   : > { %s3304_s15 = smov (!%p252_p4, %s2681_s15), 1 }
   0xf   : > { %s2580_s25 = smul.u32 56, %s3304_s15 }
  0x10   : > { %2578 = vmatpush3.bf16.msra.mxu1 %v2610_v3  ;;  %2325 = vmatpush3.bf16.msra.mxu0 %v2610_v3 }
  0x11   : > { %s2764_s30 = scalar_lea.vmem %s3294_s0, %s2580_s25  ;;  %2575 = vmatprep.subr.bf16.mxu1 %v2691_v1  ;;  %2326 = vmatprep.subr.bf16.mxu0 %v2691_v1 }
  0x12   : > { %v2767_v5 = vld [vmem:[%s2764_s30 + $0x10] sm:$0xff]   ;;  %v2770_v6 = vld [vmem:[%s2764_s30 + $0x18] sm:$0xff]   ;;  %v281_v7 = vld [vmem:[%s2764_s30] sm:$0xf] }
  0x13   : > { %v2776_v8 = vld [vmem:[%s2764_s30 + $0x4] sm:$0xf]  ;;  %v354_v9 = vshll.u32 %v2767_v5, 16  ;;  %v358_v10 = vshrl.u32 %v2767_v5, 16  ;;  %v362_v11 = vshll.u32 %v2770_v6, 16  ;;  %v2785_v13 = vld [vmem:[%s2764_s30 + $0x8] sm:$0xff]  }
  0x14   : > { %v2782_v12 = vcombine.low %v281_v7, %v2776_v8  ;;  %v2788_v14 = vld [vmem:[%s2764_s30 + $0x20] sm:$0xff]   ;;  %2579 = vmatpush3.bf16.msra.mxu1 %v2611_v4  ;;  %2327 = vmatpush3.bf16.msra.mxu0 %v2611_v4  ;;  %v346_v19 = vshll.u32 %v2785_v13, 16  ;;  %v366_v23 = vshrl.u32 %v2770_v6, 16  ;;  %v350_v29 = vshrl.u32 %v2785_v13, 16  ;;  %v2634_v7 = vld [vmem:[%s3295_s1 + $0x98] sm:$0xff]  }
  0x15   : > { %v356_v15 = vrot.slane %v354_v9, 1  ;;  %v364_v16 = vrot.slane %v362_v11, 1  ;;  %2348 = vmatprep.subr.bf16.mxu1 %v2691_v1  ;;  %2376 = vmatprep.subr.bf16.mxu0 %v2691_v1  ;;  %v370_v24 = vshll.u32 %v2788_v14, 16  ;;  %v2807_v30 = vld [vmem:[%s2764_s30 + $0x28] ss:$0 sps:$4 sm:$0x11]  }
  0x16   : > { %v339_v17 = vshrl.u32 %v2782_v12, 16  ;;  %v341_v18 = vshll.u32 %v2782_v12, 16  ;;  %v348_v25 = vrot.slane %v346_v19, 1  ;;  %v602_v38 = vld [vmem:[%s2764_s30] sm:$0xe]  ;;  %v374_v40 = vshrl.u32 %v2788_v14, 16 }
  0x17   : > { %v360_v20 = vor.u32 %v358_v10, %v356_v15  ;;  %v368_v33 = vor.u32 %v366_v23, %v364_v16  ;;  %v372_v34 = vrot.slane %v370_v24, 1  ;;  %v378_v41 = vshll.u32 %v2807_v30, 16  ;;  %v2874_v57 = vld [vmem:[%s2764_s30 + $0x1c] sm:$0xff]   ;;  %v2877_v58 = vld [vmem:[%s2764_s30 + $0x24] sm:$0xff]   ;;  %v2631_v9 = vld [vmem:[%s3295_s1 + $0x70] sm:$0xff]  }
  0x18   : > { %v343_v22 = vrot.slane %v341_v18, 1  ;;  %v352_v37 = vor.u32 %v350_v29, %v348_v25  ;;  %v2064_v44 = vcombine.low %v602_v38, %v2776_v8  ;;  %v617_v50 = vrot.slane %v2785_v13, 1  ;;  %v2647_v63 = vld [vmem:[%s2764_s30 + $0x2c] ss:$0 sps:$4 sm:$0x11]  }
  0x19   : > { %v365_v26 = vsel %vm337_vm1, %v360_v20, %v364_v16  ;;  %v373_v39 = vsel %vm337_vm1, %v368_v33, %v372_v34  ;;  %v376_v45 = vor.u32 %v374_v40, %v372_v34  ;;  %v380_v46 = vrot.slane %v378_v41, 1  ;;  %v2937_v18 = vld [vmem:[%s2764_s30 + $0xc] sm:$0xff]  }
  0x1a   : > { %v344_v27 = vor.u32 %v343_v22, %v339_v17  ;;  %2337 = vmatmul.mubr.msk.bf16.vlgmr.msra.gmra.mrb[0].mxu1 %vm406_vm2, %v365_v26  ;;  %v357_v42 = vsel %vm337_vm1, %v352_v37, %v356_v15  ;;  %v616_v49 = vrot.slane %v2064_v44, 1  ;;  %v619_v54 = vrot.slane %v2767_v5, 1  ;;  %v2931_v15 = vld [vmem:[%s2764_s30 + $0x8] sm:$0xf] }
  0x1b   : > { %2349 = vmatpush3.bf16.msra.mxu1 %v2614_v21  ;;  %2340 = vmatprep.mubr.msk.bf16.mxu1 %vm2692_vm0, %v2691_v1  ;;  %v381_v51 = vsel %vm337_vm1, %v376_v45, %v380_v46  ;;  %v802_v61 = vrot.slane %v2874_v57, 1  ;;  %v804_v62 = vrot.slane %v2877_v58, 1  ;;  %v806_v3 = vrot.slane %v2647_v63, 1  ;;  %v2644_v46 = vld [vmem:[%s3295_s1 + $0xd0] sm:$0xff]  }
  0x1c   : > { %v349_v32 = vsel %vm337_vm1, %v344_v27, %v348_v25  ;;  %2350 = vmatprep.subr.bf16.mxu1 %v2691_v1  ;;  %v618_v52 = vsel %vm615_vm3, %v616_v49, %v617_v50  ;;  %v620_v59 = vsel %vm615_vm3, %v617_v50, %v619_v54  ;;  %v621_v4 = vrot.slane %v2770_v6, 1 }
  0x1d   : > { %2329 = vmatmul.mubr.msk.bf16.vlgmr.msra.gmra.mrb[0].mxu0 %vm406_vm2, %v349_v32  ;;  %v2897_v2 = vsel %vm615_vm3, %v802_v61, %v804_v62  ;;  %v2909_v8 = vsel %vm615_vm3, %v804_v62, %v806_v3  ;;  %v623_v11 = vrot.slane %v2788_v14, 1  ;;  %v625_v19 = vrot.slane %v2807_v30, 1  ;;  %v2646_v62 = vld [vmem:[%s3295_s1 + $0xb8] sm:$0xff]  }
  0x1e   : > { %2377 = vmatpush3.bf16.msra.mxu0 %v2619_v28  ;;  %2332 = vmatprep.mubr.msk.bf16.mxu0 %vm2692_vm0, %v2691_v1  ;;  %v622_v10 = vsel %vm615_vm3, %v619_v54, %v621_v4  ;;  %v953_v22 = vshrl.u32 %v2937_v18, 16  ;;  %v956_v23 = vshll.u32 %v2937_v18, 16  ;;  %v2951_v28 = vld [vmem:[%s2764_s30 + $0x14] sm:$0xff]   ;;  %v798_v37 = vrot.slane %v2937_v18, 1 }
  0x1f   : > { %2378 = vmatprep.subr.bf16.mxu0 %v2691_v1  ;;  %2351 = vmatpush3.bf16.msra.mxu1 %v2615_v31  ;;  %v624_v16 = vsel %vm615_vm3, %v621_v4, %v623_v11  ;;  %v626_v24 = vsel %vm615_vm3, %v623_v11, %v625_v19  ;;  %v962_v31 = vshrl.u32 %v2951_v28, 16  ;;  %v965_v32 = vshll.u32 %v2951_v28, 16  ;;  %v2643_v54 = vld [vmem:[%s3295_s1 + $0xb0] sm:$0xff]   ;;  %v1119_v19 = vld [vmem:[%s2764_s30 + $0x4] sm:$0xc] }
  0x20   : > { %2352 = vmatprep.subr.bf16.mxu1 %v2691_v1  ;;  %v955_v26 = vrot.slane %v953_v22, 1  ;;  %v958_v27 = vrot.slane %v956_v23, 2  ;;  %v971_v40 = vshrl.u32 %v2874_v57, 16  ;;  %v980_v50 = vshrl.u32 %v2877_v58, 16 }
  0x21   : > { %v964_v34 = vrot.slane %v962_v31, 1  ;;  %v2123_v22 = vcombine.low %v1119_v19, %v2931_v15  ;;  %v1136_v31 = vrot.slane %v2951_v28, 2 }
  0x22   : > { %2379 = vmatpush3.bf16.msra.mxu0 %v2621_v36  ;;  %2341 = vmatmul.mubr.msk.bf16.gmra.mrb[4].mxu1 %vm406_vm2, %v373_v39  ;;  %v959_v30 = vor.u32 %v958_v27, %v955_v26  ;;  %v2641_v39 = vld [vmem:[%s3295_s1 + $0xc8] sm:$0xff]   ;;  %v973_v44 = vrot.slane %v971_v40, 1 }
  0x23   : > { %2380 = vmatprep.subr.bf16.mxu0 %v2691_v1  ;;  %2353 = vmatpush3.bf16.msra.mxu1 %v2620_v35  ;;  %v967_v35 = vrot.slane %v965_v32, 2  ;;  %v2657_v26 = vld [vmem:[%s3295_s1 + $0x108] sm:$0xff]  }
  0x24   : > { %2344 = vmatprep.mubr.msk.bf16.mxu1 %vm2692_vm0, %v2691_v1  ;;  %2354 = vmatprep.subr.bf16.mxu1 %v2691_v1  ;;  %v2656_v32 = vld [vmem:[%s3295_s1 + $0xe8] sm:$0xff]  }
  0x25   : > { %2333 = vmatmul.mubr.msk.bf16.gmra.mrb[4].mxu0 %vm406_vm2, %v357_v42  ;;  %v968_v38 = vor.u32 %v967_v35, %v964_v34  ;;  %v2637_v42 = vld [vmem:[%s3295_s1 + $0xa0] sm:$0xff]   ;;  %v2659_v34 = vld [vmem:[%s3295_s1 + $0xf0] sm:$0xff]  }
  0x26   : > { %2381 = vmatpush3.bf16.msra.mxu0 %v2623_v43  ;;  %2384 = vmatprep.mubr.msk.bf16.mxu0 %vm2692_vm0, %v2691_v1 }
  0x27   : > { %2382 = vmatprep.subr.bf16.mxu0 %v2691_v1  ;;  %2355 = vmatpush3.bf16.msra.mxu1 %v2624_v47  ;;  %v969_v43 = vsel %vm943_vm4, %v959_v30, %v968_v38  ;;  %v800_v47 = vrot.slane %v2951_v28, 1 }
  0x28   : > { %2404 = vmatprep.subr.bf16.mxu1 %v2691_v1 }
  0x29   : > { %v803_v4 = vsel %vm615_vm3, %v800_v47, %v802_v61  ;;  %v1266_v61 = vld [vmem:[%s2764_s30 + $0x8] sm:$0xc] }
  0x2a   : > { %2383 = vmatpush3.bf16.msra.mxu0 %v2625_v48  ;;  %2345 = vmatmul.mubr.msk.bf16.gmra.mrb[8].mxu1 %vm406_vm2, %v381_v51  ;;  %v2640_v48 = vld [vmem:[%s3295_s1 + $0xa8] sm:$0xff]   ;;  %v983_v51 = vshll.u32 %v2877_v58, 16 }
  0x2b   : > { %2432 = vmatprep.subr.bf16.mxu0 %v2691_v1  ;;  %2356 = vmatprep.mubr.msk.bf16.mxu1 %vm2692_vm0, %v2691_v1 }
  0x2d   : > { %2385 = vmatmul.mubr.msk.bf16.vlgmr.msra.gmra.mrb[8].mxu0 %vm406_vm2, %v618_v52  ;;  %v2649_v52 = vld [vmem:[%s3295_s1 + $0xd8] sm:$0xff]  }
  0x2e   : > { %2433 = vmatpush3.bf16.msra.mxu0 %v2628_v53  ;;  %2388 = vmatprep.mubr.msk.bf16.mxu0 %vm2692_vm0, %v2691_v1  ;;  %v801_v53 = vsel %vm615_vm3, %v798_v37, %v800_v47 }
  0x2f   : > { %2434 = vmatprep.subr.bf16.mxu0 %v2691_v1 }
  0x32   : > { %2435 = vmatpush3.bf16.msra.mxu0 %v2630_v55  ;;  %2357 = vmatmul.mubr.msk.bf16.vlgmr.msra.gmra.mrb[12].mxu1 %vm406_vm2, %v2782_v12  ;;  %v2633_v12 = vld [vmem:[%s3295_s1 + $0x78] sm:$0xff]  }
  0x33   : > { %2436 = vmatprep.subr.bf16.mxu0 %v2691_v1  ;;  %2405 = vmatpush3.bf16.msra.mxu1 %v2627_v56  ;;  %v982_v56 = vrot.slane %v980_v50, 1 }
  0x34   : > { %2360 = vmatprep.mubr.msk.bf16.mxu1 %vm2692_vm0, %v2691_v1  ;;  %2406 = vmatprep.subr.bf16.mxu1 %v2691_v1 }
  0x35   : > { %2389 = vmatmul.mubr.msk.bf16.gmra.mrb[12].mxu0 %vm406_vm2, %v620_v59  ;;  %v985_v59 = vrot.slane %v983_v51, 2 }
  0x36   : > { %2392 = vmatprep.mubr.msk.bf16.mxu0 %vm2692_vm0, %v2691_v1  ;;  %2437 = vmatpush3.bf16.msra.mxu0 %v2632_v60  ;;  %v3013_v60 = vld [vmem:[%s2764_s30 + $0x2c] ss:$0 sps:$4 sm:$0x33]  }
  0x37   : > { %2438 = vmatprep.subr.bf16.mxu0 %v2691_v1  ;;  %2407 = vmatpush3.bf16.msra.mxu1 %v2629_v0  ;;  %v986_v63 = vor.u32 %v985_v59, %v982_v56  ;;  %v989_v0 = vshrl.u32 %v3013_v60, 16  ;;  %v992_v3 = vshll.u32 %v3013_v60, 16  ;;  %v1142_v47 = vrot.slane %v3013_v60, 2 }
  0x38   : > { %2408 = vmatprep.subr.bf16.mxu1 %v2691_v1 }
  0x3a   : > { %2439 = vmatpush3.bf16.msra.mxu0 %v2634_v7  ;;  %2361 = vmatmul.mubr.msk.bf16.gmra.mrb[16].mxu1 %vm406_vm2, %v2785_v13  ;;  %v749_v13 = vld [vmem:[%s2764_s30 + $0x4] sm:$0xe] }
  0x3b   : > { %2488 = vmatprep.subr.bf16.mxu0 %v2691_v1  ;;  %2364 = vmatprep.mubr.msk.bf16.mxu1 %vm2692_vm0, %v2691_v1  ;;  %v2082_v17 = vcombine.low %v749_v13, %v2931_v15 }
  0x3c   : > { %2409 = vmatpush3.bf16.msra.mxu1 %v2631_v9  ;;  %v991_v9 = vrot.slane %v989_v0, 1 }
  0x3d   : > { %2393 = vmatmul.mubr.msk.bf16.gmra.mrb[16].mxu0 %vm406_vm2, %v622_v10  ;;  %2410 = vmatprep.subr.bf16.mxu1 %v2691_v1  ;;  %v945_v20 = vshrl.u32 %v2082_v17, 16  ;;  %v948_v21 = vshll.u32 %v2082_v17, 16  ;;  %v797_v36 = vrot.slane %v2082_v17, 1  ;;  %v994_v10 = vrot.slane %v992_v3, 2  ;;  %v3048_v17 = vld [vmem:[%s2764_s30 + $0x10] sm:$0xff]  }
  0x3e   : > { %2396 = vmatprep.mubr.msk.bf16.mxu0 %vm2692_vm0, %v2691_v1  ;;  %v1473_v50 = vshll.u32 %v3048_v17, 16 }
  0x3f   : > { %v947_v25 = vrot.slane %v945_v20, 1  ;;  %v799_v41 = vsel %vm615_vm3, %v797_v36, %v798_v37  ;;  %v995_v11 = vor.u32 %v994_v10, %v991_v9  ;;  %v3116_v36 = vld [vmem:[%s2764_s30 + $0x28] sm:$0xff]   ;;  %v1138_v37 = vrot.slane %v2874_v57, 2 }
  0x40   : > { %2411 = vmatpush3.bf16.msra.mxu1 %v2633_v12  ;;  %v3041_v12 = vld [vmem:[%s2764_s30 + $0xc] sm:$0xf]  ;;  %v1475_v59 = vrot.slane %v1473_v50, 3 }
  0x41   : > { %2460 = vmatprep.subr.bf16.mxu1 %v2691_v1  ;;  %v996_v13 = vsel %vm943_vm4, %v986_v63, %v995_v11  ;;  %v1139_v40 = vsel %vm1132_vm5, %v1136_v31, %v1138_v37 }
  0x42   : > { %2365 = vmatmul.mubr.msk.bf16.gmra.mrb[20].mxu1 %vm406_vm2, %v2767_v5  ;;  %v950_v5 = vrot.slane %v948_v21, 2  ;;  %v1315_v21 = vrot.slane %v3048_v17, 2 }
  0x43   : > { %2368 = vmatprep.mubr.msk.bf16.mxu1 %vm2692_vm0, %v2691_v1 }
  0x44   : > { %v951_v29 = vor.u32 %v950_v5, %v947_v25  ;;  %v1133_v25 = vrot.slane %v2123_v22, 2  ;;  %v1134_v5 = vrot.slane %v2937_v18, 2  ;;  %v2653_v18 = vld [vmem:[%s3295_s1 + $0xe0] sm:$0xff]  }
  0x45   : > { %2397 = vmatmul.mubr.msk.bf16.gmra.mrb[20].mxu0 %vm406_vm2, %v624_v16  ;;  %v3045_v16 = vcombine.low %v1266_v61, %v3041_v12 }
  0x46   : > { %2400 = vmatprep.mubr.msk.bf16.mxu0 %vm2692_vm0, %v2691_v1  ;;  %v960_v33 = vsel %vm943_vm4, %v951_v29, %v959_v30  ;;  %v3087_v29 = vld [vmem:[%s2764_s30 + $0x20] sm:$0xff]   ;;  %v2660_v30 = vld [vmem:[%s3295_s1 + $0x110] sm:$0xff]   ;;  %v1137_v28 = vsel %vm1132_vm5, %v1134_v5, %v1136_v31 }
  0x47   : > { %v1314_v20 = vrot.slane %v3045_v16, 2 }
  0x49   : > { %v1316_v23 = vsel %vm1132_vm5, %v1314_v20, %v1315_v21 }
  0x4a   : > { %2369 = vmatmul.mubr.msk.bf16.gmra.mrb[24].mxu1 %vm406_vm2, %v2770_v6  ;;  %v2638_v6 = vld [vmem:[%s3295_s1 + $0xc0] sm:$0xff]  }
  0x4b   : > { %2372 = vmatprep.mubr.msk.bf16.mxu1 %vm2692_vm0, %v2691_v1 }
  0x4d   : > { %2401 = vmatmul.mubr.msk.bf16.gmra.mrb[24].mxu0 %vm406_vm2, %v626_v24  ;;  %v3066_v24 = vld [vmem:[%s2764_s30 + $0x18] sm:$0xff]  }
  0x4e   : > { %2440 = vmatprep.mubr.msk.bf16.mxu0 %vm2692_vm0, %v2691_v1  ;;  %v1317_v15 = vrot.slane %v3066_v24, 2  ;;  %v1479_v0 = vshrl.u32 %v3066_v24, 16  ;;  %v1482_v3 = vshll.u32 %v3066_v24, 16 }
  0x50   : > { %v1318_v27 = vsel %vm1132_vm5, %v1315_v21, %v1317_v15  ;;  %v1481_v9 = vrot.slane %v1479_v0, 2  ;;  %v1484_v10 = vrot.slane %v1482_v3, 3 }
  0x52   : > { %2373 = vmatmul.mubr.msk.bf16.gmra.mrb[28].mxu1 %vm406_vm2, %v2788_v14  ;;  %v974_v14 = vshll.u32 %v2874_v57, 16  ;;  %v1485_v61 = vor.u32 %v1484_v10, %v1481_v9 }
  0x53   : > { %2412 = vmatprep.mubr.msk.bf16.mxu1 %vm2692_vm0, %v2691_v1 }
  0x54   : > { %v976_v45 = vrot.slane %v974_v14, 2  ;;  %v2663_v14 = vld [vmem:[%s2764_s30 + $0x30] ss:$0 sps:$4 sm:$0x33]  }
  0x55   : > { %2441 = vmatmul.mubr.msk.bf16.vlgmr.msra.gmra.mrb[28].mxu0 %vm406_vm2, %v960_v33  ;;  %v1319_v33 = vrot.slane %v3087_v29, 2 }
  0x56   : > { %2489 = vmatpush3.bf16.msra.mxu0 %v2638_v6  ;;  %2444 = vmatprep.mubr.msk.bf16.mxu0 %vm2692_vm0, %v2691_v1  ;;  %v977_v49 = vor.u32 %v976_v45, %v973_v44  ;;  %v2664_v6 = vld [vmem:[%s3295_s1 + $0x118] sm:$0xff]  }
  0x57   : > { %2490 = vmatprep.subr.bf16.mxu0 %v2691_v1  ;;  %v1320_v35 = vsel %vm1132_vm5, %v1317_v15, %v1319_v33 }
  0x58   : > { %v978_v55 = vsel %vm943_vm4, %v968_v38, %v977_v49  ;;  %v987_v7 = vsel %vm943_vm4, %v977_v49, %v986_v63  ;;  %v2662_v38 = vld [vmem:[%s3295_s1 + $0xf8] sm:$0xff]   ;;  %v1470_v49 = vshrl.u32 %v3048_v17, 16 }
  0x5a   : > { %2491 = vmatpush3.bf16.msra.mxu0 %v2641_v39  ;;  %2413 = vmatmul.mubr.msk.bf16.vlgmr.msra.gmra.mrb[32].mxu1 %vm406_vm2, %v799_v41  ;;  %v1321_v39 = vrot.slane %v3116_v36, 2  ;;  %v1140_v41 = vrot.slane %v2877_v58, 2  ;;  %v1462_v58 = vshrl.u32 %v3045_v16, 16  ;;  %v1472_v56 = vrot.slane %v1470_v49, 2 }
  0x5b   : > { %2492 = vmatprep.subr.bf16.mxu0 %v2691_v1  ;;  %2461 = vmatpush3.bf16.msra.mxu1 %v2637_v42  ;;  %v1323_v42 = vrot.slane %v2663_v14, 2 }
  0x5c   : > { %2416 = vmatprep.mubr.msk.bf16.mxu1 %vm2692_vm0, %v2691_v1  ;;  %2462 = vmatprep.subr.bf16.mxu1 %v2691_v1  ;;  %v1322_v57 = vsel %vm1132_vm5, %v1319_v33, %v1321_v39  ;;  %v1141_v44 = vsel %vm1132_vm5, %v1138_v37, %v1140_v41  ;;  %v1476_v63 = vor.u32 %v1475_v59, %v1472_v56 }
  0x5d   : > { %2445 = vmatmul.mubr.msk.bf16.gmra.mrb[32].mxu0 %vm406_vm2, %v969_v43  ;;  %v1636_v43 = vld [vmem:[%s2764_s30 + $0x8] sm:$0x8]  ;;  %v1324_v45 = vsel %vm1132_vm5, %v1321_v39, %v1323_v42 }
  0x5e   : > { %2448 = vmatprep.mubr.msk.bf16.mxu0 %vm2692_vm0, %v2691_v1  ;;  %2493 = vmatpush3.bf16.msra.mxu0 %v2644_v46  ;;  %v2182_v46 = vcombine.low %v1636_v43, %v3041_v12  ;;  %v1488_v12 = vshrl.u32 %v3087_v29, 16 }
  0x5f   : > { %2494 = vmatprep.subr.bf16.mxu0 %v2691_v1  ;;  %2463 = vmatpush3.bf16.msra.mxu1 %v2640_v48  ;;  %v1465_v48 = vshll.u32 %v3045_v16, 16  ;;  %v1655_v16 = vrot.slane %v3087_v29, 3 }
  0x60   : > { %2464 = vmatprep.subr.bf16.mxu1 %v2691_v1  ;;  %v1650_v51 = vrot.slane %v2182_v46, 3  ;;  %v1490_v19 = vrot.slane %v1488_v12, 2 }
  0x62   : > { %2495 = vmatpush3.bf16.msra.mxu0 %v2649_v52  ;;  %2417 = vmatmul.mubr.msk.bf16.gmra.mrb[36].mxu1 %vm406_vm2, %v801_v53  ;;  %v1651_v52 = vrot.slane %v3048_v17, 3  ;;  %v1143_v53 = vsel %vm1132_vm5, %v1140_v41, %v1142_v47  ;;  %v1486_v17 = vsel %vm1460_vm7, %v1476_v63, %v1485_v61 }
  0x63   : > { %2544 = vmatprep.subr.bf16.mxu0 %v2691_v1  ;;  %2420 = vmatprep.mubr.msk.bf16.mxu1 %vm2692_vm0, %v2691_v1 }
  0x64   : > { %2465 = vmatpush3.bf16.msra.mxu1 %v2643_v54  ;;  %v1464_v54 = vrot.slane %v1462_v58, 2  ;;  %v1652_v60 = vsel %vm1649_vm6, %v1650_v51, %v1651_v52 }
  0x65   : > { %2449 = vmatmul.mubr.msk.bf16.gmra.mrb[36].mxu0 %vm406_vm2, %v978_v55  ;;  %2466 = vmatprep.subr.bf16.mxu1 %v2691_v1  ;;  %v1467_v55 = vrot.slane %v1465_v48, 3 }
  0x66   : > { %2452 = vmatprep.mubr.msk.bf16.mxu0 %vm2692_vm0, %v2691_v1 }
  0x68   : > { %2467 = vmatpush3.bf16.msra.mxu1 %v2646_v62  ;;  %v1468_v62 = vor.u32 %v1467_v55, %v1464_v54 }
  0x69   : > { %2516 = vmatprep.subr.bf16.mxu1 %v2691_v1 }
  0x6a   : > { %2421 = vmatmul.mubr.msk.bf16.gmra.mrb[40].mxu1 %vm406_vm2, %v803_v4  ;;  %v1653_v4 = vrot.slane %v3066_v24, 3  ;;  %v1657_v24 = vrot.slane %v3116_v36, 3 }
  0x6b   : > { %2424 = vmatprep.mubr.msk.bf16.mxu1 %vm2692_vm0, %v2691_v1 }
  0x6c   : > { %v1654_v11 = vsel %vm1649_vm6, %v1651_v52, %v1653_v4  ;;  %v1656_v21 = vsel %vm1649_vm6, %v1653_v4, %v1655_v16 }
  0x6d   : > { %2453 = vmatmul.mubr.msk.bf16.gmra.mrb[40].mxu0 %vm406_vm2, %v987_v7  ;;  %v1477_v7 = vsel %vm1460_vm7, %v1468_v62, %v1476_v63 }
  0x6e   : > { %2456 = vmatprep.mubr.msk.bf16.mxu0 %vm2692_vm0, %v2691_v1 }
  0x72   : > { %2425 = vmatmul.mubr.msk.bf16.gmra.mrb[44].mxu1 %vm406_vm2, %v2897_v2  ;;  %v2654_v2 = vld [vmem:[%s3295_s1 + $0x100] sm:$0xff]  }
  0x73   : > { %2428 = vmatprep.mubr.msk.bf16.mxu1 %vm2692_vm0, %v2691_v1 }
  0x75   : > { %2457 = vmatmul.mubr.msk.bf16.gmra.mrb[44].mxu0 %vm406_vm2, %v996_v13  ;;  %v1491_v13 = vshll.u32 %v3087_v29, 16 }
  0x76   : > { %2496 = vmatprep.mubr.msk.bf16.mxu0 %vm2692_vm0, %v2691_v1 }
  0x77   : > { %v1493_v20 = vrot.slane %v1491_v13, 3 }
  0x79   : > { %v1494_v22 = vor.u32 %v1493_v20, %v1490_v19 }
  0x7a   : > { %2429 = vmatmul.mubr.msk.bf16.gmra.mrb[48].mxu1 %vm406_vm2, %v2909_v8  ;;  %v1135_v8 = vsel %vm1132_vm5, %v1133_v25, %v1134_v5 }
  0x7b   : > { %2468 = vmatprep.mubr.msk.bf16.mxu1 %vm2692_vm0, %v2691_v1  ;;  %v1495_v25 = vsel %vm1460_vm7, %v1485_v61, %v1494_v22 }
  0x7d   : > { %2497 = vmatmul.mubr.msk.bf16.vlgmr.msra.gmra.mrb[48].mxu0 %vm406_vm2, %v1316_v23  ;;  %v1497_v23 = vshrl.u32 %v3116_v36, 16 }
  0x7e   : > { %2545 = vmatpush3.bf16.msra.mxu0 %v2654_v2  ;;  %2500 = vmatprep.mubr.msk.bf16.mxu0 %vm2692_vm0, %v2691_v1  ;;  %v1500_v2 = vshll.u32 %v3116_v36, 16 }
  0x7f   : > { %2546 = vmatprep.subr.bf16.mxu0 %v2691_v1  ;;  %v1499_v5 = vrot.slane %v1497_v23, 2 }
  0x80   : > { %v1502_v15 = vrot.slane %v1500_v2, 3 }
  0x82   : > { %2547 = vmatpush3.bf16.msra.mxu0 %v2657_v26  ;;  %2469 = vmatmul.mubr.msk.bf16.vlgmr.msra.gmra.mrb[52].mxu1 %vm406_vm2, %v1135_v8  ;;  %v2666_v26 = vld [vmem:[%s2764_s30 + $0x30] ss:$0 sps:$4 sm:$0x77]   ;;  %v1658_v8 = vsel %vm1649_vm6, %v1655_v16, %v1657_v24  ;;  %s2581_s30 = smul.u32 40, %s3304_s15 }
  0x83   : > { %2548 = vmatprep.subr.bf16.mxu0 %v2691_v1  ;;  %2517 = vmatpush3.bf16.msra.mxu1 %v2653_v18  ;;  %v1503_v18 = vor.u32 %v1502_v15, %v1499_v5  ;;  %v1509_v29 = vshll.u32 %v2666_v26, 16 }
  0x84   : > { %2472 = vmatprep.mubr.msk.bf16.mxu1 %vm2692_vm0, %v2691_v1  ;;  %2518 = vmatprep.subr.bf16.mxu1 %v2691_v1  ;;  %s3228_s8 = scalar_lea.vmem %s3297_s3, %s2581_s30  ;;  %s3245_s13 = scalar_lea.vmem %s3298_s4, %s2581_s30 }
  0x85   : > { %2501 = vmatmul.mubr.msk.bf16.gmra.mrb[52].mxu0 %vm406_vm2, %v1318_v27  ;;  %v1506_v27 = vshrl.u32 %v2666_v26, 16  ;;  %v1504_v31 = vsel %vm1460_vm7, %v1494_v22, %v1503_v18  ;;  %v1511_v33 = vrot.slane %v1509_v29, 3 }
  0x86   : > { %2504 = vmatprep.mubr.msk.bf16.mxu0 %vm2692_vm0, %v2691_v1  ;;  %2549 = vmatpush3.bf16.msra.mxu0 %v2660_v30  ;;  %v1659_v30 = vrot.slane %v2666_v26, 3 }
  0x87   : > { %2550 = vmatprep.subr.bf16.mxu0 %v2691_v1  ;;  %2519 = vmatpush3.bf16.msra.mxu1 %v2656_v32  ;;  %v1508_v32 = vrot.slane %v1506_v27, 2 }
  0x88   : > { %2520 = vmatprep.subr.bf16.mxu1 %v2691_v1 }
  0x8a   : > { %2551 = vmatpush3.bf16.msra.mxu0 %v2664_v6  ;;  %2473 = vmatmul.mubr.msk.bf16.gmra.mrb[56].mxu1 %vm406_vm2, %v1137_v28  ;;  %v1660_v6 = vsel %vm1649_vm6, %v1657_v24, %v1659_v30  ;;  %v1512_v28 = vor.u32 %v1511_v33, %v1508_v32 }
  0x8b   : > { %2476 = vmatprep.mubr.msk.bf16.mxu1 %vm2692_vm0, %v2691_v1  ;;  %2521 = vmatpush3.bf16.msra.mxu1 %v2659_v34 }
  0x8c   : > { %2522 = vmatprep.subr.bf16.mxu1 %v2691_v1  ;;  %v1513_v34 = vsel %vm1460_vm7, %v1503_v18, %v1512_v28 }
  0x8d   : > { %2505 = vmatmul.mubr.msk.bf16.gmra.mrb[56].mxu0 %vm406_vm2, %v1320_v35 }
  0x8e   : > { %2508 = vmatprep.mubr.msk.bf16.mxu0 %vm2692_vm0, %v2691_v1 }
  0x8f   : > { %2523 = vmatpush3.bf16.msra.mxu1 %v2662_v38 }
  0x92   : > { %2477 = vmatmul.mubr.msk.bf16.gmra.mrb[60].mxu1 %vm406_vm2, %v1139_v40 }
  0x93   : > { %2480 = vmatprep.mubr.msk.bf16.mxu1 %vm2692_vm0, %v2691_v1 }
  0x95   : > { %2509 = vmatmul.mubr.msk.bf16.gmra.mrb[60].mxu0 %vm406_vm2, %v1322_v57 }
  0x96   : > { %2512 = vmatprep.mubr.msk.bf16.mxu0 %vm2692_vm0, %v2691_v1 }
  0x9a   : > { %2481 = vmatmul.mubr.msk.bf16.gmra.mrb[64].mxu1 %vm406_vm2, %v1141_v44 }
  0x9b   : > { %2484 = vmatprep.mubr.msk.bf16.mxu1 %vm2692_vm0, %v2691_v1 }
  0x9d   : > { %2513 = vmatmul.mubr.msk.bf16.gmra.mrb[64].mxu0 %vm406_vm2, %v1324_v45 }
  0x9e   : > { %2552 = vmatprep.mubr.msk.bf16.mxu0 %vm2692_vm0, %v2691_v1 }
  0xa2   : > { %2485 = vmatmul.mubr.msk.bf16.gmra.mrb[68].mxu1 %vm406_vm2, %v1143_v53 }
  0xa3   : > { %2524 = vmatprep.mubr.msk.bf16.mxu1 %vm2692_vm0, %v2691_v1 }
  0xa5   : > { %2553 = vmatmul.mubr.msk.bf16.vlgmr.msra.gmra.mrb[68].mxu0 %vm406_vm2, %v1652_v60 }
  0xa6   : > { %2556 = vmatprep.mubr.msk.bf16.mxu0 %vm2692_vm0, %v2691_v1 }
  0xaa   : > { %2525 = vmatmul.mubr.msk.bf16.vlgmr.msra.gmra.mrb[72].mxu1 %vm406_vm2, %v1477_v7 }
  0xab   : > { %2528 = vmatprep.mubr.msk.bf16.mxu1 %vm2692_vm0, %v2691_v1 }
  0xad   : > { %2557 = vmatmul.mubr.msk.bf16.gmra.mrb[72].mxu0 %vm406_vm2, %v1654_v11 }
  0xae   : > { %2560 = vmatprep.mubr.msk.bf16.mxu0 %vm2692_vm0, %v2691_v1 }
  0xb2   : > { %2529 = vmatmul.mubr.msk.bf16.gmra.mrb[76].mxu1 %vm406_vm2, %v1486_v17 }
  0xb3   : > { %2532 = vmatprep.mubr.msk.bf16.mxu1 %vm2692_vm0, %v2691_v1 }
  0xb5   : > { %2561 = vmatmul.mubr.msk.bf16.gmra.mrb[76].mxu0 %vm406_vm2, %v1656_v21 }
  0xb6   : > { %2564 = vmatprep.mubr.msk.bf16.mxu0 %vm2692_vm0, %v2691_v1 }
  0xba   : > { %2533 = vmatmul.mubr.msk.bf16.gmra.mrb[80].mxu1 %vm406_vm2, %v1495_v25 }
  0xbb   : > { %2536 = vmatprep.mubr.msk.bf16.mxu1 %vm2692_vm0, %v2691_v1 }
  0xbd   : > { %2565 = vmatmul.mubr.msk.bf16.gmra.mrb[80].mxu0 %vm406_vm2, %v1658_v8 }
  0xbe   : > { %2568 = vmatprep.mubr.msk.bf16.mxu0 %vm2692_vm0, %v2691_v1 }
  0xc2   : > { %2537 = vmatmul.mubr.msk.bf16.gmra.mrb[84].mxu1 %vm406_vm2, %v1504_v31 }
  0xc3   : > { %2540 = vmatprep.mubr.msk.bf16.mxu1 %vm2692_vm0, %v2691_v1 }
  0xc5   : > { %2569 = vmatmul.mubr.msk.bf16.gmra.mrb[84].mxu0 %vm406_vm2, %v1660_v6 }
  0xca   : > { %2541 = vmatmul.mubr.msk.bf16.gmra.mrb[88].mxu1 %vm406_vm2, %v1513_v34 }
  0xed   : > { %v472_v35 = vpop.f32.mrb[0].mxu1 }
  0xee   : > { %v2338_v36 = vpop.f32.mrb[1].mxu1 }
  0xef   : > { %v475_v37 = vpop.f32.mrb[2].mxu1 }
  0xf0   : > { %v456_v38 = vpop.f32.mrb[0].mxu0  ;;  %v2339_v39 = vpop.f32.mrb[3].mxu1 }
  0xf1   : > { %v2330_v40 = vpop.f32.mrb[1].mxu0 }
  0xf2   : > { %v459_v57 = vpop.f32.mrb[2].mxu0 }
  0xf3   : > { %v2331_v14 = vpop.f32.mrb[3].mxu0 }
  0xf5   : > { %v480_v41 = vpop.f32.mrb[4].mxu1 }
  0xf6   : > { %v2342_v42 = vpop.f32.mrb[5].mxu1 }
  0xf7   : > { %v483_v43 = vpop.f32.mrb[6].mxu1 }
  0xf8   : > { %v464_v44 = vpop.f32.mrb[4].mxu0  ;;  %v2343_v1 = vpop.f32.mrb[7].mxu1 }
  0xf9   : > { %v2334_v45 = vpop.f32.mrb[5].mxu0 }
  0xfa   : > { %v467_v46 = vpop.f32.mrb[6].mxu0 }
  0xfb   : > { %v2335_v47 = vpop.f32.mrb[7].mxu0 }
  0xfd   : > { %v488_v58 = vpop.f32.mrb[8].mxu1 }
  0xfe   : > { %v2346_v48 = vpop.f32.mrb[9].mxu1 }
  0xff   : > { %v491_v49 = vpop.f32.mrb[10].mxu1 }
 0x100   : > { %v700_v50 = vpop.f32.mrb[8].mxu0  ;;  %v2347_v51 = vpop.f32.mrb[11].mxu1 }
 0x101   : > { %v2386_v52 = vpop.f32.mrb[9].mxu0 }
 0x102   : > { %v703_v53 = vpop.f32.mrb[10].mxu0 }
 0x103   : > { %v2387_v54 = vpop.f32.mrb[11].mxu0 }
 0x105   : > { %v563_v55 = vpop.f32.mrb[12].mxu1 }
 0x106   : > { %v564_v56 = vadd.f32 %v563_v55, %v456_v38  ;;  %v2358_v59 = vpop.f32.mrb[13].mxu1 }
 0x107   : > { %v566_v60 = vpop.f32.mrb[14].mxu1 }
 0x108   : > { %v708_v62 = vpop.f32.mrb[12].mxu0  ;;  %v739_v63 = vadd.f32 %v700_v50, %v564_v56  ;;  %v567_v0 = vadd.f32 %v566_v60, %v459_v57  ;;  %v2359_v3 = vpop.f32.mrb[15].mxu1 }
 0x109   : > { %v2390_v4 = vpop.f32.mrb[13].mxu0 }
 0x10a   : > { %v711_v7 = vpop.f32.mrb[14].mxu0  ;;  %v740_v9 = vadd.f32 %v703_v53, %v567_v0 }
 0x10b   : > { %v2391_v10 = vpop.f32.mrb[15].mxu0 }
 0x10d   : > { %v571_v11 = vpop.f32.mrb[16].mxu1 }
 0x10e   : > { %v572_v61 = vadd.f32 %v571_v11, %v464_v44  ;;  %v2362_v12 = vpop.f32.mrb[17].mxu1 }
 0x10f   : > { %v574_v13 = vpop.f32.mrb[18].mxu1 }
 0x110   : > { %v716_v16 = vpop.f32.mrb[16].mxu0  ;;  %v741_v17 = vadd.f32 %v708_v62, %v572_v61  ;;  %v575_v19 = vadd.f32 %v574_v13, %v467_v46  ;;  %v2363_v20 = vpop.f32.mrb[19].mxu1 }
 0x111   : > { %v2394_v21 = vpop.f32.mrb[17].mxu0 }
 0x112   : > { %v719_v22 = vpop.f32.mrb[18].mxu0  ;;  %v742_v23 = vadd.f32 %v711_v7, %v575_v19 }
 0x113   : > { %v2395_v2 = vpop.f32.mrb[19].mxu0 }
 0x115   : > { %v579_v24 = vpop.f32.mrb[20].mxu1 }
 0x116   : > { %v580_v25 = vadd.f32 %v579_v24, %v472_v35  ;;  %v2366_v5 = vpop.f32.mrb[21].mxu1 }
 0x117   : > { %v582_v15 = vpop.f32.mrb[22].mxu1 }
 0x118   : > { %v724_v26 = vpop.f32.mrb[20].mxu0  ;;  %v743_v8 = vadd.f32 %v716_v16, %v580_v25  ;;  %v583_v18 = vadd.f32 %v582_v15, %v475_v37  ;;  %v2367_v27 = vpop.f32.mrb[23].mxu1 }
 0x119   : > { %v2398_v29 = vpop.f32.mrb[21].mxu0 }
 0x11a   : > { %v727_v30 = vpop.f32.mrb[22].mxu0  ;;  %v744_v31 = vadd.f32 %v719_v22, %v583_v18 }
 0x11b   : > { %v2399_v32 = vpop.f32.mrb[23].mxu0 }
 0x11d   : > { %v587_v33 = vpop.f32.mrb[24].mxu1 }
 0x11e   : > { %v588_v6 = vadd.f32 %v587_v33, %v480_v41  ;;  %v2370_v28 = vpop.f32.mrb[25].mxu1 }
 0x11f   : > { %v590_v34 = vpop.f32.mrb[26].mxu1 }
 0x120   : > { %v732_v36 = vpop.f32.mrb[24].mxu0  ;;  %v745_v38 = vadd.f32 %v724_v26, %v588_v6  ;;  %v591_v39 = vadd.f32 %v590_v34, %v483_v43  ;;  %v2371_v40 = vpop.f32.mrb[27].mxu1 }
 0x121   : > { %v2402_v57 = vpop.f32.mrb[25].mxu0 }
 0x122   : > { %v735_v35 = vpop.f32.mrb[26].mxu0  ;;  %v746_v14 = vadd.f32 %v727_v30, %v591_v39 }
 0x123   : > { %v2403_v42 = vpop.f32.mrb[27].mxu0 }
 0x125   : > { %v595_v44 = vpop.f32.mrb[28].mxu1 }
 0x126   : > { %v596_v1 = vadd.f32 %v595_v44, %v488_v58  ;;  %v2374_v37 = vpop.f32.mrb[29].mxu1 }
 0x127   : > { %v598_v45 = vpop.f32.mrb[30].mxu1 }
 0x128   : > { %v1070_v46 = vpop.f32.mrb[28].mxu0  ;;  %v747_v47 = vadd.f32 %v732_v36, %v596_v1  ;;  %v599_v48 = vadd.f32 %v598_v45, %v491_v49  ;;  %v2375_v50 = vpop.f32.mrb[31].mxu1 }
 0x129   : > { %v2442_v51 = vpop.f32.mrb[29].mxu0 }
 0x12a   : > { %v1073_v41 = vpop.f32.mrb[30].mxu0  ;;  %v748_v52 = vadd.f32 %v735_v35, %v599_v48 }
 0x12b   : > { %v2443_v53 = vpop.f32.mrb[31].mxu0 }
 0x12d   : > { %v881_v54 = vpop.f32.mrb[32].mxu1 }
 0x12e   : > { %v920_v55 = vadd.f32 %v881_v54, %v739_v63  ;;  %v2414_v43 = vpop.f32.mrb[33].mxu1 }
 0x12f   : > { %v884_v56 = vpop.f32.mrb[34].mxu1 }
 0x130   : > { %v1078_v59 = vpop.f32.mrb[32].mxu0  ;;  %v1109_v60 = vadd.f32 %v1070_v46, %v920_v55  ;;  %v921_v62 = vadd.f32 %v884_v56, %v740_v9  ;;  %v2415_v0 = vpop.f32.mrb[35].mxu1 }
 0x131   : > { %v2446_v3 = vpop.f32.mrb[33].mxu0 }
 0x132   : > { %v1081_v58 = vpop.f32.mrb[34].mxu0  ;;  %v1110_v4 = vadd.f32 %v1073_v41, %v921_v62 }
 0x133   : > { %v2447_v7 = vpop.f32.mrb[35].mxu0 }
 0x135   : > { %v889_v10 = vpop.f32.mrb[36].mxu1 }
 0x136   : > { %v922_v11 = vadd.f32 %v889_v10, %v741_v17  ;;  %v2418_v49 = vpop.f32.mrb[37].mxu1 }
 0x137   : > { %v892_v61 = vpop.f32.mrb[38].mxu1 }
 0x138   : > { %v1086_v12 = vpop.f32.mrb[36].mxu0  ;;  %v1111_v13 = vadd.f32 %v1078_v59, %v922_v11  ;;  %v923_v16 = vadd.f32 %v892_v61, %v742_v23  ;;  %v2419_v19 = vpop.f32.mrb[39].mxu1 }
 0x139   : > { %v2450_v20 = vpop.f32.mrb[37].mxu0 }
 0x13a   : > { %v1089_v63 = vpop.f32.mrb[38].mxu0  ;;  %v1112_v21 = vadd.f32 %v1081_v58, %v923_v16 }
 0x13b   : > { %v2451_v22 = vpop.f32.mrb[39].mxu0 }
 0x13d   : > { %v897_v2 = vpop.f32.mrb[40].mxu1 }
 0x13e   : > { %v924_v24 = vadd.f32 %v897_v2, %v743_v8  ;;  %v2422_v9 = vpop.f32.mrb[41].mxu1 }
 0x13f   : > { %v900_v25 = vpop.f32.mrb[42].mxu1 }
 0x140   : > { %v1094_v5 = vpop.f32.mrb[40].mxu0  ;;  %v1113_v15 = vadd.f32 %v1086_v12, %v924_v24  ;;  %v925_v26 = vadd.f32 %v900_v25, %v744_v31  ;;  %v2423_v18 = vpop.f32.mrb[43].mxu1 }
 0x141   : > { %v2454_v27 = vpop.f32.mrb[41].mxu0 }
 0x142   : > { %v1097_v17 = vpop.f32.mrb[42].mxu0  ;;  %v1114_v29 = vadd.f32 %v1089_v63, %v925_v26 }
 0x143   : > { %v2455_v30 = vpop.f32.mrb[43].mxu0 }
 0x145   : > { %v905_v32 = vpop.f32.mrb[44].mxu1 }
 0x146   : > { %v926_v33 = vadd.f32 %v905_v32, %v745_v38  ;;  %v2426_v23 = vpop.f32.mrb[45].mxu1 }
 0x147   : > { %v908_v6 = vpop.f32.mrb[46].mxu1 }
 0x148   : > { %v1102_v28 = vpop.f32.mrb[44].mxu0  ;;  %v1115_v34 = vadd.f32 %v1094_v5, %v926_v33  ;;  %v927_v36 = vadd.f32 %v908_v6, %v746_v14  ;;  %v2427_v39 = vpop.f32.mrb[47].mxu1 }
 0x149   : > { %v2458_v40 = vpop.f32.mrb[45].mxu0 }
 0x14a   : > { %v1105_v8 = vpop.f32.mrb[46].mxu0  ;;  %v1116_v57 = vadd.f32 %v1097_v17, %v927_v36 }
 0x14b   : > { %v2459_v35 = vpop.f32.mrb[47].mxu0 }
 0x14d   : > { %v913_v42 = vpop.f32.mrb[48].mxu1 }
 0x14e   : > { %v928_v44 = vadd.f32 %v913_v42, %v747_v47  ;;  %v2430_v31 = vpop.f32.mrb[49].mxu1 }
 0x14f   : > { %v916_v1 = vpop.f32.mrb[50].mxu1 }
 0x150   : > { %v1398_v37 = vpop.f32.mrb[48].mxu0  ;;  %v1117_v45 = vadd.f32 %v1102_v28, %v928_v44  ;;  %v929_v46 = vadd.f32 %v916_v1, %v748_v52  ;;  %v2431_v48 = vpop.f32.mrb[51].mxu1 }
 0x151   : > { %v2498_v50 = vpop.f32.mrb[49].mxu0 }
 0x152   : > { %v1401_v38 = vpop.f32.mrb[50].mxu0  ;;  %v1118_v51 = vadd.f32 %v1105_v8, %v929_v46 }
 0x153   : > { %v2499_v41 = vpop.f32.mrb[51].mxu0 }
 0x155   : > { %v1217_v53 = vpop.f32.mrb[52].mxu1 }
 0x156   : > { %v1256_v54 = vadd.f32 %v1217_v53, %v1109_v60  ;;  %v2470_v14 = vpop.f32.mrb[53].mxu1 }
 0x157   : > { %v1220_v55 = vpop.f32.mrb[54].mxu1 }
 0x158   : > { %v1406_v43 = vpop.f32.mrb[52].mxu0  ;;  %v1437_v56 = vadd.f32 %v1398_v37, %v1256_v54  ;;  %v1257_v59 = vadd.f32 %v1220_v55, %v1110_v4  ;;  %v2471_v62 = vpop.f32.mrb[55].mxu1 }
 0x159   : > { %v2502_v0 = vpop.f32.mrb[53].mxu0 }
 0x15a   : > { %v1409_v47 = vpop.f32.mrb[54].mxu0  ;;  %v1438_v3 = vadd.f32 %v1401_v38, %v1257_v59  ;;  %v2216_v38 = vld [vmem:[%s3228_s8] sm:$0xff]  }
 0x15b   : > { %v2503_v58 = vpop.f32.mrb[55].mxu0 }
 0x15d   : > { %v1225_v7 = vpop.f32.mrb[56].mxu1 }
 0x15e   : > { %v1258_v10 = vadd.f32 %v1225_v7, %v1111_v13  ;;  %v2474_v52 = vpop.f32.mrb[57].mxu1 }
 0x15f   : > { %v1228_v11 = vpop.f32.mrb[58].mxu1 }
 0x160   : > { %v1414_v49 = vpop.f32.mrb[56].mxu0  ;;  %v3206_v61 = vadd.f32 %v1406_v43, %v1258_v10  ;;  %v1259_v12 = vadd.f32 %v1228_v11, %v1112_v21  ;;  %v2475_v16 = vpop.f32.mrb[59].mxu1  ;;  %v2217_v43 = vunpack.c.l.bf16 %v2216_v38 }
 0x161   : > { %v2506_v60 = vpop.f32.mrb[57].mxu0 }
 0x162   : > { %v1417_v19 = vpop.f32.mrb[58].mxu0  ;;  %v3208_v20 = vadd.f32 %v1409_v47, %v1259_v12 }
 0x163   : > { %v2507_v63 = vpop.f32.mrb[59].mxu0 }
 0x165   : > { %v1233_v4 = vpop.f32.mrb[60].mxu1 }
 0x166   : > { %v1260_v22 = vadd.f32 %v1233_v4, %v1113_v15  ;;  %v2478_v2 = vpop.f32.mrb[61].mxu1 }
 0x167   : > { %v1236_v24 = vpop.f32.mrb[62].mxu1 }
 0x168   : > { %v1422_v9 = vpop.f32.mrb[60].mxu0  ;;  %v3210_v25 = vadd.f32 %v1414_v49, %v1260_v22  ;;  %v1261_v13 = vadd.f32 %v1236_v24, %v1114_v29  ;;  %v2479_v5 = vpop.f32.mrb[63].mxu1  ;;  %v2235_v49 = vld [vmem:[%s3228_s8 + $0x8] sm:$0xff]  }
 0x169   : > { %v2510_v26 = vpop.f32.mrb[61].mxu0 }
 0x16a   : > { %v1425_v18 = vpop.f32.mrb[62].mxu0  ;;  %v3212_v27 = vadd.f32 %v1417_v19, %v1261_v13 }
 0x16b   : > { %v2511_v21 = vpop.f32.mrb[63].mxu0 }
 0x16d   : > { %v1241_v17 = vpop.f32.mrb[64].mxu1 }
 0x16e   : > { %v1262_v30 = vadd.f32 %v1241_v17, %v1115_v34  ;;  %v2482_v32 = vpop.f32.mrb[65].mxu1 }
 0x16f   : > { %v1244_v33 = vpop.f32.mrb[66].mxu1 }
 0x170   : > { %v1430_v23 = vpop.f32.mrb[64].mxu0  ;;  %v3214_v6 = vadd.f32 %v1422_v9, %v1262_v30  ;;  %v1263_v15 = vadd.f32 %v1244_v33, %v1116_v57  ;;  %v2483_v28 = vpop.f32.mrb[67].mxu1  ;;  %v2222_v30 = vunpack.c.h.bf16 %v2235_v49 }
 0x171   : > { %v2514_v36 = vpop.f32.mrb[65].mxu0 }
 0x172   : > { %v1433_v39 = vpop.f32.mrb[66].mxu0  ;;  %v3216_v29 = vadd.f32 %v1425_v18, %v1263_v15  ;;  %v2236_v15 = vld [vmem:[%s3228_s8 + $0x10] sm:$0xff]  }
 0x173   : > { %v2515_v40 = vpop.f32.mrb[67].mxu0 }
 0x175   : > { %v1249_v8 = vpop.f32.mrb[68].mxu1 }
 0x176   : > { %v1264_v35 = vadd.f32 %v1249_v8, %v1117_v45  ;;  %v2486_v42 = vpop.f32.mrb[69].mxu1  ;;  %v2225_v8 = vunpack.c.l.bf16 %v2236_v15 }
 0x177   : > { %v1252_v44 = vpop.f32.mrb[70].mxu1 }
 0x178   : > { %v1734_v31 = vpop.f32.mrb[68].mxu0  ;;  %v3219_v34 = vadd.f32 %v1430_v23, %v1264_v35  ;;  %v1265_v1 = vadd.f32 %v1252_v44, %v1118_v51  ;;  %v2487_v37 = vpop.f32.mrb[71].mxu1  ;;  %v3234_v51 = vld [vmem:[%s3296_s2] ss:$0 sm:$0xff] }
 0x179   : > { %v2554_v46 = vpop.f32.mrb[69].mxu0 }
 0x17a   : > { %v1737_v48 = vpop.f32.mrb[70].mxu0  ;;  %v3221_v57 = vadd.f32 %v1433_v39, %v1265_v1 }
 0x17b   : > { %v2555_v45 = vpop.f32.mrb[71].mxu0 }
 0x17d   : > { %v1587_v50 = vpop.f32.mrb[72].mxu1 }
 0x17e   : > { %v1626_v41 = vadd.f32 %v1587_v50, %v1437_v56  ;;  %v2526_v53 = vpop.f32.mrb[73].mxu1  ;;  %v2218_v56 = vunpack.c.h.bf16 %v2216_v38 }
 0x17f   : > { %v1590_v54 = vpop.f32.mrb[74].mxu1 }
 0x180   : > { %v1742_v14 = vpop.f32.mrb[72].mxu0  ;;  %v1773_v55 = vadd.f32 %v1734_v31, %v1626_v41  ;;  %v1627_v59 = vadd.f32 %v1590_v54, %v1438_v3  ;;  %v2527_v62 = vpop.f32.mrb[75].mxu1  ;;  %v2221_v3 = vunpack.c.l.bf16 %v2235_v49  ;;  %v2226_v41 = vunpack.c.h.bf16 %v2236_v15 }
 0x181   : > { %v2558_v0 = vpop.f32.mrb[73].mxu0 }
 0x182   : > { %v1745_v47 = vpop.f32.mrb[74].mxu0  ;;  %v1790_v58 = vadd.f32 %v3234_v51, %v1773_v55  ;;  %v1774_v7 = vadd.f32 %v1737_v48, %v1627_v59  ;;  %v2237_v55 = vld [vmem:[%s3228_s8 + $0x18] sm:$0xff]  }
 0x183   : > { %v2559_v10 = vpop.f32.mrb[75].mxu0 }
 0x184   : > { %v1820_v52 = vadd.f32 %v2217_v43, %v1790_v58  ;;  %v1791_v11 = vadd.f32 %v3234_v51, %v1774_v7 }
 0x185   : > { %v1595_v12 = vpop.f32.mrb[76].mxu1 }
 0x186   : > { %v1830_v16 = vmax.f32 %v1820_v52, 0.0  ;;  %v1821_v60 = vadd.f32 %v2218_v56, %v1791_v11  ;;  %v1628_v19 = vadd.f32 %v1595_v12, %v3206_v61  ;;  %v2530_v63 = vpop.f32.mrb[77].mxu1 }
 0x187   : > { %v1598_v4 = vpop.f32.mrb[78].mxu1  ;;  %v2230_v63 = vunpack.c.h.bf16 %v2237_v55 }
 0x188   : > { %v1750_v22 = vpop.f32.mrb[76].mxu0  ;;  %v2205_v2 = vpack.c.bf16 %v1830_v16, %v1830_v16  ;;  %v1831_v24 = vmax.f32 %v1821_v60, 0.0  ;;  %v1775_v9 = vadd.f32 %v1742_v14, %v1628_v19  ;;  %v1629_v13 = vadd.f32 %v1598_v4, %v3208_v20  ;;  %v2531_v61 = vpop.f32.mrb[79].mxu1 }
 0x189   : > { %v2562_v5 = vpop.f32.mrb[77].mxu0 }
 0x18a   : > { %v1753_v26 = vpop.f32.mrb[78].mxu0  ;;  %1881 = vst.msk [vmem:[%s3245_s13] sm:$0xf] %vm1880_vm8, %v2205_v2  ;;  %v2206_v18 = vpack.c.bf16 %v1831_v24, %v1831_v24  ;;  %v1792_v21 = vadd.f32 %v3234_v51, %v1775_v9  ;;  %v1776_v17 = vadd.f32 %v1745_v47, %v1629_v13  ;;  %v2229_v47 = vunpack.c.l.bf16 %v2237_v55  ;;  %v2238_v2 = vld [vmem:[%s3228_s8 + $0x20] sm:$0xff]  }
 0x18b   : > { %v2563_v32 = vpop.f32.mrb[79].mxu0  ;;  %v2233_v5 = vunpack.c.l.bf16 %v2238_v2 }
 0x18c   : > { %1882 = vst.msk [vmem:[%s3245_s13 + $0x4] sm:$0xf] %vm1880_vm8, %v2206_v18  ;;  %v1822_v33 = vadd.f32 %v2221_v3, %v1792_v21  ;;  %v1793_v23 = vadd.f32 %v3234_v51, %v1776_v17 }
 0x18d   : > { %v1603_v28 = vpop.f32.mrb[80].mxu1 }
 0x18e   : > { %v1832_v20 = vmax.f32 %v1822_v33, 0.0  ;;  %v1823_v36 = vadd.f32 %v2222_v30, %v1793_v23  ;;  %v1630_v39 = vadd.f32 %v1603_v28, %v3210_v25  ;;  %v2534_v40 = vpop.f32.mrb[81].mxu1  ;;  %v2234_v28 = vunpack.c.h.bf16 %v2238_v2 }
 0x18f   : > { %v1606_v35 = vpop.f32.mrb[82].mxu1 }
 0x190   : > { %v1758_v42 = vpop.f32.mrb[80].mxu0  ;;  %v2207_v44 = vpack.c.bf16 %v1832_v20, %v1832_v20  ;;  %v1833_v31 = vmax.f32 %v1823_v36, 0.0  ;;  %v1777_v1 = vadd.f32 %v1750_v22, %v1630_v39  ;;  %v1631_v37 = vadd.f32 %v1606_v35, %v3212_v27  ;;  %v2535_v46 = vpop.f32.mrb[83].mxu1 }
 0x191   : > { %v2566_v48 = vpop.f32.mrb[81].mxu0 }
 0x192   : > { %v1761_v45 = vpop.f32.mrb[82].mxu0  ;;  %1883 = vst.msk [vmem:[%s3245_s13 + $0x8] sm:$0xf] %vm1880_vm8, %v2207_v44  ;;  %v2208_v50 = vpack.c.bf16 %v1833_v31, %v1833_v31  ;;  %v1794_v38 = vadd.f32 %v3234_v51, %v1777_v1  ;;  %v1778_v25 = vadd.f32 %v1753_v26, %v1631_v37 }
 0x193   : > { %v2567_v53 = vpop.f32.mrb[83].mxu0 }
 0x194   : > { %1884 = vst.msk [vmem:[%s3245_s13 + $0xc] sm:$0xf] %vm1880_vm8, %v2208_v50  ;;  %v1824_v54 = vadd.f32 %v2225_v8, %v1794_v38  ;;  %v1795_v14 = vadd.f32 %v3234_v51, %v1778_v25 }
 0x195   : > { %v1611_v43 = vpop.f32.mrb[84].mxu1 }
 0x196   : > { %v1834_v27 = vmax.f32 %v1824_v54, 0.0  ;;  %v1825_v59 = vadd.f32 %v2226_v41, %v1795_v14  ;;  %v1632_v62 = vadd.f32 %v1611_v43, %v3214_v6  ;;  %v2538_v0 = vpop.f32.mrb[85].mxu1 }
 0x197   : > { %v1614_v58 = vpop.f32.mrb[86].mxu1 }
 0x198   : > { %v1766_v7 = vpop.f32.mrb[84].mxu0  ;;  %v2209_v56 = vpack.c.bf16 %v1834_v27, %v1834_v27  ;;  %v1835_v10 = vmax.f32 %v1825_v59, 0.0  ;;  %v1779_v52 = vadd.f32 %v1758_v42, %v1632_v62  ;;  %v1633_v11 = vadd.f32 %v1614_v58, %v3216_v29  ;;  %v2539_v49 = vpop.f32.mrb[87].mxu1 }
 0x199   : > { %v2570_v12 = vpop.f32.mrb[85].mxu0 }
 0x19a   : > { %v1769_v16 = vpop.f32.mrb[86].mxu0  ;;  %1885 = vst.msk [vmem:[%s3245_s13 + $0x10] sm:$0xf] %vm1880_vm8, %v2209_v56  ;;  %v2210_v60 = vpack.c.bf16 %v1835_v10, %v1835_v10  ;;  %v1796_v19 = vadd.f32 %v3234_v51, %v1779_v52  ;;  %v1780_v6 = vadd.f32 %v1761_v45, %v1633_v11 }
 0x19b   : > { %v2571_v3 = vpop.f32.mrb[87].mxu0 }
 0x19c   : > { %1886 = vst.msk [vmem:[%s3245_s13 + $0x14] sm:$0xf] %vm1880_vm8, %v2210_v60  ;;  %v1826_v4 = vadd.f32 %v2229_v47, %v1796_v19  ;;  %v1797_v22 = vadd.f32 %v3234_v51, %v1780_v6 }
 0x19d   : > { %v1619_v24 = vpop.f32.mrb[88].mxu1 }
 0x19e   : > { %v1836_v29 = vmax.f32 %v1826_v4, 0.0  ;;  %v1827_v9 = vadd.f32 %v2230_v63, %v1797_v22  ;;  %v1634_v13 = vadd.f32 %v1619_v24, %v3219_v34  ;;  %v2542_v61 = vpop.f32.mrb[89].mxu1 }
 0x19f   : > { %v1622_v26 = vpop.f32.mrb[90].mxu1 }
 0x1a0   : > { %v2211_v18 = vpack.c.bf16 %v1836_v29, %v1836_v29  ;;  %v1837_v21 = vmax.f32 %v1827_v9, 0.0  ;;  %v1781_v17 = vadd.f32 %v1766_v7, %v1634_v13  ;;  %v1635_v30 = vadd.f32 %v1622_v26, %v3221_v57  ;;  %v2543_v32 = vpop.f32.mrb[91].mxu1 }
 0x1a2   : > { %1887 = vst.msk [vmem:[%s3245_s13 + $0x18] sm:$0xf] %vm1880_vm8, %v2211_v18  ;;  %v2212_v33 = vpack.c.bf16 %v1837_v21, %v1837_v21  ;;  %v1798_v23 = vadd.f32 %v3234_v51, %v1781_v17  ;;  %v1782_v15 = vadd.f32 %v1769_v16, %v1635_v30 }
 0x1a4   : > { %1888 = vst.msk [vmem:[%s3245_s13 + $0x1c] sm:$0xf] %vm1880_vm8, %v2212_v33  ;;  %v1828_v34 = vadd.f32 %v2233_v5, %v1798_v23  ;;  %v1799_v20 = vadd.f32 %v3234_v51, %v1782_v15 }
 0x1a6   : > { %v1838_v36 = vmax.f32 %v1828_v34, 0.0  ;;  %v1829_v39 = vadd.f32 %v2234_v28, %v1799_v20 }
 0x1a8   : > { %v2213_v40 = vpack.c.bf16 %v1838_v36, %v1838_v36  ;;  %v1839_v8 = vmax.f32 %v1829_v39, 0.0 }
 0x1aa   : > { %1889 = vst.msk [vmem:[%s3245_s13 + $0x20] sm:$0xf] %vm1880_vm8, %v2213_v40  ;;  %v2214_v57 = vpack.c.bf16 %v1839_v8, %v1839_v8 }
 0x1ac   : > { %1890 = vst.msk [vmem:[%s3245_s13 + $0x24] sm:$0xf] %vm1880_vm8, %v2214_v57 }
 0x1ad PF: > { %s14_s17 = sadd.s32 1, %s2689_s17   ;;  %s3299_s15 = smov %s2685_s16 }
 0x1ae   : > { %p11_p5 = scmp.ge.s32.totalorder %s14_s17, 4   ;;  %s3300_s16 = smov %s3302_s18 }
 0x1b0   :  { %13 = sbr.rel (!%p11_p5) target bundleno = 2 (0x2), region = 83 }

// kernel: resnet_forward.13
= control target key start
LH: loop header
LB: loop body
LE: loop exit
PB: predicated region body
PF: predicated region fallthrough
CT: control target
= control target key end

     0   :  { %vm372_vm0 = vcmask 523264   ;;  %s913_s1 = inlined_call_operand.vmem [shape: bf16[576,128], index: 1, kind: input, shape index: {}]   ;;  %s914_s0 = inlined_call_operand.vmem [shape: bf16[32,576], index: 0, kind: input, shape index: {}]   ;;  %s915_s2 = inlined_call_operand.vmem [shape: f32[1,128], index: 2, kind: input, shape index: {}]   ;;  %s916_s3 = inlined_call_operand.vmem [shape: bf16[32,128], index: 3, kind: output, shape index: {}]  }
   0x1   :  { %v696_v0 = vld [vmem:[%s913_s1 + $0x40] sm:$0xff]   ;;  %v700_v4 = vld [vmem:[%s913_s1 + $0x48] sm:$0xff]   ;;  %v704_v8 = vld [vmem:[%s913_s1 + $0x50] sm:$0xff]  }
   0x2   :  { %v697_v1 = vld [vmem:[%s913_s1] sm:$0xff]   ;;  %622 = vmatprep.subr.bf16.mxu0 %v696_v0  ;;  %v701_v5 = vld [vmem:[%s913_s1 + $0x8] sm:$0xff]   ;;  %v705_v9 = vld [vmem:[%s913_s1 + $0x10] sm:$0xff]  }
   0x3   :  { %v698_v2 = vld [vmem:[%s913_s1 + $0xc0] sm:$0xff]   ;;  %623 = vmatpush3.bf16.msra.mxu0 %v697_v1  ;;  %v702_v6 = vld [vmem:[%s913_s1 + $0xc8] sm:$0xff]   ;;  %v706_v10 = vld [vmem:[%s913_s1 + $0xd0] sm:$0xff]  }
   0x4   :  { %v699_v3 = vld [vmem:[%s913_s1 + $0x80] sm:$0xff]   ;;  %650 = vmatprep.subr.bf16.mxu1 %v698_v2  ;;  %624 = vmatprep.subr.bf16.mxu0 %v700_v4  ;;  %v703_v7 = vld [vmem:[%s913_s1 + $0x88] sm:$0xff]   ;;  %v707_v11 = vld [vmem:[%s913_s1 + $0x90] sm:$0xff]  }
   0x5   :  { %651 = vmatpush3.bf16.msra.mxu1 %v699_v3  ;;  %v708_v12 = vld [vmem:[%s913_s1 + $0x58] sm:$0xff]   ;;  %v712_v16 = vld [vmem:[%s913_s1 + $0x60] sm:$0xff]   ;;  %v716_v20 = vld [vmem:[%s913_s1 + $0x68] sm:$0xff]  }
   0x6   :  { %652 = vmatprep.subr.bf16.mxu1 %v702_v6  ;;  %v709_v13 = vld [vmem:[%s913_s1 + $0x18] sm:$0xff]   ;;  %v713_v17 = vld [vmem:[%s913_s1 + $0x20] sm:$0xff]   ;;  %v717_v21 = vld [vmem:[%s913_s1 + $0x28] sm:$0xff]  }
   0x7   :  { %625 = vmatpush3.bf16.msra.mxu0 %v701_v5  ;;  %v710_v14 = vld [vmem:[%s913_s1 + $0xd8] sm:$0xff]   ;;  %v714_v18 = vld [vmem:[%s913_s1 + $0xe0] sm:$0xff]   ;;  %v718_v22 = vld [vmem:[%s913_s1 + $0xe8] sm:$0xff]  }
   0x8   :  { %626 = vmatprep.subr.bf16.mxu0 %v704_v8  ;;  %v711_v15 = vld [vmem:[%s913_s1 + $0x98] sm:$0xff]   ;;  %v715_v19 = vld [vmem:[%s913_s1 + $0xa0] sm:$0xff]   ;;  %v719_v23 = vld [vmem:[%s913_s1 + $0xa8] sm:$0xff]  }
   0x9   :  { %653 = vmatpush3.bf16.msra.mxu1 %v703_v7  ;;  %v720_v24 = vld [vmem:[%s913_s1 + $0x70] sm:$0xff]   ;;  %v724_v28 = vld [vmem:[%s913_s1 + $0x78] sm:$0xff]   ;;  %v731_v34 = vld [vmem:[%s913_s1 + $0x100] sm:$0xff]  }
   0xa   :  { %654 = vmatprep.subr.bf16.mxu1 %v706_v10  ;;  %v721_v25 = vld [vmem:[%s913_s1 + $0x30] sm:$0xff]   ;;  %v725_v29 = vld [vmem:[%s913_s1 + $0x38] sm:$0xff]   ;;  %v734_v36 = vld [vmem:[%s914_s0 + $0xc] ss:$20 sps:$4 sm:$0xff]  }
   0xb   :  { %627 = vmatpush3.bf16.msra.mxu0 %v705_v9  ;;  %v722_v26 = vld [vmem:[%s913_s1 + $0xf0] sm:$0xff]   ;;  %v726_v30 = vld [vmem:[%s913_s1 + $0xf8] sm:$0xff]   ;;  %v735_v37 = vld [vmem:[%s913_s1 + $0x108] sm:$0xff]   ;;  %460 = vmatprep.mubr.bf16.mxu1 %v734_v36 }
   0xc   :  { %628 = vmatprep.subr.bf16.mxu0 %v708_v12  ;;  %v723_v27 = vld [vmem:[%s913_s1 + $0xb0] sm:$0xff]   ;;  %v729_v32 = vld [vmem:[%s914_s0 + $0x4] ss:$20 sps:$4 sm:$0xff]   ;;  %v732_v35 = vld [vmem:[%s914_s0 + $0x8] ss:$20 sps:$4 sm:$0xff]  }
   0xd   :  { %655 = vmatpush3.bf16.msra.mxu1 %v707_v11  ;;  %v727_v31 = vld [vmem:[%s914_s0] ss:$20 sps:$4 sm:$0xff]   ;;  %v730_v33 = vld [vmem:[%s913_s1 + $0xb8] sm:$0xff]   ;;  %411 = vmatprep.mubr.bf16.mxu0 %v729_v32  ;;  %v742_v42 = vld [vmem:[%s914_s0 + $0x30] ss:$20 sps:$4 sm:$0xff]  }
   0xe   :  { %656 = vmatprep.subr.bf16.mxu1 %v710_v14  ;;  %v736_v38 = vld [vmem:[%s914_s0 + $0x2c] ss:$20 sps:$4 sm:$0xff]   ;;  %v738_v39 = vld [vmem:[%s914_s0 + $0x28] ss:$20 sps:$4 sm:$0xff]   ;;  %v739_v40 = vld [vmem:[%s913_s1 + $0x110] sm:$0xff]  }
   0xf   :  { %629 = vmatpush3.bf16.msra.mxu0 %v709_v13  ;;  %v740_v41 = vld [vmem:[%s914_s0 + $0x34] ss:$20 sps:$4 sm:$0xff]   ;;  %v743_v43 = vld [vmem:[%s913_s1 + $0x118] sm:$0xff]   ;;  %v744_v44 = vld [vmem:[%s914_s0 + $0x10] ss:$20 sps:$4 sm:$0xff]  }
  0x10   :  { %630 = vmatprep.subr.bf16.mxu0 %v712_v16  ;;  %v745_v45 = vld [vmem:[%s914_s0 + $0x38] ss:$20 sps:$4 sm:$0xff]   ;;  %v554_v47 = vld [vmem:[%s915_s2] ss:$0 sm:$0xff] }
  0x11   :  { %657 = vmatpush3.bf16.msra.mxu1 %v711_v15 }
  0x12   :  { %658 = vmatprep.subr.bf16.mxu1 %v714_v18 }
  0x13   :  { %631 = vmatpush3.bf16.msra.mxu0 %v713_v17 }
  0x14   :  { %632 = vmatprep.subr.bf16.mxu0 %v716_v20 }
  0x15   :  { %659 = vmatpush3.bf16.msra.mxu1 %v715_v19 }
  0x16   :  { %660 = vmatprep.subr.bf16.mxu1 %v718_v22 }
  0x17   :  { %633 = vmatpush3.bf16.msra.mxu0 %v717_v21 }
  0x18   :  { %634 = vmatprep.subr.bf16.mxu0 %v720_v24 }
  0x19   :  { %661 = vmatpush3.bf16.msra.mxu1 %v719_v23 }
  0x1a   :  { %662 = vmatprep.subr.bf16.mxu1 %v722_v26 }
  0x1b   :  { %635 = vmatpush3.bf16.msra.mxu0 %v721_v25 }
  0x1c   :  { %636 = vmatprep.subr.bf16.mxu0 %v724_v28 }
  0x1d   :  { %663 = vmatpush3.bf16.msra.mxu1 %v723_v27 }
  0x1e   :  { %664 = vmatprep.subr.bf16.mxu1 %v726_v30 }
  0x1f   :  { %637 = vmatpush3.bf16.msra.mxu0 %v725_v29 }
  0x20   :  { %684 = vmatprep.subr.bf16.mxu0 %v731_v34 }
  0x21   :  { %665 = vmatpush3.bf16.msra.mxu1 %v730_v33 }
  0x22   :  { %412 = vmatmul.mubr.bf16.vlgmr.msra.gmra.mrb[0].mxu0 %v727_v31 }
  0x23   :  { %685 = vmatpush3.bf16.msra.mxu0 %v731_v34  ;;  %419 = vmatprep.mubr.bf16.mxu0 %v736_v38 }
  0x24   :  { %461 = vmatmul.mubr.bf16.vlgmr.msra.gmra.mrb[0].mxu1 %v732_v35  ;;  %686 = vmatprep.subr.bf16.mxu0 %v735_v37 }
  0x25   :  { %468 = vmatprep.mubr.bf16.mxu1 %v740_v41 }
  0x27   :  { %687 = vmatpush3.bf16.msra.mxu0 %v735_v37 }
  0x28   :  { %688 = vmatprep.subr.bf16.mxu0 %v739_v40 }
  0x2a   :  { %420 = vmatmul.mubr.bf16.gmra.mrb[4].mxu0 %v738_v39 }
  0x2b   :  { %692 = vmatprep.mubr.msk.bf16.mxu0 %vm372_vm0, %v744_v44  ;;  %689 = vmatpush3.bf16.msra.mxu0 %v739_v40 }
  0x2c   :  { %469 = vmatmul.mubr.bf16.gmra.mrb[4].mxu1 %v742_v42  ;;  %690 = vmatprep.subr.bf16.mxu0 %v743_v43 }
  0x2f   :  { %691 = vmatpush3.bf16.msra.mxu0 %v743_v43 }
  0x32   :  { %693 = vmatmul.mubr.msk.bf16.vlgmr.msra.gmra.mrb[8].mxu0 %vm372_vm0, %v745_v45 }
  0xf5   :  { %v638_v46 = vpop.f32.mrb[0].mxu0 }
  0xf6   :  { %v639_v48 = vpop.f32.mrb[1].mxu0 }
  0xf7   :  { %v640_v49 = vadd.f32 %v639_v48, %v638_v46  ;;  %v641_v50 = vpop.f32.mrb[2].mxu0  ;;  %v666_v51 = vpop.f32.mrb[0].mxu1 }
  0xf8   :  { %v642_v52 = vpop.f32.mrb[3].mxu0  ;;  %v667_v55 = vpop.f32.mrb[1].mxu1 }
  0xf9   :  { %v414_v53 = vadd.f32 %v640_v49, %v554_v47  ;;  %v643_v54 = vadd.f32 %v642_v52, %v641_v50  ;;  %v668_v56 = vadd.f32 %v667_v55, %v666_v51  ;;  %v669_v57 = vpop.f32.mrb[2].mxu1 }
  0xfa   :  { %v670_v59 = vpop.f32.mrb[3].mxu1 }
  0xfb   :  { %v417_v58 = vadd.f32 %v643_v54, %v554_v47  ;;  %v671_v60 = vadd.f32 %v670_v59, %v669_v57  ;;  %v463_v61 = vadd.f32 %v668_v56, %v414_v53 }
  0xfd   :  { %v644_v62 = vpop.f32.mrb[4].mxu0  ;;  %v466_v0 = vadd.f32 %v671_v60, %v417_v58 }
  0xfe   :  { %v645_v63 = vpop.f32.mrb[5].mxu0 }
  0xff   :  { %v646_v1 = vadd.f32 %v645_v63, %v644_v62  ;;  %v647_v2 = vpop.f32.mrb[6].mxu0  ;;  %v672_v3 = vpop.f32.mrb[4].mxu1 }
 0x100   :  { %v648_v4 = vpop.f32.mrb[7].mxu0  ;;  %v673_v7 = vpop.f32.mrb[5].mxu1 }
 0x101   :  { %v422_v5 = vadd.f32 %v646_v1, %v554_v47  ;;  %v649_v6 = vadd.f32 %v648_v4, %v647_v2  ;;  %v674_v8 = vadd.f32 %v673_v7, %v672_v3  ;;  %v675_v9 = vpop.f32.mrb[6].mxu1 }
 0x102   :  { %v676_v11 = vpop.f32.mrb[7].mxu1 }
 0x103   :  { %v425_v10 = vadd.f32 %v649_v6, %v554_v47  ;;  %v677_v12 = vadd.f32 %v676_v11, %v675_v9  ;;  %v471_v13 = vadd.f32 %v674_v8, %v422_v5 }
 0x105   :  { %v694_v14 = vpop.f32.mrb[8].mxu0  ;;  %v474_v15 = vadd.f32 %v677_v12, %v425_v10 }
 0x106   :  { %v520_v16 = vadd.f32 %v694_v14, %v471_v13  ;;  %v511_v17 = vpop.f32.mrb[9].mxu0 }
 0x107   :  { %v512_v18 = vadd.f32 %v511_v17, %v463_v61  ;;  %v695_v19 = vpop.f32.mrb[10].mxu0 }
 0x108   :  { %v523_v20 = vadd.f32 %v695_v19, %v474_v15  ;;  %v514_v21 = vpop.f32.mrb[11].mxu0  ;;  %v528_v23 = vmax.f32 %v520_v16, 0.0 }
 0x109   :  { %v515_v22 = vadd.f32 %v514_v21, %v466_v0  ;;  %v526_v25 = vmax.f32 %v512_v18, 0.0 }
 0x10a   :  { %v529_v24 = vmax.f32 %v523_v20, 0.0 }
 0x10b   :  { %v527_v26 = vmax.f32 %v515_v22, 0.0 }
 0x10c   :  { %v619_v27 = vpack.c.bf16 %v529_v24, %v528_v23 }
 0x10d   :  { %v614_v28 = vpack.c.bf16 %v527_v26, %v526_v25 }
 0x10e   :  { %621 = vst [vmem:[%s916_s3 + $0x8] sm:$0xff] %v619_v27  }
 0x10f   :  { %615 = vst [vmem:[%s916_s3] sm:$0xff] %v614_v28  }

// kernel: resnet_forward.12
= control target key start
LH: loop header
LB: loop body
LE: loop exit
PB: predicated region body
PF: predicated region fallthrough
CT: control target
= control target key end

     0   :  { %vm68_vm0 = vcmask 523264   ;;  %s247_s1 = inlined_call_operand.vmem [shape: bf16[64,128], index: 1, kind: input, shape index: {}]   ;;  %s248_s0 = inlined_call_operand.vmem [shape: bf16[32,64], index: 0, kind: input, shape index: {}]   ;;  %s249_s2 = inlined_call_operand.vmem [shape: f32[1,128], index: 2, kind: input, shape index: {}]   ;;  %s250_s3 = inlined_call_operand.vmem [shape: bf16[32,128], index: 3, kind: output, shape index: {}]  }
   0x1   :  { %v194_v0 = vld [vmem:[%s247_s1] sm:$0xff]   ;;  %v195_v1 = vld [vmem:[%s247_s1 + $0x8] sm:$0xff]   ;;  %v196_v2 = vld [vmem:[%s247_s1 + $0x10] sm:$0xff]  }
   0x2   :  { %182 = vmatprep.subr.bf16.mxu0 %v194_v0  ;;  %v198_v3 = vld [vmem:[%s248_s0] sm:$0xff]   ;;  %v197_v4 = vld [vmem:[%s247_s1 + $0x18] sm:$0xff]   ;;  %v199_v5 = vld [vmem:[%s248_s0 + $0x8] sm:$0xff]  }
   0x3   :  { %183 = vmatpush3.bf16.msra.mxu0 %v194_v0  ;;  %190 = vmatprep.mubr.msk.bf16.mxu0 %vm68_vm0, %v198_v3  ;;  %v148_v7 = vld [vmem:[%s249_s2] ss:$0 sm:$0xff] }
   0x4   :  { %184 = vmatprep.subr.bf16.mxu0 %v195_v1 }
   0x7   :  { %185 = vmatpush3.bf16.msra.mxu0 %v195_v1 }
   0x8   :  { %186 = vmatprep.subr.bf16.mxu0 %v196_v2 }
   0xb   :  { %187 = vmatpush3.bf16.msra.mxu0 %v196_v2 }
   0xc   :  { %188 = vmatprep.subr.bf16.mxu0 %v197_v4 }
   0xf   :  { %189 = vmatpush3.bf16.msra.mxu0 %v197_v4 }
  0x12   :  { %191 = vmatmul.mubr.msk.bf16.vlgmr.msra.gmra.mrb[0].mxu0 %vm68_vm0, %v199_v5 }
  0xe5   :  { %v192_v6 = vpop.f32.mrb[0].mxu0 }
  0xe6   :  { %v109_v8 = vpop.f32.mrb[1].mxu0  ;;  %v118_v10 = vadd.f32 %v192_v6, %v148_v7 }
  0xe7   :  { %v193_v9 = vpop.f32.mrb[2].mxu0  ;;  %v110_v13 = vadd.f32 %v148_v7, %v109_v8 }
  0xe8   :  { %v121_v11 = vadd.f32 %v193_v9, %v148_v7  ;;  %v112_v12 = vpop.f32.mrb[3].mxu0 }
  0xe9   :  { %v113_v14 = vadd.f32 %v148_v7, %v112_v12 }
  0xea   :  { %v173_v15 = vpack.c.bf16 %v121_v11, %v118_v10 }
  0xeb   :  { %v168_v16 = vpack.c.bf16 %v113_v14, %v110_v13 }
  0xec   :  { %175 = vst [vmem:[%s250_s3 + $0x8] sm:$0xff] %v173_v15  }
  0xed   :  { %169 = vst [vmem:[%s250_s3] sm:$0xff] %v168_v16  }

// kernel: resnet_forward.15
= control target key start
LH: loop header
LB: loop body
LE: loop exit
PB: predicated region body
PF: predicated region fallthrough
CT: control target
= control target key end

     0   :  { %s125_s0 = inlined_call_operand.vmem [shape: bf16[2,16,128], index: 0, kind: input, shape index: {}]   ;;  %s126_s1 = inlined_call_operand.hbm [shape: f32[2,128], index: 1, kind: output, shape index: {}]  }
   0x1   :  { %v61_v0 = vld [vmem:[%s125_s0] sm:$0xff]   ;;  %v68_v1 = vld [vmem:[%s125_s0 + $0x8] sm:$0xff]  }
   0x2   :  { %6 = vsyncpa [#allocation3], 0  ;;  %v95_v2 = vmov 0.0   ;;  %v62_v3 = vunpack.c.l.bf16 %v61_v0  ;;  %v63_v4 = vunpack.c.h.bf16 %v61_v0  ;;  %v66_v5 = vunpack.c.l.bf16 %v68_v1  ;;  %s96_s0 = smov [#allocation2]  }
   0x3   :  { %13 = vst [vmem:[#allocation2] sm:$0x3] %v95_v2  ;;  %v67_v6 = vunpack.c.h.bf16 %v68_v1  ;;  %vm41_vm0 = vcmask 1041409   ;;  %s52_s10 = sshll.u32 %s96_s0, 4  ;;  %s53_s10 = int_to_ptr.vmem [resolvable:$true] %s52_s10 }
   0x4   :  { %v23_v7 = vadd.f32 %v63_v4, %v62_v3  ;;  %s71_s11 = scalar_lea.vmem %s53_s10, 32  ;;  %p76_p1 = scmp.lt.s32.totalorder %s53_s10, %s53_s10 }
   0x5   :  { %v30_v8 = vadd.f32 %v67_v6, %v66_v5  ;;  %p72_p0 = scmp.ne.s32.totalorder %s53_s10, %s71_s11  ;;  %p77_p2 = scmp.lt.s32.totalorder %s71_s11, %s71_s11 }
   0x6   :  { %v24_v9 = vrot.slane %v23_v7, 4 }
   0x7   :  { %v31_v10 = vrot.slane %v30_v8, 4  ;;  %p78_p3 = por %p77_p2, %p76_p1 }
   0x8   :  { %v25_v11 = vadd.f32 %v24_v9, %v23_v7 }
   0x9   :  { %v32_v12 = vadd.f32 %v31_v10, %v30_v8  ;;  %p79_p4 = pnand %p78_p3, %p72_p0 }
   0xa   :  { %v26_v13 = vrot.slane %v25_v11, 2  ;;  %v14_v21 = vld [vmem:[#allocation2] sm:$0x3] }
   0xb   :  { %v33_v14 = vrot.slane %v32_v12, 2 }
   0xc   :  { %v27_v15 = vadd.f32 %v26_v13, %v25_v11 }
   0xd   :  { %v34_v16 = vadd.f32 %v33_v14, %v32_v12 }
   0xe   :  { %v28_v17 = vrot.slane %v27_v15, 1 }
   0xf   :  { %v35_v18 = vrot.slane %v34_v16, 1 }
  0x10   :  { %v29_v19 = vadd.f32 %v28_v17, %v27_v15 }
  0x11   :  { %v36_v20 = vadd.f32 %v35_v18, %v34_v16 }
  0x12   :  { %v37_v22 = vmul.f32 0.0625, %v29_v19 }
  0x13   :  { %v38_v23 = vmul.f32 0.0625, %v36_v20 }
  0x15   :  { %v42_v24 = vsel %vm41_vm0, %v38_v23, %v37_v22 }
  0x16   :  { %v44_v25 = vadd.f32 %v42_v24, %v14_v21 }
  0x18   :  { %45 = vst [vmem:[#allocation2] sm:$0x3] %v44_v25 }
  0x19   :  { %82 = shalt.err (!%p79_p4)
}
  0x1a   :  { %s83_s14 = scalar_lea.hbm %s126_s1, 32 }
  0x1b   :  { %p84_p5 = scmp.ne.s32.totalorder %s126_s1, %s83_s14  ;;  %p87_p6 = scmp.lt.u32.totalorder %s83_s14, %s126_s1 }
  0x1d   :  { %p89_p7 = pnand %p87_p6, %p84_p5 }
  0x1f   :  { %92 = shalt.err (!%p89_p7)
}
  0x20   :  { %55 = dma.vmem_to_hbm [thread:$0]  %s53_s10, 32, %s126_s1, [#allocation3]  }
  0x21   :  { %93 = dma.done.wait [#allocation3], 32  }
  0x22   :  { %94 = vsyncadd [#allocation3], 4294967264 }
  0x23   :  { %59 = vsyncpa [#allocation3], 1 }

// kernel: resnet_forward.14
= control target key start
LH: loop header
LB: loop body
LE: loop exit
PB: predicated region body
PF: predicated region fallthrough
CT: control target
= control target key end

     0   :  { %s2290_s15 = smov 0   ;;  %s2292_s16 = smov 0   ;;  %s2617_s0 = inlined_call_operand.vmem [shape: bf16[2,42,128], index: 0, kind: input, shape index: {}]   ;;  %s2618_s1 = inlined_call_operand.vmem [shape: bf16[9,128,128], index: 1, kind: input, shape index: {}]   ;;  %s2619_s2 = inlined_call_operand.vmem [shape: f32[1,128], index: 2, kind: input, shape index: {}]   ;;  %s2620_s3 = inlined_call_operand.vmem [shape: bf16[2,24,128], index: 3, kind: input, shape index: {}]   ;;  %s2621_s4 = inlined_call_operand.vmem [shape: bf16[2,24,128], index: 4, kind: output, shape index: {}]  }
   0x1   :  { %s2294_s17 = smov 0  }
   0x2 LB: > { %s26_s18 = sadd.s32 1, %s2259_s16  ;;  %p1625_p0 = scmp.ge.s32.totalorder %s2263_s17, 1  ;;  %s2263_s17 = sphi %s2294_s17, %s14_s17   ;;  %s2259_s16 = sphi %s2292_s16, %s2623_s16   ;;  %s2255_s15 = sphi %s2290_s15, %s2622_s15  }
   0x3   : > { %p28_p1 = scmp.ge.s32.totalorder %s26_s18, 2  ;;  %p208_p2 = scmp.lt.s32.totalorder %s2263_s17, 3 }
   0x5   : > { %s2625_s18 = smov (%p28_p1, %s26_s18), 0  ;;  %p209_p3 = pnand %p1625_p0, %p208_p2 }
   0x6   : > { %v2156_v0 = vld [vmem:[%s2618_s1 + $0x40] sm:$0xff] (!%p209_p3)   ;;  %p252_p4 = scmp.lt.s32.totalorder (!%p209_p3), %s2255_s15, 1  ;;  %v2158_v2 = vld [vmem:[%s2618_s1 + $0x48] sm:$0xff] (!%p209_p3)   ;;  %v2160_v4 = vld [vmem:[%s2618_s1 + $0x50] sm:$0xff] (!%p209_p3)   ;;  %vm328_vm0 = vsmask.f32 (!%p209_p3), 7424 }
   0x7   : > { %212 = sbr.rel (%p209_p3) target bundleno = 393 (0x189), region = 36  ;;  %v2157_v1 = vld [vmem:[%s2618_s1] sm:$0xff] (!%p209_p3)   ;;  %1950 = vmatprep.subr.bf16.mxu0 (!%p209_p3), %v2156_v0  ;;  %v2159_v3 = vld [vmem:[%s2618_s1 + $0x8] sm:$0xff] (!%p209_p3)   ;;  %v2161_v5 = vld [vmem:[%s2618_s1 + $0x10] sm:$0xff] (!%p209_p3)   ;;  %vm562_vm1 = vcmask (!%p209_p3), 1046528   ;;  %vm692_vm2 = vcmask (!%p209_p3), 1044480  }
   0x8   : > { %1970 = vmatprep.subr.bf16.mxu1 (!%p209_p3), %v2157_v1  ;;  %1951 = vmatpush3.bf16.msra.mxu0 (!%p209_p3), %v2156_v0  ;;  %v2162_v6 = vld [vmem:[%s2618_s1 + $0x58] sm:$0xff] (!%p209_p3)   ;;  %v2164_v8 = vld [vmem:[%s2618_s1 + $0x60] sm:$0xff] (!%p209_p3)   ;;  %v2166_v10 = vld [vmem:[%s2618_s1 + $0x68] sm:$0xff] (!%p209_p3)   ;;  %vm818_vm3 = vsmask.f32 (!%p209_p3), 4352  ;;  %vm1088_vm4 = vcmask (!%p209_p3), 1045504  }
   0x9   : > { %1971 = vmatpush3.bf16.msra.mxu1 (!%p209_p3), %v2157_v1  ;;  %1952 = vmatprep.subr.bf16.mxu0 (!%p209_p3), %v2158_v2  ;;  %v2163_v7 = vld [vmem:[%s2618_s1 + $0x18] sm:$0xff] (!%p209_p3)   ;;  %v2165_v9 = vld [vmem:[%s2618_s1 + $0x20] sm:$0xff] (!%p209_p3)   ;;  %v2167_v14 = vld [vmem:[%s2618_s1 + $0x28] sm:$0xff] (!%p209_p3)   ;;  %vm1214_vm5 = vsmask.f32 (!%p209_p3), 5376 }
   0xa   : > { %1972 = vmatprep.subr.bf16.mxu1 (!%p209_p3), %v2159_v3  ;;  %v2168_v20 = vld [vmem:[%s2618_s1 + $0x70] sm:$0xff] (!%p209_p3)   ;;  %v2170_v26 = vld [vmem:[%s2618_s1 + $0x78] sm:$0xff] (!%p209_p3)   ;;  %v2175_v30 = vld [vmem:[%s2618_s1 + $0x80] sm:$0xff] (!%p209_p3)  }
   0xb   : > { %v2169_v22 = vld [vmem:[%s2618_s1 + $0x30] sm:$0xff] (!%p209_p3)   ;;  %v2171_v27 = vld [vmem:[%s2618_s1 + $0x38] sm:$0xff] (!%p209_p3)   ;;  %v2176_v31 = vld [vmem:[%s2618_s1 + $0xc0] sm:$0xff] (!%p209_p3)  }
   0xc   : > { %1953 = vmatpush3.bf16.msra.mxu0 (!%p209_p3), %v2158_v2  ;;  %v2177_v34 = vld [vmem:[%s2618_s1 + $0x88] sm:$0xff] (!%p209_p3)   ;;  %v2179_v41 = vld [vmem:[%s2618_s1 + $0x90] sm:$0xff] (!%p209_p3)   ;;  %v2181_v49 = vld [vmem:[%s2618_s1 + $0x98] sm:$0xff] (!%p209_p3)  }
   0xd   : > { %1973 = vmatpush3.bf16.msra.mxu1 (!%p209_p3), %v2159_v3  ;;  %1954 = vmatprep.subr.bf16.mxu0 (!%p209_p3), %v2160_v4  ;;  %v2178_v35 = vld [vmem:[%s2618_s1 + $0xc8] sm:$0xff] (!%p209_p3)   ;;  %v2180_v44 = vld [vmem:[%s2618_s1 + $0xd0] sm:$0xff] (!%p209_p3)   ;;  %v2182_v51 = vld [vmem:[%s2618_s1 + $0xd8] sm:$0xff] (!%p209_p3)  }
   0xe   : > { %s2627_s15 = smov (!%p252_p4, %s2255_s15), 1  ;;  %1974 = vmatprep.subr.bf16.mxu1 %v2161_v5  ;;  %v2183_v52 = vld [vmem:[%s2618_s1 + $0xa0] sm:$0xff]   ;;  %v2185_v54 = vld [vmem:[%s2618_s1 + $0xa8] sm:$0xff]   ;;  %v2187_v56 = vld [vmem:[%s2618_s1 + $0xb0] sm:$0xff]  }
   0xf   : > { %s2130_s9 = smul.u32 24, %s2627_s15  ;;  %v2184_v53 = vld [vmem:[%s2618_s1 + $0xe0] sm:$0xff]   ;;  %v2186_v55 = vld [vmem:[%s2618_s1 + $0xe8] sm:$0xff]   ;;  %v2188_v61 = vld [vmem:[%s2618_s1 + $0xf0] sm:$0xff]  }
  0x10   : > { %1955 = vmatpush3.bf16.msra.mxu0 %v2160_v4  ;;  %v2189_v0 = vld [vmem:[%s2618_s1 + $0xb8] sm:$0xff]   ;;  %s2131_s11 = smul.u32 12, %s2627_s15 }
  0x11   : > { %1975 = vmatpush3.bf16.msra.mxu1 %v2161_v5  ;;  %1956 = vmatprep.subr.bf16.mxu0 %v2162_v6  ;;  %s2344_s20 = scalar_lea.vmem %s2617_s0, %s2130_s9  ;;  %v2190_v1 = vld [vmem:[%s2618_s1 + $0xf8] sm:$0xff]  }
  0x12   : > { %1976 = vmatprep.subr.bf16.mxu1 %v2163_v7  ;;  %v281_v11 = vld [vmem:[%s2344_s20] sm:$0xf]  ;;  %v2351_v12 = vld [vmem:[%s2344_s20 + $0x4] sm:$0xf]  ;;  %v2354_v13 = vld [vmem:[%s2344_s20 + $0x8] sm:$0xf]  ;;  %s271_s14 = scalar_lea.vmem %s2620_s3, %s2131_s11  ;;  %s279_s23 = scalar_lea.vmem %s2621_s4, %s2131_s11 }
  0x13   : > { %v300_v15 = vld [vmem:[%s2344_s20 + $0xc] sm:$0x1]  ;;  %v1645_v16 = vcombine.low %v281_v11, %v2351_v12  ;;  %v1655_v33 = vcombine.low %v2354_v13, %v2354_v13  ;;  %v541_v36 = vld [vmem:[%s2344_s20] sm:$0xe] }
  0x14   : > { %1957 = vmatpush3.bf16.msra.mxu0 %v2162_v6  ;;  %v2362_v17 = vcombine.low %v2354_v13, %v300_v15  ;;  %v1680_v37 = vcombine.low %v541_v36, %v2351_v12  ;;  %v667_v39 = vld [vmem:[%s2344_s20] sm:$0x8]  ;;  %v668_v40 = vld [vmem:[%s2344_s20 + $0xc] sm:$0x7]  ;;  %v1756_v15 = vcombine.low %v2351_v12, %v2354_v13 }
  0x15   : > { %1977 = vmatpush3.bf16.msra.mxu1 %v2163_v7  ;;  %1958 = vmatprep.subr.bf16.mxu0 %v2164_v8  ;;  %v330_v18 = vshrl.u32 %v1645_v16, 16  ;;  %v332_v19 = vshll.u32 %v1645_v16, 16  ;;  %v1705_v42 = vcombine.low %v667_v39, %v2351_v12  ;;  %v1706_v43 = vcombine.low %v2354_v13, %v668_v40  ;;  %v2435_v57 = vld [vmem:[%s2344_s20 + $0xc] sm:$0xf]  ;;  %v2192_v6 = vld [vmem:[%s2618_s1 + $0x100] sm:$0xff]   ;;  %v2200_v12 = vld [vmem:[%s2618_s1 + $0x118] sm:$0xff]  }
  0x16   : > { %1978 = vmatprep.subr.bf16.mxu1 %v2165_v9  ;;  %1986 = vmatprep.mubr.bf16.mxu1 %v1645_v16  ;;  %v337_v21 = vshll.u32 %v2362_v17, 16  ;;  %v341_v29 = vshrl.u32 %v2362_v17, 16  ;;  %v564_v38 = vrot.slane %v2362_v17, 1  ;;  %v563_v45 = vrot.slane %v1680_v37, 1  ;;  %v2195_v7 = vld [vmem:[%s2618_s1 + $0x140] sm:$0xff]   ;;  %v2197_v11 = vld [vmem:[%s2618_s1 + $0x148] sm:$0xff]  }
  0x17   : > { %v334_v23 = vrot.slane %v332_v19, 1  ;;  %v693_v46 = vrot.slane %v1705_v42, 3  ;;  %v2406_v47 = vrot.slane %v1706_v43, 3  ;;  %v820_v58 = vshrl.u32 %v1705_v42, 16  ;;  %v2198_v16 = vld [vmem:[%s2618_s1 + $0x110] sm:$0xff]   ;;  %v2208_v40 = vld [vmem:[%s2618_s1 + $0x138] sm:$0xff]  }
  0x18   : > { %1959 = vmatpush3.bf16.msra.mxu0 %v2164_v8  ;;  %v339_v24 = vrot.slane %v337_v21, 1  ;;  %v565_v48 = vsel %vm562_vm1, %v563_v45, %v564_v38  ;;  %v823_v59 = vshll.u32 %v1705_v42, 16  ;;  %v1731_v60 = vcombine.low %v2354_v13, %v2435_v57  ;;  %v2199_v17 = vld [vmem:[%s2618_s1 + $0x150] sm:$0xff]   ;;  %v2201_v13 = vld [vmem:[%s2618_s1 + $0x158] sm:$0xff]   ;;  %v2203_v21 = vld [vmem:[%s2618_s1 + $0x160] sm:$0xff]  }
  0x19   : > { %1979 = vmatpush3.bf16.msra.mxu1 %v2165_v9  ;;  %1960 = vmatprep.subr.bf16.mxu0 %v2166_v10  ;;  %v335_v25 = vor.u32 %v334_v23, %v330_v18  ;;  %v695_v50 = vsel %vm692_vm2, %v693_v46, %v2406_v47  ;;  %v822_v2 = vrot.slane %v820_v58, 3  ;;  %v1059_v18 = vld [vmem:[%s2344_s20 + $0xc] sm:$0xf]  ;;  %v1193_v19 = vld [vmem:[%s2344_s20 + $0x10] sm:$0x7] }
  0x1a   : > { %1980 = vmatprep.subr.bf16.mxu1 %v2167_v14  ;;  %v343_v32 = vor.u32 %v341_v29, %v339_v24  ;;  %v828_v62 = vshrl.u32 %v1731_v60, 16  ;;  %v831_v63 = vshll.u32 %v1731_v60, 16  ;;  %v825_v3 = vrot.slane %v823_v59, 4  ;;  %v1058_v23 = vld [vmem:[%s2344_s20 + $0x8] sm:$0xf]  ;;  %v2217_v58 = vld [vmem:[%s2618_s1 + $0x190] sm:$0xff]  }
  0x1b   : > { %v340_v28 = vsel %vm328_vm0, %v335_v25, %v339_v24  ;;  %v1333_v24 = vld [vmem:[%s2344_s20 + $0x4] sm:$0x8]  ;;  %v2205_v29 = vld [vmem:[%s2618_s1 + $0x168] sm:$0xff]   ;;  %v2218_v59 = vld [vmem:[%s2618_s1 + $0x1d0] sm:$0xff]  }
  0x1c   : > { %1961 = vmatpush3.bf16.msra.mxu0 %v2166_v10  ;;  %1966 = vmatprep.mubr.bf16.mxu0 %v340_v28  ;;  %v830_v4 = vrot.slane %v828_v62, 3  ;;  %v833_v5 = vrot.slane %v831_v63, 4  ;;  %v826_v8 = vor.u32 %v825_v3, %v822_v2  ;;  %v2196_v10 = vld [vmem:[%s2618_s1 + $0x108] sm:$0xff]   ;;  %v1833_v25 = vcombine.low %v1333_v24, %v1058_v23  ;;  %v1057_v28 = vld [vmem:[%s2344_s20 + $0x4] sm:$0xc]  ;;  %v2219_v60 = vld [vmem:[%s2618_s1 + $0x198] sm:$0xff]  }
  0x1d   : > { %1981 = vmatpush3.bf16.msra.mxu1 %v2167_v14  ;;  %1962 = vmatprep.subr.bf16.mxu0 %v2168_v20  ;;  %v2221_v62 = vld [vmem:[%s2618_s1 + $0x1a0] sm:$0xff]   ;;  %v2225_v2 = vld [vmem:[%s2618_s1 + $0x1b0] sm:$0xff]  }
  0x1e   : > { %1982 = vmatprep.subr.bf16.mxu1 %v2169_v22  ;;  %v2454_v9 = vor.u32 %v833_v5, %v830_v4  ;;  %v2222_v63 = vld [vmem:[%s2618_s1 + $0x1e0] sm:$0xff]   ;;  %v2226_v3 = vld [vmem:[%s2618_s1 + $0x1f0] sm:$0xff]   ;;  %v2227_v4 = vld [vmem:[%s2618_s1 + $0x1b8] sm:$0xff]  }
  0x1f   : > { %v2228_v5 = vld [vmem:[%s2618_s1 + $0x1f8] sm:$0xff]  }
  0x20   : > { %1963 = vmatpush3.bf16.msra.mxu0 %v2168_v20  ;;  %v835_v14 = vsel %vm818_vm3, %v826_v8, %v2454_v9  ;;  %v2202_v20 = vld [vmem:[%s2618_s1 + $0x120] sm:$0xff]   ;;  %v2234_v8 = vld [vmem:[%s2618_s1 + $0x210] sm:$0xff]  }
  0x21   : > { %1983 = vmatpush3.bf16.msra.mxu1 %v2169_v22  ;;  %1964 = vmatprep.subr.bf16.mxu0 %v2170_v26  ;;  %v2488_v22 = vcombine.low %v1059_v18, %v1193_v19 }
  0x22   : > { %1984 = vmatprep.subr.bf16.mxu1 %v2171_v27 }
  0x23   : > { %v1227_v39 = vshll.u32 %v2488_v22, 16 }
  0x24   : > { %1965 = vmatpush3.bf16.msra.mxu0 %v2170_v26  ;;  %v1355_v26 = vrot.slane %v2488_v22, 3 }
  0x25   : > { %1985 = vmatpush3.bf16.msra.mxu1 %v2171_v27  ;;  %1990 = vmatprep.subr.bf16.mxu0 %v2175_v30  ;;  %v2204_v27 = vld [vmem:[%s2618_s1 + $0x128] sm:$0xff]   ;;  %v1229_v46 = vrot.slane %v1227_v39, 3 }
  0x26   : > { %2010 = vmatprep.subr.bf16.mxu1 %v2176_v31 }
  0x27   : > { %1967 = vmatmul.mubr.bf16.vlgmr.msra.gmra.mrb[0].mxu0 %v343_v32 }
  0x28   : > { %1987 = vmatmul.mubr.bf16.vlgmr.msra.gmra.mrb[0].mxu1 %v1655_v33  ;;  %1991 = vmatpush3.bf16.msra.mxu0 %v2175_v30  ;;  %v1354_v30 = vrot.slane %v1833_v25, 3  ;;  %v2206_v33 = vld [vmem:[%s2618_s1 + $0x130] sm:$0xff]  }
  0x29   : > { %2011 = vmatpush3.bf16.msra.mxu1 %v2176_v31  ;;  %1992 = vmatprep.subr.bf16.mxu0 %v2177_v34  ;;  %v1782_v31 = vcombine.low %v1057_v28, %v1058_v23 }
  0x2a   : > { %2012 = vmatprep.subr.bf16.mxu1 %v2178_v35  ;;  %2006 = vmatprep.mubr.bf16.mxu0 %v565_v48  ;;  %v2503_v32 = vsel %vm692_vm2, %v1354_v30, %v1355_v26  ;;  %v2214_v48 = vld [vmem:[%s2618_s1 + $0x1c0] sm:$0xff]  }
  0x2b   : > { %2026 = vmatprep.mubr.bf16.mxu1 %v695_v50  ;;  %v1216_v36 = vshrl.u32 %v1782_v31, 16  ;;  %v1219_v37 = vshll.u32 %v1782_v31, 16 }
  0x2c   : > { %1993 = vmatpush3.bf16.msra.mxu0 %v2177_v34  ;;  %v2207_v34 = vld [vmem:[%s2618_s1 + $0x170] sm:$0xff]  }
  0x2d   : > { %2013 = vmatpush3.bf16.msra.mxu1 %v2178_v35  ;;  %1994 = vmatprep.subr.bf16.mxu0 %v2179_v41  ;;  %v1060_v35 = vld [vmem:[%s2344_s20 + $0x10] sm:$0x3]  ;;  %v1218_v43 = vrot.slane %v1216_v36, 2 }
  0x2e   : > { %2014 = vmatprep.subr.bf16.mxu1 %v2180_v44  ;;  %v1783_v42 = vcombine.low %v1059_v18, %v1060_v35 }
  0x30   : > { %1995 = vmatpush3.bf16.msra.mxu0 %v2179_v41  ;;  %v2209_v41 = vld [vmem:[%s2618_s1 + $0x178] sm:$0xff]   ;;  %v1090_v50 = vrot.slane %v1783_v42, 2 }
  0x31   : > { %2015 = vmatpush3.bf16.msra.mxu1 %v2180_v44  ;;  %1996 = vmatprep.subr.bf16.mxu0 %v2181_v49  ;;  %v1221_v44 = vrot.slane %v1219_v37, 3 }
  0x32   : > { %2016 = vmatprep.subr.bf16.mxu1 %v2182_v51 }
  0x34   : > { %1997 = vmatpush3.bf16.msra.mxu0 %v2181_v49  ;;  %v1089_v49 = vrot.slane %v1782_v31, 2 }
  0x35   : > { %2017 = vmatpush3.bf16.msra.mxu1 %v2182_v51  ;;  %1998 = vmatprep.subr.bf16.mxu0 %v2183_v52  ;;  %v1757_v51 = vcombine.low %v2435_v57, %v2435_v57 }
  0x36   : > { %2018 = vmatprep.subr.bf16.mxu1 %v2184_v53 }
  0x38   : > { %1999 = vmatpush3.bf16.msra.mxu0 %v2183_v52  ;;  %v1222_v52 = vor.u32 %v1221_v44, %v1218_v43 }
  0x39   : > { %2019 = vmatpush3.bf16.msra.mxu1 %v2184_v53  ;;  %2000 = vmatprep.subr.bf16.mxu0 %v2185_v54 }
  0x3a   : > { %2020 = vmatprep.subr.bf16.mxu1 %v2186_v55 }
  0x3c   : > { %2001 = vmatpush3.bf16.msra.mxu0 %v2185_v54  ;;  %v2215_v54 = vld [vmem:[%s2618_s1 + $0x188] sm:$0xff]  }
  0x3d   : > { %2021 = vmatpush3.bf16.msra.mxu1 %v2186_v55  ;;  %2002 = vmatprep.subr.bf16.mxu0 %v2187_v56  ;;  %v2216_v55 = vld [vmem:[%s2618_s1 + $0x1c8] sm:$0xff]  }
  0x3e   : > { %2022 = vmatprep.subr.bf16.mxu1 %v2188_v61 }
  0x40   : > { %2003 = vmatpush3.bf16.msra.mxu0 %v2187_v56  ;;  %v1091_v56 = vsel %vm1088_vm4, %v1089_v49, %v1090_v50 }
  0x41   : > { %2023 = vmatpush3.bf16.msra.mxu1 %v2188_v61  ;;  %2004 = vmatprep.subr.bf16.mxu0 %v2189_v0  ;;  %v2220_v61 = vld [vmem:[%s2618_s1 + $0x1d8] sm:$0xff]  }
  0x42   : > { %2024 = vmatprep.subr.bf16.mxu1 %v2190_v1 }
  0x44   : > { %2005 = vmatpush3.bf16.msra.mxu0 %v2189_v0  ;;  %v2223_v0 = vld [vmem:[%s2618_s1 + $0x1a8] sm:$0xff]  }
  0x45   : > { %2025 = vmatpush3.bf16.msra.mxu1 %v2190_v1  ;;  %2030 = vmatprep.subr.bf16.mxu0 %v2192_v6  ;;  %v2224_v1 = vld [vmem:[%s2618_s1 + $0x1e8] sm:$0xff]  }
  0x46   : > { %2050 = vmatprep.subr.bf16.mxu1 %v2195_v7 }
  0x47   : > { %2007 = vmatmul.mubr.bf16.vlgmr.msra.gmra.mrb[4].mxu0 %v564_v38  ;;  %v1224_v38 = vshrl.u32 %v2488_v22, 16 }
  0x48   : > { %2031 = vmatpush3.bf16.msra.mxu0 %v2192_v6  ;;  %2027 = vmatmul.mubr.bf16.vlgmr.msra.gmra.mrb[4].mxu1 %v2406_v47  ;;  %v2211_v47 = vld [vmem:[%s2618_s1 + $0x180] sm:$0xff]  }
  0x49   : > { %2051 = vmatpush3.bf16.msra.mxu1 %v2195_v7  ;;  %2032 = vmatprep.subr.bf16.mxu0 %v2196_v10  ;;  %v1226_v45 = vrot.slane %v1224_v38, 2  ;;  %v2232_v6 = vld [vmem:[%s2618_s1 + $0x200] sm:$0xff]   ;;  %v2233_v7 = vld [vmem:[%s2618_s1 + $0x208] sm:$0xff]  }
  0x4a   : > { %2052 = vmatprep.subr.bf16.mxu1 %v2197_v11  ;;  %2046 = vmatprep.mubr.bf16.mxu0 %v835_v14  ;;  %v2238_v14 = vld [vmem:[%s2618_s1 + $0x230] sm:$0xff]  }
  0x4b   : > { %2066 = vmatprep.mubr.bf16.mxu1 %v1756_v15  ;;  %v1230_v53 = vor.u32 %v1229_v46, %v1226_v45  ;;  %v2239_v15 = vld [vmem:[%s2618_s1 + $0x238] sm:$0xff]  }
  0x4c   : > { %2033 = vmatpush3.bf16.msra.mxu0 %v2196_v10  ;;  %v2236_v10 = vld [vmem:[%s2618_s1 + $0x220] sm:$0xff]  }
  0x4d   : > { %2053 = vmatpush3.bf16.msra.mxu1 %v2197_v11  ;;  %2034 = vmatprep.subr.bf16.mxu0 %v2198_v16  ;;  %v1231_v57 = vsel %vm1214_vm5, %v1222_v52, %v1230_v53  ;;  %v2237_v11 = vld [vmem:[%s2618_s1 + $0x228] sm:$0xff]  }
  0x4e   : > { %2054 = vmatprep.subr.bf16.mxu1 %v2199_v17 }
  0x50   : > { %2035 = vmatpush3.bf16.msra.mxu0 %v2198_v16 }
  0x51   : > { %2055 = vmatpush3.bf16.msra.mxu1 %v2199_v17  ;;  %2036 = vmatprep.subr.bf16.mxu0 %v2200_v12 }
  0x52   : > { %2056 = vmatprep.subr.bf16.mxu1 %v2201_v13 }
  0x54   : > { %2037 = vmatpush3.bf16.msra.mxu0 %v2200_v12 }
  0x55   : > { %2057 = vmatpush3.bf16.msra.mxu1 %v2201_v13  ;;  %2038 = vmatprep.subr.bf16.mxu0 %v2202_v20 }
  0x56   : > { %2058 = vmatprep.subr.bf16.mxu1 %v2203_v21 }
  0x58   : > { %2039 = vmatpush3.bf16.msra.mxu0 %v2202_v20 }
  0x59   : > { %2059 = vmatpush3.bf16.msra.mxu1 %v2203_v21  ;;  %2040 = vmatprep.subr.bf16.mxu0 %v2204_v27 }
  0x5a   : > { %2060 = vmatprep.subr.bf16.mxu1 %v2205_v29 }
  0x5c   : > { %2041 = vmatpush3.bf16.msra.mxu0 %v2204_v27 }
  0x5d   : > { %2061 = vmatpush3.bf16.msra.mxu1 %v2205_v29  ;;  %2042 = vmatprep.subr.bf16.mxu0 %v2206_v33 }
  0x5e   : > { %2062 = vmatprep.subr.bf16.mxu1 %v2207_v34 }
  0x60   : > { %2043 = vmatpush3.bf16.msra.mxu0 %v2206_v33 }
  0x61   : > { %2063 = vmatpush3.bf16.msra.mxu1 %v2207_v34  ;;  %2044 = vmatprep.subr.bf16.mxu0 %v2208_v40 }
  0x62   : > { %2064 = vmatprep.subr.bf16.mxu1 %v2209_v41 }
  0x64   : > { %2045 = vmatpush3.bf16.msra.mxu0 %v2208_v40 }
  0x65   : > { %2065 = vmatpush3.bf16.msra.mxu1 %v2209_v41  ;;  %2070 = vmatprep.subr.bf16.mxu0 %v2211_v47 }
  0x66   : > { %2090 = vmatprep.subr.bf16.mxu1 %v2214_v48 }
  0x67   : > { %2047 = vmatmul.mubr.bf16.vlgmr.msra.gmra.mrb[8].mxu0 %v2454_v9  ;;  %v2235_v9 = vld [vmem:[%s2618_s1 + $0x218] sm:$0xff]  }
  0x68   : > { %2071 = vmatpush3.bf16.msra.mxu0 %v2211_v47  ;;  %2067 = vmatmul.mubr.bf16.vlgmr.msra.gmra.mrb[8].mxu1 %v1757_v51 }
  0x69   : > { %2091 = vmatpush3.bf16.msra.mxu1 %v2214_v48  ;;  %2072 = vmatprep.subr.bf16.mxu0 %v2215_v54 }
  0x6a   : > { %2092 = vmatprep.subr.bf16.mxu1 %v2216_v55  ;;  %2086 = vmatprep.mubr.bf16.mxu0 %v1091_v56 }
  0x6b   : > { %2106 = vmatprep.mubr.bf16.mxu1 %v1231_v57 }
  0x6c   : > { %2073 = vmatpush3.bf16.msra.mxu0 %v2215_v54 }
  0x6d   : > { %2093 = vmatpush3.bf16.msra.mxu1 %v2216_v55  ;;  %2074 = vmatprep.subr.bf16.mxu0 %v2217_v58 }
  0x6e   : > { %2094 = vmatprep.subr.bf16.mxu1 %v2218_v59 }
  0x70   : > { %2075 = vmatpush3.bf16.msra.mxu0 %v2217_v58 }
  0x71   : > { %2095 = vmatpush3.bf16.msra.mxu1 %v2218_v59  ;;  %2076 = vmatprep.subr.bf16.mxu0 %v2219_v60 }
  0x72   : > { %2096 = vmatprep.subr.bf16.mxu1 %v2220_v61 }
  0x74   : > { %2077 = vmatpush3.bf16.msra.mxu0 %v2219_v60 }
  0x75   : > { %2097 = vmatpush3.bf16.msra.mxu1 %v2220_v61  ;;  %2078 = vmatprep.subr.bf16.mxu0 %v2221_v62 }
  0x76   : > { %2098 = vmatprep.subr.bf16.mxu1 %v2222_v63 }
  0x78   : > { %2079 = vmatpush3.bf16.msra.mxu0 %v2221_v62 }
  0x79   : > { %2099 = vmatpush3.bf16.msra.mxu1 %v2222_v63  ;;  %2080 = vmatprep.subr.bf16.mxu0 %v2223_v0 }
  0x7a   : > { %2100 = vmatprep.subr.bf16.mxu1 %v2224_v1 }
  0x7c   : > { %2081 = vmatpush3.bf16.msra.mxu0 %v2223_v0 }
  0x7d   : > { %2101 = vmatpush3.bf16.msra.mxu1 %v2224_v1  ;;  %2082 = vmatprep.subr.bf16.mxu0 %v2225_v2 }
  0x7e   : > { %2102 = vmatprep.subr.bf16.mxu1 %v2226_v3 }
  0x80   : > { %2083 = vmatpush3.bf16.msra.mxu0 %v2225_v2 }
  0x81   : > { %2103 = vmatpush3.bf16.msra.mxu1 %v2226_v3  ;;  %2084 = vmatprep.subr.bf16.mxu0 %v2227_v4  ;;  %v1470_v3 = vld [vmem:[%s271_s14 + $0x8] sm:$0xf] }
  0x82   : > { %2104 = vmatprep.subr.bf16.mxu1 %v2228_v5 }
  0x84   : > { %2085 = vmatpush3.bf16.msra.mxu0 %v2227_v4  ;;  %v1852_v4 = vld [vmem:[%s271_s14] sm:$0xff]  }
  0x85   : > { %2105 = vmatpush3.bf16.msra.mxu1 %v2228_v5  ;;  %2110 = vmatprep.subr.bf16.mxu0 %v2232_v6 }
  0x87   : > { %2087 = vmatmul.mubr.bf16.vlgmr.msra.gmra.mrb[12].mxu0 %v1090_v50 }
  0x88   : > { %2111 = vmatpush3.bf16.msra.mxu0 %v2232_v6  ;;  %2107 = vmatmul.mubr.bf16.vlgmr.msra.gmra.mrb[12].mxu1 %v1230_v53  ;;  %v1842_v6 = vld [vmem:[%s2619_s2] ss:$0 sm:$0xff] }
  0x89   : > { %2112 = vmatprep.subr.bf16.mxu0 %v2233_v7  ;;  %2126 = vmatprep.mubr.bf16.mxu0 %v2503_v32 }
  0x8c   : > { %2113 = vmatpush3.bf16.msra.mxu0 %v2233_v7 }
  0x8d   : > { %2114 = vmatprep.subr.bf16.mxu0 %v2234_v8 }
  0x90   : > { %2115 = vmatpush3.bf16.msra.mxu0 %v2234_v8  ;;  %v1473_v8 = vunpack.c.l.bf16 %v1470_v3 }
  0x91   : > { %2116 = vmatprep.subr.bf16.mxu0 %v2235_v9 }
  0x94   : > { %2117 = vmatpush3.bf16.msra.mxu0 %v2235_v9 }
  0x95   : > { %2118 = vmatprep.subr.bf16.mxu0 %v2236_v10 }
  0x98   : > { %2119 = vmatpush3.bf16.msra.mxu0 %v2236_v10 }
  0x99   : > { %2120 = vmatprep.subr.bf16.mxu0 %v2237_v11 }
  0x9c   : > { %2121 = vmatpush3.bf16.msra.mxu0 %v2237_v11  ;;  %v1853_v11 = vunpack.c.l.bf16 %v1852_v4 }
  0x9d   : > { %2122 = vmatprep.subr.bf16.mxu0 %v2238_v14 }
  0xa0   : > { %2123 = vmatpush3.bf16.msra.mxu0 %v2238_v14 }
  0xa1   : > { %2124 = vmatprep.subr.bf16.mxu0 %v2239_v15 }
  0xa4   : > { %2125 = vmatpush3.bf16.msra.mxu0 %v2239_v15 }
  0xa7   : > { %2127 = vmatmul.mubr.bf16.vlgmr.msra.gmra.mrb[16].mxu0 %v1355_v26 }
  0xfa   : > { %v1968_v16 = vpop.f32.mrb[0].mxu0 }
  0xfb   : > { %v1988_v17 = vpop.f32.mrb[0].mxu1  ;;  %v428_v12 = vpop.f32.mrb[1].mxu0 }
  0xfc   : > { %v536_v13 = vadd.f32 %v1988_v17, %v1968_v16  ;;  %v527_v18 = vpop.f32.mrb[1].mxu1  ;;  %v1969_v19 = vpop.f32.mrb[2].mxu0 }
  0xfd   : > { %v528_v20 = vadd.f32 %v527_v18, %v428_v12  ;;  %v1989_v21 = vpop.f32.mrb[2].mxu1  ;;  %v431_v23 = vpop.f32.mrb[3].mxu0 }
  0xfe   : > { %v530_v24 = vpop.f32.mrb[3].mxu1 }
  0xff   : > { %v531_v25 = vadd.f32 %v530_v24, %v431_v23 }
 0x11a   : > { %v2008_v27 = vpop.f32.mrb[4].mxu0 }
 0x11b   : > { %v666_v28 = vadd.f32 %v2008_v27, %v536_v13  ;;  %v650_v29 = vpop.f32.mrb[5].mxu0  ;;  %v2028_v30 = vpop.f32.mrb[4].mxu1  ;;  %v1854_v13 = vunpack.c.h.bf16 %v1852_v4 }
 0x11c   : > { %v664_v31 = vadd.f32 %v650_v29, %v528_v20  ;;  %v2009_v32 = vpop.f32.mrb[6].mxu0  ;;  %v780_v33 = vpop.f32.mrb[5].mxu1 }
 0x11d   : > { %v796_v22 = vadd.f32 %v2028_v30, %v666_v28  ;;  %v653_v26 = vpop.f32.mrb[7].mxu0  ;;  %v2029_v34 = vpop.f32.mrb[6].mxu1 }
 0x11e   : > { %v665_v35 = vadd.f32 %v653_v26, %v531_v25  ;;  %v794_v36 = vadd.f32 %v780_v33, %v664_v31  ;;  %v783_v37 = vpop.f32.mrb[7].mxu1 }
 0x120   : > { %v795_v38 = vadd.f32 %v783_v37, %v665_v35 }
 0x13a   : > { %v2048_v39 = vpop.f32.mrb[8].mxu0 }
 0x13b   : > { %v936_v40 = vadd.f32 %v2048_v39, %v796_v22  ;;  %v920_v41 = vpop.f32.mrb[9].mxu0  ;;  %v2068_v42 = vpop.f32.mrb[8].mxu1 }
 0x13c   : > { %v934_v43 = vadd.f32 %v920_v41, %v794_v36  ;;  %v2049_v44 = vpop.f32.mrb[10].mxu0  ;;  %v1040_v45 = vpop.f32.mrb[9].mxu1 }
 0x13d   : > { %v1056_v46 = vadd.f32 %v2068_v42, %v936_v40  ;;  %v923_v47 = vpop.f32.mrb[11].mxu0  ;;  %v2069_v48 = vpop.f32.mrb[10].mxu1 }
 0x13e   : > { %v935_v49 = vadd.f32 %v923_v47, %v795_v38  ;;  %v1054_v50 = vadd.f32 %v1040_v45, %v934_v43  ;;  %v1043_v51 = vpop.f32.mrb[11].mxu1 }
 0x140   : > { %v1055_v52 = vadd.f32 %v1043_v51, %v935_v49 }
 0x15a   : > { %v2088_v53 = vpop.f32.mrb[12].mxu0 }
 0x15b   : > { %v1192_v54 = vadd.f32 %v2088_v53, %v1056_v46  ;;  %v1176_v55 = vpop.f32.mrb[13].mxu0  ;;  %v2108_v56 = vpop.f32.mrb[12].mxu1 }
 0x15c   : > { %v1190_v57 = vadd.f32 %v1176_v55, %v1054_v50  ;;  %v2089_v58 = vpop.f32.mrb[14].mxu0  ;;  %v1316_v59 = vpop.f32.mrb[13].mxu1 }
 0x15d   : > { %v1332_v60 = vadd.f32 %v2108_v56, %v1192_v54  ;;  %v1179_v61 = vpop.f32.mrb[15].mxu0  ;;  %v2109_v62 = vpop.f32.mrb[14].mxu1 }
 0x15e   : > { %v1191_v63 = vadd.f32 %v1179_v61, %v1055_v52  ;;  %v1330_v0 = vadd.f32 %v1316_v59, %v1190_v57  ;;  %v1319_v1 = vpop.f32.mrb[15].mxu1 }
 0x160   : > { %v1331_v2 = vadd.f32 %v1319_v1, %v1191_v63 }
 0x17a   : > { %v2128_v5 = vpop.f32.mrb[16].mxu0 }
 0x17b   : > { %v1457_v7 = vadd.f32 %v2128_v5, %v1332_v60  ;;  %v1441_v9 = vpop.f32.mrb[17].mxu0 }
 0x17c   : > { %v1455_v10 = vadd.f32 %v1441_v9, %v1330_v0  ;;  %v2129_v14 = vpop.f32.mrb[18].mxu0 }
 0x17d   : > { %v1467_v15 = vadd.f32 %v1842_v6, %v1457_v7  ;;  %v1444_v16 = vpop.f32.mrb[19].mxu0 }
 0x17e   : > { %v1465_v17 = vadd.f32 %v1842_v6, %v1455_v10  ;;  %v1456_v12 = vadd.f32 %v1444_v16, %v1331_v2 }
 0x17f   : > { %v1476_v18 = vadd.f32 %v1473_v8, %v1467_v15 }
 0x180   : > { %v1474_v19 = vadd.f32 %v1853_v11, %v1465_v17  ;;  %v1466_v20 = vadd.f32 %v1842_v6, %v1456_v12 }
 0x181   : > { %v1479_v21 = vmax.f32 %v1476_v18, 0.0 }
 0x182   : > { %v1475_v23 = vadd.f32 %v1854_v13, %v1466_v20  ;;  %v1477_v25 = vmax.f32 %v1474_v19, 0.0 }
 0x183   : > { %v1850_v24 = vpack.c.bf16 %v1479_v21, %v1479_v21 }
 0x184   : > { %v1478_v27 = vmax.f32 %v1475_v23, 0.0 }
 0x185   : > { %1495 = vst [vmem:[%s279_s23 + $0x8] sm:$0xf] %v1850_v24 }
 0x186   : > { %v1858_v28 = vpack.c.bf16 %v1478_v27, %v1477_v25 }
 0x188   : > { %1859 = vst [vmem:[%s279_s23] sm:$0xff] %v1858_v28  }
 0x189 PF: > { %s14_s17 = sadd.s32 1, %s2263_s17   ;;  %s2622_s15 = smov %s2259_s16 }
 0x18a   : > { %p11_p5 = scmp.ge.s32.totalorder %s14_s17, 4   ;;  %s2623_s16 = smov %s2625_s18 }
 0x18c   :  { %13 = sbr.rel (!%p11_p5) target bundleno = 2 (0x2), region = 83 }

</bundles_post_ra>
